<compile_context>
chip_gen: v6e
topology: v6e:2x2x1
jax: 0.10.0
libtpu: 0.0.40
codegen_flags: <defaults>
</compile_context>

<pallas_src>
import functools

import numpy as np
import jax
import jax.numpy as jnp
from jax.experimental import pallas as pl
from jax.experimental.pallas import tpu as pltpu

V_TH = 1.0


def _round_up(x, m):
    return ((x + m - 1) // m) * m


def _tile_sum_abs(a):
    # (N, C) -> (1, 1) two-stage reduction (lane reduce then sublane reduce).
    return jnp.sum(jnp.sum(jnp.abs(a), axis=1, keepdims=True),
                   axis=0, keepdims=True)


# --------------------------------------------------------------------------
# Pallas kernel: in-kernel im2col (shifted-slice conv) + IF neuron updates.
# One grid step == one batch image.
# --------------------------------------------------------------------------
def _spiking_resblock_kernel(xph_ref, p1_ref, v1_ref, v2_ref, rmask_ref,
                             w1_ref, wsk_ref, w2_ref, b1_ref, b2sk_ref,
                             v1n_ref, out1n_ref, v2n_ref, out2n_ref,
                             cnt1_ref, cnt2_ref,
                             *, stride, grid_w, gx, g1):
    f32 = jnp.float32
    R = v1_ref.shape[1]          # (Ho+2)*(Wo+2) rows of the padded output grid
    Cp = v1_ref.shape[2]         # output channels padded to a 128 multiple
    mask = rmask_ref[...]        # (R, 1) 1.0 on interior rows, 0.0 on borders

    # ---- conv1 (3x3, stride s, pad 1): 9 statically shifted contiguous slices
    #      of the phase-decomposed input, each a (R, Cin) x (Cin, Cp) MXU dot.
    acc1 = jnp.zeros((R, Cp), f32)
    x_center = None
    for dy in range(3):
        for dx in range(3):
            ph = (dy % stride) * stride + (dx % stride)
            sh = (dy // stride - 1) * grid_w + (dx // stride - 1)
            xin = xph_ref[0, ph, gx + sh:gx + sh + R, :]        # (R, Cin) bf16
            if dy == 1 and dx == 1:
                x_center = xin            # == x at the strided centres
            acc1 = acc1 + jnp.dot(xin, w1_ref[dy * 3 + dx],
                                  preferred_element_type=f32)

    # conv_skip (1x1, stride s, pad 0): small dot on the resident centre tap.
    csk = jnp.dot(x_center, wsk_ref[...], preferred_element_type=f32)

    # ---- IF neuron for conv1 (alpha=None); border rows masked so they never
    #      spike (they are the zero padding seen by conv2 next step).
    c1 = (acc1 + b1_ref[...]) * mask
    v1 = v1_ref[0] + c1
    spk1 = (v1 >= V_TH).astype(f32)
    v1n_ref[0] = v1 - spk1
    out1n_ref[0] = jnp.zeros(out1n_ref.shape[1:], jnp.bfloat16)  # guards/borders
    out1n_ref[0, g1:g1 + R, :] = spk1.astype(jnp.bfloat16)

    # ---- conv2 (3x3, stride 1, pad 1) on the PREVIOUS conv1 spikes, read
    #      directly in their persistent padded-grid layout (bf16 0/1).
    acc2 = jnp.zeros((R, Cp), f32)
    for dy in range(3):
        for dx in range(3):
            sh = (dy - 1) * grid_w + (dx - 1)
            pin = p1_ref[0, g1 + sh:g1 + sh + R, :]             # (R, Cp) bf16
            acc2 = acc2 + jnp.dot(pin, w2_ref[dy * 3 + dx],
                                  preferred_element_type=f32)

    # ---- residual add + SpikingAvgPool(kernel_size=1) == identity pool + IF.
    y_pre = (acc2 + b2sk_ref[...] + csk) * mask
    v2 = v2_ref[0] + y_pre
    spk2 = (v2 >= V_TH).astype(f32)
    v2n_ref[0] = v2 - spk2
    out2n_ref[0] = spk2.astype(jnp.bfloat16)

    # ---- spike-count partials (per image; reduced in the wrapper).
    s1 = jnp.zeros((1, 1), f32)
    for ph in range(xph_ref.shape[1]):
        s1 = s1 + _tile_sum_abs(xph_ref[0, ph].astype(f32))      # == sum|x|
    cnt1_ref[...] = jnp.broadcast_to(s1, (8, 128))
    cnt2_ref[...] = jnp.broadcast_to(_tile_sum_abs(y_pre), (8, 128))


# --------------------------------------------------------------------------
# Wrapper-side layout helpers (single pass over x, no im2col amplification)
# --------------------------------------------------------------------------
def _build_xph(x_nchw, stride, Ho, Wo, gx_top, gx_bot):
    """Phase-decompose (space-to-depth by `stride`) the zero-padded input and
    flatten each phase to (Ho+2)*(Wo+2) rows, plus top/bottom guard rows."""
    B, Cin, H, W = x_nchw.shape
    H2, W2 = Ho + 2, Wo + 2
    xh = jnp.transpose(x_nchw, (0, 2, 3, 1))                    # NHWC
    xp = jnp.pad(xh, ((0, 0), (1, 1), (1, 1), (0, 0)))          # conv pad ring
    phases = []
    for py in range(stride):
        for px in range(stride):
            g = xp[:, py::stride, px::stride, :]
            g = g[:, :H2, :W2, :]
            g = jnp.pad(g, ((0, 0), (0, H2 - g.shape[1]),
                            (0, W2 - g.shape[2]), (0, 0)))
            phases.append(g.reshape(B, H2 * W2, Cin))
    xph = jnp.stack(phases, axis=1)                              # (B, s*s, R, Cin)
    xph = jnp.pad(xph, ((0, 0), (0, 0), (gx_top, gx_bot), (0, 0)))
    return xph.astype(jnp.bfloat16)


def _row_mask(Ho, Wo):
    W2 = Wo + 2
    yy, xx = np.divmod(np.arange((Ho + 2) * W2), W2)
    m = ((yy >= 1) & (yy <= Ho) & (xx >= 1) & (xx <= Wo)).astype(np.float32)
    return jnp.asarray(m.reshape(-1, 1))


def rows_to_nchw(a, Ho, Wo, cout):
    """Kernel layout (B, (Ho+2)*(Wo+2), Cp) -> NCHW (B, cout, Ho, Wo)."""
    B = a.shape[0]
    g = a.reshape(B, Ho + 2, Wo + 2, a.shape[-1])[:, 1:Ho + 1, 1:Wo + 1, :cout]
    return jnp.transpose(g, (0, 3, 1, 2)).astype(jnp.float32)


def init_state(batch, Ho, Wo, cout_p):
    """Zero state in the persistent kernel layout (conv1.v, conv1.out, pool.v,
    pool.out).  conv1.out carries guard rows so conv2 can read it directly."""
    W2 = Wo + 2
    R = (Ho + 2) * W2
    g1 = _round_up(W2 + 1, 16)
    Rg1 = R + 2 * g1
    return (jnp.zeros((batch, R, cout_p), jnp.float32),
            jnp.zeros((batch, Rg1, cout_p), jnp.bfloat16),
            jnp.zeros((batch, R, cout_p), jnp.float32),
            jnp.zeros((batch, R, cout_p), jnp.bfloat16))


def prepare_params(w1, b1, w2, b2, wsk, bsk):
    """PyTorch-layout conv params -> per-tap, channel-padded, bf16 weights."""
    Cout, Cin = int(w1.shape[0]), int(w1.shape[1])
    Cp = _round_up(Cout, 128)
    pc = Cp - Cout
    w1_t = jnp.transpose(w1, (2, 3, 1, 0)).reshape(9, Cin, Cout)
    w1_t = jnp.pad(w1_t, ((0, 0), (0, 0), (0, pc))).astype(jnp.bfloat16)
    w2_t = jnp.transpose(w2, (2, 3, 1, 0)).reshape(9, Cout, Cout)
    w2_t = jnp.pad(w2_t, ((0, 0), (0, pc), (0, pc))).astype(jnp.bfloat16)
    wsk_t = jnp.pad(jnp.transpose(wsk[:, :, 0, 0], (1, 0)),
                    ((0, 0), (0, pc))).astype(jnp.bfloat16)
    b1p = jnp.pad(b1, (0, pc)).reshape(1, Cp).astype(jnp.float32)
    b2skp = jnp.pad(b2 + bsk, (0, pc)).reshape(1, Cp).astype(jnp.float32)
    return (w1_t, wsk_t, w2_t, b1p, b2skp)


def _vmem_limit_bytes(est_bytes):
    cap = 64 * 1024 * 1024                 # v7x floor; v5e/v6e have 128 MiB
    try:
        cap = int(pltpu.get_tpu_info().vmem_capacity_bytes)
    except Exception:
        pass
    want = 2 * est_bytes + (16 << 20)      # double-buffered blocks + headroom
    return int(min(max(want, 32 << 20), cap * 3 // 4))


# --------------------------------------------------------------------------
# One SpikingResBlock forward step (state passed/returned in kernel layout)
# --------------------------------------------------------------------------
def spiking_resblock_step(x, params, state, stride):
    assert stride in (1, 2), \
        "TODO(synk): generalize the phase decomposition for stride > 2"
    w1_t, wsk_t, w2_t, b1p, b2skp = params
    v1k, out1k, v2k, out2k = state
    B, Cin, H, W = x.shape
    Cp = int(w2_t.shape[-1])
    Ho = (H + 2 - 3) // stride + 1
    Wo = (W + 2 - 3) // stride + 1
    W2 = Wo + 2
    R = (Ho + 2) * W2
    g1 = _round_up(W2 + 1, 16)             # guard rows for the conv2 input
    gx_top = W2 + 1                        # guard rows for the conv1 input
    gx_bot = max(0, (2 // stride - 1) * (W2 + 1))
    nph = stride * stride
    Rgx = gx_top + R + gx_bot
    Rg1 = R + 2 * g1
    assert v1k.shape == (B, R, Cp) and out1k.shape == (B, Rg1, Cp)

    xph = _build_xph(x, stride, Ho, Wo, gx_top, gx_bot)
    rmask = _row_mask(Ho, Wo)

    kernel = functools.partial(_spiking_resblock_kernel, stride=stride,
                               grid_w=W2, gx=gx_top, g1=g1)

    def img3(d1, d2):
        return pl.BlockSpec((1, d1, d2), lambda b: (b, 0, 0))

    def img4(d1, d2, d3):
        return pl.BlockSpec((1, d1, d2, d3), lambda b: (b, 0, 0, 0))

    def full2(shape):
        return pl.BlockSpec(shape, lambda b: (0, 0))

    def full3(shape):
        return pl.BlockSpec(shape, lambda b: (0, 0, 0))

    # per-grid-step VMEM footprint (inputs + outputs + weights), all of which
    # Pallas double-buffers; used to pick the scoped VMEM limit per chip.
    est = (nph * Rgx * Cin * 2 + 2 * Rg1 * Cp * 2 + 4 * R * Cp * 4
           + R * Cp * 2 + R * 4
           + (9 * Cin + Cin + 9 * Cp) * Cp * 2 + 2 * Cp * 4 + 2 * 8 * 128 * 4)

    outs = pl.pallas_call(
        kernel,
        grid=(B,),
        in_specs=[img4(nph, Rgx, Cin),          # x, phase-decomposed (bf16)
                  img3(Rg1, Cp),                # previous conv1 spikes (bf16)
                  img3(R, Cp),                  # conv1 membrane v1 (f32)
                  img3(R, Cp),                  # pool membrane v2 (f32)
                  full2((R, 1)),                # interior-row mask
                  full3((9, Cin, Cp)),          # conv1 per-tap weights
                  full2((Cin, Cp)),             # skip 1x1 weight
                  full3((9, Cp, Cp)),           # conv2 per-tap weights
                  full2((1, Cp)),               # conv1 bias
                  full2((1, Cp))],              # conv2 + skip bias
        out_specs=[img3(R, Cp),                 # new v1
                   img3(Rg1, Cp),               # new conv1 spikes
                   img3(R, Cp),                 # new v2
                   img3(R, Cp),                 # new pool spikes
                   pl.BlockSpec((8, 128), lambda b: (b, 0)),   # sum|x| partial
                   pl.BlockSpec((8, 128), lambda b: (b, 0))],  # sum|ypre| part.
        out_shape=[jax.ShapeDtypeStruct((B, R, Cp), jnp.float32),
                   jax.ShapeDtypeStruct((B, Rg1, Cp), jnp.bfloat16),
                   jax.ShapeDtypeStruct((B, R, Cp), jnp.float32),
                   jax.ShapeDtypeStruct((B, R, Cp), jnp.bfloat16),
                   jax.ShapeDtypeStruct((B * 8, 128), jnp.float32),
                   jax.ShapeDtypeStruct((B * 8, 128), jnp.float32)],
        input_output_aliases={2: 0, 1: 1, 3: 2},   # v1, out1, v2 update in place
        compiler_params=pltpu.CompilerParams(
            dimension_semantics=("parallel",),
            vmem_limit_bytes=_vmem_limit_bytes(est)),
    )(xph, out1k, v1k, v2k, rmask, w1_t, wsk_t, w2_t, b1p, b2skp)

    v1n, out1n, v2n, out2n, c1p, c2p = outs
    y = out2k                                   # module output: previous pool spikes
    cnt1 = jnp.sum(c1p.reshape(B, 8, 128)[:, 0, 0])
    cnt2 = jnp.sum(c2p.reshape(B, 8, 128)[:, 0, 0])
    return y, (v1n, out1n, v2n, out2n), (cnt1, cnt2)


# --------------------------------------------------------------------------
# Pure-JAX reference (lax.conv) for self-check
# --------------------------------------------------------------------------
def _conv2d_ref(x, w, b, stride, pad):
    out = jax.lax.conv_general_dilated(
        x, w, window_strides=(stride, stride),
        padding=[(pad, pad), (pad, pad)],
        dimension_numbers=('NCHW', 'OIHW', 'NCHW'),
        precision=jax.lax.Precision.HIGHEST)
    return out + b[None, :, None, None]


def spiking_resblock_step_ref(x, raw_params, state, stride):
    w1, b1, w2, b2, wsk, bsk = raw_params
    v1, out1, v2, out2 = state
    c1 = _conv2d_ref(x, w1, b1, stride, 1)
    skip = _conv2d_ref(x, wsk, bsk, stride, 0)
    v1p = v1 + c1
    plus1 = (v1p >= V_TH).astype(jnp.float32)
    c2 = _conv2d_ref(out1, w2, b2, 1, 1)
    y_pre = c2 + skip
    v2p = v2 + y_pre
    plus2 = (v2p >= V_TH).astype(jnp.float32)
    new_state = (v1p - plus1, plus1, v2p - plus2, plus2)
    counts = (jnp.sum(jnp.abs(x)), jnp.sum(jnp.abs(y_pre)))
    return out2, new_state, counts


if __name__ == "__main__":
    key = jax.random.PRNGKey(0)
    B, Cin, H, W = 2, 4, 16, 16
    Cout, stride = 8, 2
    Ho = (H + 2 - 3) // stride + 1
    Wo = (W + 2 - 3) // stride + 1
    W2 = Wo + 2
    R = (Ho + 2) * W2
    g1 = _round_up(W2 + 1, 16)

    # Quantize weights / inputs to bf16-representable f32 so the bf16 MXU path
    # and the f32 reference see identical values (isolates kernel correctness).
    q = lambda a: a.astype(jnp.bfloat16).astype(jnp.float32)

    ks = jax.random.split(key, 6)
    w1 = q(jax.random.normal(ks[0], (Cout, Cin, 3, 3), jnp.float32) / np.sqrt(Cin * 9))
    b1 = q(0.1 * jax.random.normal(ks[1], (Cout,), jnp.float32))
    w2 = q(jax.random.normal(ks[2], (Cout, Cout, 3, 3), jnp.float32) / np.sqrt(Cout * 9))
    b2 = q(0.1 * jax.random.normal(ks[3], (Cout,), jnp.float32))
    wsk = q(jax.random.normal(ks[4], (Cout, Cin, 1, 1), jnp.float32) / np.sqrt(Cin))
    bsk = q(0.1 * jax.random.normal(ks[5], (Cout,), jnp.float32))

    params = prepare_params(w1, b1, w2, b2, wsk, bsk)
    raw_params = (w1, b1, w2, b2, wsk, bsk)
    Cp = int(params[2].shape[-1])

    state = init_state(B, Ho, Wo, Cp)           # kernel-layout state
    zeros = jnp.zeros((B, Cout, Ho, Wo), jnp.float32)
    state_ref = (zeros, zeros, zeros, zeros)

    step = jax.jit(spiking_resblock_step, static_argnums=(3,))

    ok = True
    for t in range(3):   # a few time-steps to exercise the stateful path
        x = q(jax.random.normal(jax.random.fold_in(key, 100 + t),
                                (B, Cin, H, W), jnp.float32))
        y, state, counts = step(x, params, state, stride)
        jax.block_until_ready(state)
        y_ref, state_ref, counts_ref = spiking_resblock_step_ref(
            x, raw_params, state_ref, stride)

        y_nchw = rows_to_nchw(y, Ho, Wo, Cout)
        ok &= np.allclose(np.asarray(y_nchw), np.asarray(y_ref),
                          atol=5e-2, rtol=5e-2)
        v1n, out1n, v2n, out2n = state
        comp = (rows_to_nchw(v1n, Ho, Wo, Cout),
                rows_to_nchw(out1n[:, g1:g1 + R, :], Ho, Wo, Cout),
                rows_to_nchw(v2n, Ho, Wo, Cout),
                rows_to_nchw(out2n, Ho, Wo, Cout))
        for pa, pb in zip(comp, state_ref):
            ok &= np.allclose(np.asarray(pa), np.asarray(pb),
                              atol=5e-2, rtol=5e-2)
        for pa, pb in zip(counts, counts_ref):
            ok &= np.allclose(float(pa), float(pb), rtol=5e-2)

    if bool(ok):
        print("KERNEL_OK")
    else:
        raise SystemExit("mismatch vs reference")
</pallas_src>

<mosaic_0001>
module attributes {stable_mosaic.version = 11 : i64} {
  func.func @_spiking_resblock_kernel(%arg0: i32, %arg1: memref<1x4x111x4xbf16, #tpu.memory_space<vmem>>, %arg2: memref<1x132x128xbf16, #tpu.memory_space<vmem>>, %arg3: memref<1x100x128xf32, #tpu.memory_space<vmem>>, %arg4: memref<1x100x128xf32, #tpu.memory_space<vmem>>, %arg5: memref<100x1xf32, #tpu.memory_space<vmem>>, %arg6: memref<9x4x128xbf16, #tpu.memory_space<vmem>>, %arg7: memref<4x128xbf16, #tpu.memory_space<vmem>>, %arg8: memref<9x128x128xbf16, #tpu.memory_space<vmem>>, %arg9: memref<1x128xf32, #tpu.memory_space<vmem>>, %arg10: memref<1x128xf32, #tpu.memory_space<vmem>>, %arg11: memref<1x100x128xf32, #tpu.memory_space<vmem>>, %arg12: memref<1x132x128xbf16, #tpu.memory_space<vmem>>, %arg13: memref<1x100x128xf32, #tpu.memory_space<vmem>>, %arg14: memref<1x100x128xbf16, #tpu.memory_space<vmem>>, %arg15: memref<8x128xf32, #tpu.memory_space<vmem>>, %arg16: memref<8x128xf32, #tpu.memory_space<vmem>>) attributes {dimension_semantics = [#tpu.dimension_semantics<parallel>], iteration_bounds = array<i64: 2>, scalar_prefetch = 0 : i64, scratch_operands = 0 : i64, tpu.core_type = #tpu.core_type<tc>, window_params = [{transform_indices = @transform_0, window_bounds = array<i64: 1, 4, 111, 4>}, {transform_indices = @transform_1, window_bounds = array<i64: 1, 132, 128>}, {transform_indices = @transform_2, window_bounds = array<i64: 1, 100, 128>}, {transform_indices = @transform_3, window_bounds = array<i64: 1, 100, 128>}, {pipeline_mode = #tpu.pipeline_mode<synchronous>, transform_indices = @transform_4, window_bounds = array<i64: 100, 1>}, {pipeline_mode = #tpu.pipeline_mode<synchronous>, transform_indices = @transform_5, window_bounds = array<i64: 9, 4, 128>}, {pipeline_mode = #tpu.pipeline_mode<synchronous>, transform_indices = @transform_6, window_bounds = array<i64: 4, 128>}, {pipeline_mode = #tpu.pipeline_mode<synchronous>, transform_indices = @transform_7, window_bounds = array<i64: 9, 128, 128>}, {pipeline_mode = #tpu.pipeline_mode<synchronous>, transform_indices = @transform_8, window_bounds = array<i64: 1, 128>}, {pipeline_mode = #tpu.pipeline_mode<synchronous>, transform_indices = @transform_9, window_bounds = array<i64: 1, 128>}, {transform_indices = @transform_10, window_bounds = array<i64: 1, 100, 128>}, {transform_indices = @transform_11, window_bounds = array<i64: 1, 132, 128>}, {transform_indices = @transform_12, window_bounds = array<i64: 1, 100, 128>}, {transform_indices = @transform_13, window_bounds = array<i64: 1, 100, 128>}, {transform_indices = @transform_14, window_bounds = array<i64: 8, 128>}, {transform_indices = @transform_15, window_bounds = array<i64: 8, 128>}]} {
    %c0 = arith.constant 0 : index
    %c0_0 = arith.constant 0 : index
    %0 = vector.load %arg5[%c0, %c0_0] : memref<100x1xf32, #tpu.memory_space<vmem>>, vector<100x1xf32>
    %cst = arith.constant 0.000000e+00 : f32
    %1 = vector.broadcast %cst : f32 to vector<100x128xf32>
    %c0_1 = arith.constant 0 : index
    %c0_2 = arith.constant 0 : index
    %c0_3 = arith.constant 0 : index
    %c0_4 = arith.constant 0 : index
    %2 = vector.load %arg1[%c0_1, %c0_2, %c0_3, %c0_4] : memref<1x4x111x4xbf16, #tpu.memory_space<vmem>>, vector<1x1x100x4xbf16>
    %3 = vector.shape_cast %2 : vector<1x1x100x4xbf16> to vector<100x4xbf16>
    %c0_5 = arith.constant 0 : index
    %c0_6 = arith.constant 0 : index
    %c0_7 = arith.constant 0 : index
    %4 = vector.load %arg6[%c0_5, %c0_6, %c0_7] : memref<9x4x128xbf16, #tpu.memory_space<vmem>>, vector<1x4x128xbf16>
    %5 = vector.shape_cast %4 : vector<1x4x128xbf16> to vector<4x128xbf16>
    %cst_8 = arith.constant dense<0.000000e+00> : vector<100x128xf32>
    %6 = tpu.matmul %3, %5, %cst_8 {dimension_numbers = #tpu.dot_dimension_numbers<[1], [0], [0], [1], [0, 0, 1, 1], [], []>} : vector<100x4xbf16>, vector<4x128xbf16>, vector<100x128xf32> -> vector<100x128xf32>
    %7 = arith.addf %1, %6 : vector<100x128xf32>
    %c0_9 = arith.constant 0 : index
    %c1 = arith.constant 1 : index
    %c0_10 = arith.constant 0 : index
    %c0_11 = arith.constant 0 : index
    %8 = vector.load %arg1[%c0_9, %c1, %c0_10, %c0_11] : memref<1x4x111x4xbf16, #tpu.memory_space<vmem>>, vector<1x1x100x4xbf16>
    %9 = vector.shape_cast %8 : vector<1x1x100x4xbf16> to vector<100x4xbf16>
    %c1_12 = arith.constant 1 : index
    %c0_13 = arith.constant 0 : index
    %c0_14 = arith.constant 0 : index
    %10 = vector.load %arg6[%c1_12, %c0_13, %c0_14] : memref<9x4x128xbf16, #tpu.memory_space<vmem>>, vector<1x4x128xbf16>
    %11 = vector.shape_cast %10 : vector<1x4x128xbf16> to vector<4x128xbf16>
    %cst_15 = arith.constant dense<0.000000e+00> : vector<100x128xf32>
    %12 = tpu.matmul %9, %11, %cst_15 {dimension_numbers = #tpu.dot_dimension_numbers<[1], [0], [0], [1], [0, 0, 1, 1], [], []>} : vector<100x4xbf16>, vector<4x128xbf16>, vector<100x128xf32> -> vector<100x128xf32>
    %13 = arith.addf %7, %12 : vector<100x128xf32>
    %c0_16 = arith.constant 0 : index
    %c0_17 = arith.constant 0 : index
    %c1_18 = arith.constant 1 : index
    %c0_19 = arith.constant 0 : index
    %14 = vector.load %arg1[%c0_16, %c0_17, %c1_18, %c0_19] : memref<1x4x111x4xbf16, #tpu.memory_space<vmem>>, vector<1x1x100x4xbf16>
    %15 = vector.shape_cast %14 : vector<1x1x100x4xbf16> to vector<100x4xbf16>
    %c2 = arith.constant 2 : index
    %c0_20 = arith.constant 0 : index
    %c0_21 = arith.constant 0 : index
    %16 = vector.load %arg6[%c2, %c0_20, %c0_21] : memref<9x4x128xbf16, #tpu.memory_space<vmem>>, vector<1x4x128xbf16>
    %17 = vector.shape_cast %16 : vector<1x4x128xbf16> to vector<4x128xbf16>
    %cst_22 = arith.constant dense<0.000000e+00> : vector<100x128xf32>
    %18 = tpu.matmul %15, %17, %cst_22 {dimension_numbers = #tpu.dot_dimension_numbers<[1], [0], [0], [1], [0, 0, 1, 1], [], []>} : vector<100x4xbf16>, vector<4x128xbf16>, vector<100x128xf32> -> vector<100x128xf32>
    %19 = arith.addf %13, %18 : vector<100x128xf32>
    %c0_23 = arith.constant 0 : index
    %c2_24 = arith.constant 2 : index
    %c0_25 = arith.constant 0 : index
    %c0_26 = arith.constant 0 : index
    %20 = vector.load %arg1[%c0_23, %c2_24, %c0_25, %c0_26] : memref<1x4x111x4xbf16, #tpu.memory_space<vmem>>, vector<1x1x100x4xbf16>
    %21 = vector.shape_cast %20 : vector<1x1x100x4xbf16> to vector<100x4xbf16>
    %c3 = arith.constant 3 : index
    %c0_27 = arith.constant 0 : index
    %c0_28 = arith.constant 0 : index
    %22 = vector.load %arg6[%c3, %c0_27, %c0_28] : memref<9x4x128xbf16, #tpu.memory_space<vmem>>, vector<1x4x128xbf16>
    %23 = vector.shape_cast %22 : vector<1x4x128xbf16> to vector<4x128xbf16>
    %cst_29 = arith.constant dense<0.000000e+00> : vector<100x128xf32>
    %24 = tpu.matmul %21, %23, %cst_29 {dimension_numbers = #tpu.dot_dimension_numbers<[1], [0], [0], [1], [0, 0, 1, 1], [], []>} : vector<100x4xbf16>, vector<4x128xbf16>, vector<100x128xf32> -> vector<100x128xf32>
    %25 = arith.addf %19, %24 : vector<100x128xf32>
    %c0_30 = arith.constant 0 : index
    %c3_31 = arith.constant 3 : index
    %c0_32 = arith.constant 0 : index
    %c0_33 = arith.constant 0 : index
    %26 = vector.load %arg1[%c0_30, %c3_31, %c0_32, %c0_33] : memref<1x4x111x4xbf16, #tpu.memory_space<vmem>>, vector<1x1x100x4xbf16>
    %27 = vector.shape_cast %26 : vector<1x1x100x4xbf16> to vector<100x4xbf16>
    %c4 = arith.constant 4 : index
    %c0_34 = arith.constant 0 : index
    %c0_35 = arith.constant 0 : index
    %28 = vector.load %arg6[%c4, %c0_34, %c0_35] : memref<9x4x128xbf16, #tpu.memory_space<vmem>>, vector<1x4x128xbf16>
    %29 = vector.shape_cast %28 : vector<1x4x128xbf16> to vector<4x128xbf16>
    %cst_36 = arith.constant dense<0.000000e+00> : vector<100x128xf32>
    %30 = tpu.matmul %27, %29, %cst_36 {dimension_numbers = #tpu.dot_dimension_numbers<[1], [0], [0], [1], [0, 0, 1, 1], [], []>} : vector<100x4xbf16>, vector<4x128xbf16>, vector<100x128xf32> -> vector<100x128xf32>
    %31 = arith.addf %25, %30 : vector<100x128xf32>
    %c0_37 = arith.constant 0 : index
    %c2_38 = arith.constant 2 : index
    %c1_39 = arith.constant 1 : index
    %c0_40 = arith.constant 0 : index
    %32 = vector.load %arg1[%c0_37, %c2_38, %c1_39, %c0_40] : memref<1x4x111x4xbf16, #tpu.memory_space<vmem>>, vector<1x1x100x4xbf16>
    %33 = vector.shape_cast %32 : vector<1x1x100x4xbf16> to vector<100x4xbf16>
    %c5 = arith.constant 5 : index
    %c0_41 = arith.constant 0 : index
    %c0_42 = arith.constant 0 : index
    %34 = vector.load %arg6[%c5, %c0_41, %c0_42] : memref<9x4x128xbf16, #tpu.memory_space<vmem>>, vector<1x4x128xbf16>
    %35 = vector.shape_cast %34 : vector<1x4x128xbf16> to vector<4x128xbf16>
    %cst_43 = arith.constant dense<0.000000e+00> : vector<100x128xf32>
    %36 = tpu.matmul %33, %35, %cst_43 {dimension_numbers = #tpu.dot_dimension_numbers<[1], [0], [0], [1], [0, 0, 1, 1], [], []>} : vector<100x4xbf16>, vector<4x128xbf16>, vector<100x128xf32> -> vector<100x128xf32>
    %37 = arith.addf %31, %36 : vector<100x128xf32>
    %c0_44 = arith.constant 0 : index
    %c0_45 = arith.constant 0 : index
    %c10 = arith.constant 10 : index
    %c0_46 = arith.constant 0 : index
    %38 = vector.load %arg1[%c0_44, %c0_45, %c10, %c0_46] : memref<1x4x111x4xbf16, #tpu.memory_space<vmem>>, vector<1x1x100x4xbf16>
    %39 = vector.shape_cast %38 : vector<1x1x100x4xbf16> to vector<100x4xbf16>
    %c6 = arith.constant 6 : index
    %c0_47 = arith.constant 0 : index
    %c0_48 = arith.constant 0 : index
    %40 = vector.load %arg6[%c6, %c0_47, %c0_48] : memref<9x4x128xbf16, #tpu.memory_space<vmem>>, vector<1x4x128xbf16>
    %41 = vector.shape_cast %40 : vector<1x4x128xbf16> to vector<4x128xbf16>
    %cst_49 = arith.constant dense<0.000000e+00> : vector<100x128xf32>
    %42 = tpu.matmul %39, %41, %cst_49 {dimension_numbers = #tpu.dot_dimension_numbers<[1], [0], [0], [1], [0, 0, 1, 1], [], []>} : vector<100x4xbf16>, vector<4x128xbf16>, vector<100x128xf32> -> vector<100x128xf32>
    %43 = arith.addf %37, %42 : vector<100x128xf32>
    %c0_50 = arith.constant 0 : index
    %c1_51 = arith.constant 1 : index
    %c10_52 = arith.constant 10 : index
    %c0_53 = arith.constant 0 : index
    %44 = vector.load %arg1[%c0_50, %c1_51, %c10_52, %c0_53] : memref<1x4x111x4xbf16, #tpu.memory_space<vmem>>, vector<1x1x100x4xbf16>
    %45 = vector.shape_cast %44 : vector<1x1x100x4xbf16> to vector<100x4xbf16>
    %c7 = arith.constant 7 : index
    %c0_54 = arith.constant 0 : index
    %c0_55 = arith.constant 0 : index
    %46 = vector.load %arg6[%c7, %c0_54, %c0_55] : memref<9x4x128xbf16, #tpu.memory_space<vmem>>, vector<1x4x128xbf16>
    %47 = vector.shape_cast %46 : vector<1x4x128xbf16> to vector<4x128xbf16>
    %cst_56 = arith.constant dense<0.000000e+00> : vector<100x128xf32>
    %48 = tpu.matmul %45, %47, %cst_56 {dimension_numbers = #tpu.dot_dimension_numbers<[1], [0], [0], [1], [0, 0, 1, 1], [], []>} : vector<100x4xbf16>, vector<4x128xbf16>, vector<100x128xf32> -> vector<100x128xf32>
    %49 = arith.addf %43, %48 : vector<100x128xf32>
    %c0_57 = arith.constant 0 : index
    %c0_58 = arith.constant 0 : index
    %c11 = arith.constant 11 : index
    %c0_59 = arith.constant 0 : index
    %50 = vector.load %arg1[%c0_57, %c0_58, %c11, %c0_59] : memref<1x4x111x4xbf16, #tpu.memory_space<vmem>>, vector<1x1x100x4xbf16>
    %51 = vector.shape_cast %50 : vector<1x1x100x4xbf16> to vector<100x4xbf16>
    %c8 = arith.constant 8 : index
    %c0_60 = arith.constant 0 : index
    %c0_61 = arith.constant 0 : index
    %52 = vector.load %arg6[%c8, %c0_60, %c0_61] : memref<9x4x128xbf16, #tpu.memory_space<vmem>>, vector<1x4x128xbf16>
    %53 = vector.shape_cast %52 : vector<1x4x128xbf16> to vector<4x128xbf16>
    %cst_62 = arith.constant dense<0.000000e+00> : vector<100x128xf32>
    %54 = tpu.matmul %51, %53, %cst_62 {dimension_numbers = #tpu.dot_dimension_numbers<[1], [0], [0], [1], [0, 0, 1, 1], [], []>} : vector<100x4xbf16>, vector<4x128xbf16>, vector<100x128xf32> -> vector<100x128xf32>
    %55 = arith.addf %49, %54 : vector<100x128xf32>
    %c0_63 = arith.constant 0 : index
    %c0_64 = arith.constant 0 : index
    %56 = vector.load %arg7[%c0_63, %c0_64] : memref<4x128xbf16, #tpu.memory_space<vmem>>, vector<4x128xbf16>
    %cst_65 = arith.constant dense<0.000000e+00> : vector<100x128xf32>
    %57 = tpu.matmul %27, %56, %cst_65 {dimension_numbers = #tpu.dot_dimension_numbers<[1], [0], [0], [1], [0, 0, 1, 1], [], []>} : vector<100x4xbf16>, vector<4x128xbf16>, vector<100x128xf32> -> vector<100x128xf32>
    %c0_66 = arith.constant 0 : index
    %c0_67 = arith.constant 0 : index
    %58 = vector.load %arg9[%c0_66, %c0_67] : memref<1x128xf32, #tpu.memory_space<vmem>>, vector<1x128xf32>
    %59 = vector.broadcast %58 : vector<1x128xf32> to vector<100x128xf32>
    %60 = arith.addf %55, %59 : vector<100x128xf32>
    %61 = vector.broadcast %0 : vector<100x1xf32> to vector<100x128xf32>
    %62 = arith.mulf %60, %61 : vector<100x128xf32>
    %c0_68 = arith.constant 0 : index
    %c0_69 = arith.constant 0 : index
    %c0_70 = arith.constant 0 : index
    %63 = vector.load %arg3[%c0_68, %c0_69, %c0_70] : memref<1x100x128xf32, #tpu.memory_space<vmem>>, vector<1x100x128xf32>
    %64 = vector.shape_cast %63 : vector<1x100x128xf32> to vector<100x128xf32>
    %65 = arith.addf %64, %62 : vector<100x128xf32>
    %cst_71 = arith.constant 1.000000e+00 : f32
    %66 = vector.broadcast %cst_71 : f32 to vector<100x128xf32>
    %67 = arith.cmpf oge, %65, %66 : vector<100x128xf32>
    %68 = arith.extui %67 : vector<100x128xi1> to vector<100x128xi32>
    %69 = arith.sitofp %68 : vector<100x128xi32> to vector<100x128xf32>
    %70 = arith.subf %65, %69 : vector<100x128xf32>
    %c0_72 = arith.constant 0 : index
    %c0_73 = arith.constant 0 : index
    %c0_74 = arith.constant 0 : index
    %71 = vector.load %arg11[%c0_72, %c0_73, %c0_74] : memref<1x100x128xf32, #tpu.memory_space<vmem>>, vector<1x100x128xf32>
    %72 = vector.shape_cast %71 : vector<1x100x128xf32> to vector<100x128xf32>
    %73 = vector.shape_cast %70 : vector<100x128xf32> to vector<1x100x128xf32>
    tpu.vector_store %arg11[%c0_72, %c0_73, %c0_74], %73 {strides = array<i32>} : memref<1x100x128xf32, #tpu.memory_space<vmem>>, vector<1x100x128xf32>,
    %cst_75 = arith.constant 0.000000e+00 : bf16
    %74 = vector.broadcast %cst_75 : bf16 to vector<132x128xbf16>
    %c0_76 = arith.constant 0 : index
    %c0_77 = arith.constant 0 : index
    %c0_78 = arith.constant 0 : index
    %75 = vector.load %arg12[%c0_76, %c0_77, %c0_78] : memref<1x132x128xbf16, #tpu.memory_space<vmem>>, vector<1x132x128xbf16>
    %76 = vector.shape_cast %75 : vector<1x132x128xbf16> to vector<132x128xbf16>
    %77 = vector.shape_cast %74 : vector<132x128xbf16> to vector<1x132x128xbf16>
    tpu.vector_store %arg12[%c0_76, %c0_77, %c0_78], %77 {strides = array<i32>} : memref<1x132x128xbf16, #tpu.memory_space<vmem>>, vector<1x132x128xbf16>,
    %78 = arith.truncf %69 : vector<100x128xf32> to vector<100x128xbf16>
    %c0_79 = arith.constant 0 : index
    %c16 = arith.constant 16 : index
    %c0_80 = arith.constant 0 : index
    %79 = vector.load %arg12[%c0_79, %c16, %c0_80] : memref<1x132x128xbf16, #tpu.memory_space<vmem>>, vector<1x100x128xbf16>
    %80 = vector.shape_cast %79 : vector<1x100x128xbf16> to vector<100x128xbf16>
    %81 = vector.shape_cast %78 : vector<100x128xbf16> to vector<1x100x128xbf16>
    tpu.vector_store %arg12[%c0_79, %c16, %c0_80], %81 {strides = array<i32>} : memref<1x132x128xbf16, #tpu.memory_space<vmem>>, vector<1x100x128xbf16>,
    %cst_81 = arith.constant 0.000000e+00 : f32
    %82 = vector.broadcast %cst_81 : f32 to vector<100x128xf32>
    %c0_82 = arith.constant 0 : index
    %c5_83 = arith.constant 5 : index
    %c0_84 = arith.constant 0 : index
    %83 = vector.load %arg2[%c0_82, %c5_83, %c0_84] : memref<1x132x128xbf16, #tpu.memory_space<vmem>>, vector<1x100x128xbf16>
    %84 = vector.shape_cast %83 : vector<1x100x128xbf16> to vector<100x128xbf16>
    %c0_85 = arith.constant 0 : index
    %c0_86 = arith.constant 0 : index
    %c0_87 = arith.constant 0 : index
    %85 = vector.load %arg8[%c0_85, %c0_86, %c0_87] : memref<9x128x128xbf16, #tpu.memory_space<vmem>>, vector<1x128x128xbf16>
    %86 = vector.shape_cast %85 : vector<1x128x128xbf16> to vector<128x128xbf16>
    %cst_88 = arith.constant dense<0.000000e+00> : vector<100x128xf32>
    %87 = tpu.matmul %84, %86, %cst_88 {dimension_numbers = #tpu.dot_dimension_numbers<[1], [0], [0], [1], [0, 0, 1, 1], [], []>} : vector<100x128xbf16>, vector<128x128xbf16>, vector<100x128xf32> -> vector<100x128xf32>
    %88 = arith.addf %82, %87 : vector<100x128xf32>
    %c0_89 = arith.constant 0 : index
    %c6_90 = arith.constant 6 : index
    %c0_91 = arith.constant 0 : index
    %89 = vector.load %arg2[%c0_89, %c6_90, %c0_91] : memref<1x132x128xbf16, #tpu.memory_space<vmem>>, vector<1x100x128xbf16>
    %90 = vector.shape_cast %89 : vector<1x100x128xbf16> to vector<100x128xbf16>
    %c1_92 = arith.constant 1 : index
    %c0_93 = arith.constant 0 : index
    %c0_94 = arith.constant 0 : index
    %91 = vector.load %arg8[%c1_92, %c0_93, %c0_94] : memref<9x128x128xbf16, #tpu.memory_space<vmem>>, vector<1x128x128xbf16>
    %92 = vector.shape_cast %91 : vector<1x128x128xbf16> to vector<128x128xbf16>
    %cst_95 = arith.constant dense<0.000000e+00> : vector<100x128xf32>
    %93 = tpu.matmul %90, %92, %cst_95 {dimension_numbers = #tpu.dot_dimension_numbers<[1], [0], [0], [1], [0, 0, 1, 1], [], []>} : vector<100x128xbf16>, vector<128x128xbf16>, vector<100x128xf32> -> vector<100x128xf32>
    %94 = arith.addf %88, %93 : vector<100x128xf32>
    %c0_96 = arith.constant 0 : index
    %c7_97 = arith.constant 7 : index
    %c0_98 = arith.constant 0 : index
    %95 = vector.load %arg2[%c0_96, %c7_97, %c0_98] : memref<1x132x128xbf16, #tpu.memory_space<vmem>>, vector<1x100x128xbf16>
    %96 = vector.shape_cast %95 : vector<1x100x128xbf16> to vector<100x128xbf16>
    %c2_99 = arith.constant 2 : index
    %c0_100 = arith.constant 0 : index
    %c0_101 = arith.constant 0 : index
    %97 = vector.load %arg8[%c2_99, %c0_100, %c0_101] : memref<9x128x128xbf16, #tpu.memory_space<vmem>>, vector<1x128x128xbf16>
    %98 = vector.shape_cast %97 : vector<1x128x128xbf16> to vector<128x128xbf16>
    %cst_102 = arith.constant dense<0.000000e+00> : vector<100x128xf32>
    %99 = tpu.matmul %96, %98, %cst_102 {dimension_numbers = #tpu.dot_dimension_numbers<[1], [0], [0], [1], [0, 0, 1, 1], [], []>} : vector<100x128xbf16>, vector<128x128xbf16>, vector<100x128xf32> -> vector<100x128xf32>
    %100 = arith.addf %94, %99 : vector<100x128xf32>
    %c0_103 = arith.constant 0 : index
    %c15 = arith.constant 15 : index
    %c0_104 = arith.constant 0 : index
    %101 = vector.load %arg2[%c0_103, %c15, %c0_104] : memref<1x132x128xbf16, #tpu.memory_space<vmem>>, vector<1x100x128xbf16>
    %102 = vector.shape_cast %101 : vector<1x100x128xbf16> to vector<100x128xbf16>
    %c3_105 = arith.constant 3 : index
    %c0_106 = arith.constant 0 : index
    %c0_107 = arith.constant 0 : index
    %103 = vector.load %arg8[%c3_105, %c0_106, %c0_107] : memref<9x128x128xbf16, #tpu.memory_space<vmem>>, vector<1x128x128xbf16>
    %104 = vector.shape_cast %103 : vector<1x128x128xbf16> to vector<128x128xbf16>
    %cst_108 = arith.constant dense<0.000000e+00> : vector<100x128xf32>
    %105 = tpu.matmul %102, %104, %cst_108 {dimension_numbers = #tpu.dot_dimension_numbers<[1], [0], [0], [1], [0, 0, 1, 1], [], []>} : vector<100x128xbf16>, vector<128x128xbf16>, vector<100x128xf32> -> vector<100x128xf32>
    %106 = arith.addf %100, %105 : vector<100x128xf32>
    %c0_109 = arith.constant 0 : index
    %c16_110 = arith.constant 16 : index
    %c0_111 = arith.constant 0 : index
    %107 = vector.load %arg2[%c0_109, %c16_110, %c0_111] : memref<1x132x128xbf16, #tpu.memory_space<vmem>>, vector<1x100x128xbf16>
    %108 = vector.shape_cast %107 : vector<1x100x128xbf16> to vector<100x128xbf16>
    %c4_112 = arith.constant 4 : index
    %c0_113 = arith.constant 0 : index
    %c0_114 = arith.constant 0 : index
    %109 = vector.load %arg8[%c4_112, %c0_113, %c0_114] : memref<9x128x128xbf16, #tpu.memory_space<vmem>>, vector<1x128x128xbf16>
    %110 = vector.shape_cast %109 : vector<1x128x128xbf16> to vector<128x128xbf16>
    %cst_115 = arith.constant dense<0.000000e+00> : vector<100x128xf32>
    %111 = tpu.matmul %108, %110, %cst_115 {dimension_numbers = #tpu.dot_dimension_numbers<[1], [0], [0], [1], [0, 0, 1, 1], [], []>} : vector<100x128xbf16>, vector<128x128xbf16>, vector<100x128xf32> -> vector<100x128xf32>
    %112 = arith.addf %106, %111 : vector<100x128xf32>
    %c0_116 = arith.constant 0 : index
    %c17 = arith.constant 17 : index
    %c0_117 = arith.constant 0 : index
    %113 = vector.load %arg2[%c0_116, %c17, %c0_117] : memref<1x132x128xbf16, #tpu.memory_space<vmem>>, vector<1x100x128xbf16>
    %114 = vector.shape_cast %113 : vector<1x100x128xbf16> to vector<100x128xbf16>
    %c5_118 = arith.constant 5 : index
    %c0_119 = arith.constant 0 : index
    %c0_120 = arith.constant 0 : index
    %115 = vector.load %arg8[%c5_118, %c0_119, %c0_120] : memref<9x128x128xbf16, #tpu.memory_space<vmem>>, vector<1x128x128xbf16>
    %116 = vector.shape_cast %115 : vector<1x128x128xbf16> to vector<128x128xbf16>
    %cst_121 = arith.constant dense<0.000000e+00> : vector<100x128xf32>
    %117 = tpu.matmul %114, %116, %cst_121 {dimension_numbers = #tpu.dot_dimension_numbers<[1], [0], [0], [1], [0, 0, 1, 1], [], []>} : vector<100x128xbf16>, vector<128x128xbf16>, vector<100x128xf32> -> vector<100x128xf32>
    %118 = arith.addf %112, %117 : vector<100x128xf32>
    %c0_122 = arith.constant 0 : index
    %c25 = arith.constant 25 : index
    %c0_123 = arith.constant 0 : index
    %119 = vector.load %arg2[%c0_122, %c25, %c0_123] : memref<1x132x128xbf16, #tpu.memory_space<vmem>>, vector<1x100x128xbf16>
    %120 = vector.shape_cast %119 : vector<1x100x128xbf16> to vector<100x128xbf16>
    %c6_124 = arith.constant 6 : index
    %c0_125 = arith.constant 0 : index
    %c0_126 = arith.constant 0 : index
    %121 = vector.load %arg8[%c6_124, %c0_125, %c0_126] : memref<9x128x128xbf16, #tpu.memory_space<vmem>>, vector<1x128x128xbf16>
    %122 = vector.shape_cast %121 : vector<1x128x128xbf16> to vector<128x128xbf16>
    %cst_127 = arith.constant dense<0.000000e+00> : vector<100x128xf32>
    %123 = tpu.matmul %120, %122, %cst_127 {dimension_numbers = #tpu.dot_dimension_numbers<[1], [0], [0], [1], [0, 0, 1, 1], [], []>} : vector<100x128xbf16>, vector<128x128xbf16>, vector<100x128xf32> -> vector<100x128xf32>
    %124 = arith.addf %118, %123 : vector<100x128xf32>
    %c0_128 = arith.constant 0 : index
    %c26 = arith.constant 26 : index
    %c0_129 = arith.constant 0 : index
    %125 = vector.load %arg2[%c0_128, %c26, %c0_129] : memref<1x132x128xbf16, #tpu.memory_space<vmem>>, vector<1x100x128xbf16>
    %126 = vector.shape_cast %125 : vector<1x100x128xbf16> to vector<100x128xbf16>
    %c7_130 = arith.constant 7 : index
    %c0_131 = arith.constant 0 : index
    %c0_132 = arith.constant 0 : index
    %127 = vector.load %arg8[%c7_130, %c0_131, %c0_132] : memref<9x128x128xbf16, #tpu.memory_space<vmem>>, vector<1x128x128xbf16>
    %128 = vector.shape_cast %127 : vector<1x128x128xbf16> to vector<128x128xbf16>
    %cst_133 = arith.constant dense<0.000000e+00> : vector<100x128xf32>
    %129 = tpu.matmul %126, %128, %cst_133 {dimension_numbers = #tpu.dot_dimension_numbers<[1], [0], [0], [1], [0, 0, 1, 1], [], []>} : vector<100x128xbf16>, vector<128x128xbf16>, vector<100x128xf32> -> vector<100x128xf32>
    %130 = arith.addf %124, %129 : vector<100x128xf32>
    %c0_134 = arith.constant 0 : index
    %c27 = arith.constant 27 : index
    %c0_135 = arith.constant 0 : index
    %131 = vector.load %arg2[%c0_134, %c27, %c0_135] : memref<1x132x128xbf16, #tpu.memory_space<vmem>>, vector<1x100x128xbf16>
    %132 = vector.shape_cast %131 : vector<1x100x128xbf16> to vector<100x128xbf16>
    %c8_136 = arith.constant 8 : index
    %c0_137 = arith.constant 0 : index
    %c0_138 = arith.constant 0 : index
    %133 = vector.load %arg8[%c8_136, %c0_137, %c0_138] : memref<9x128x128xbf16, #tpu.memory_space<vmem>>, vector<1x128x128xbf16>
    %134 = vector.shape_cast %133 : vector<1x128x128xbf16> to vector<128x128xbf16>
    %cst_139 = arith.constant dense<0.000000e+00> : vector<100x128xf32>
    %135 = tpu.matmul %132, %134, %cst_139 {dimension_numbers = #tpu.dot_dimension_numbers<[1], [0], [0], [1], [0, 0, 1, 1], [], []>} : vector<100x128xbf16>, vector<128x128xbf16>, vector<100x128xf32> -> vector<100x128xf32>
    %136 = arith.addf %130, %135 : vector<100x128xf32>
    %c0_140 = arith.constant 0 : index
    %c0_141 = arith.constant 0 : index
    %137 = vector.load %arg10[%c0_140, %c0_141] : memref<1x128xf32, #tpu.memory_space<vmem>>, vector<1x128xf32>
    %138 = vector.broadcast %137 : vector<1x128xf32> to vector<100x128xf32>
    %139 = arith.addf %136, %138 : vector<100x128xf32>
    %140 = arith.addf %139, %57 : vector<100x128xf32>
    %141 = vector.broadcast %0 : vector<100x1xf32> to vector<100x128xf32>
    %142 = arith.mulf %140, %141 : vector<100x128xf32>
    %c0_142 = arith.constant 0 : index
    %c0_143 = arith.constant 0 : index
    %c0_144 = arith.constant 0 : index
    %143 = vector.load %arg4[%c0_142, %c0_143, %c0_144] : memref<1x100x128xf32, #tpu.memory_space<vmem>>, vector<1x100x128xf32>
    %144 = vector.shape_cast %143 : vector<1x100x128xf32> to vector<100x128xf32>
    %145 = arith.addf %144, %142 : vector<100x128xf32>
    %cst_145 = arith.constant 1.000000e+00 : f32
    %146 = vector.broadcast %cst_145 : f32 to vector<100x128xf32>
    %147 = arith.cmpf oge, %145, %146 : vector<100x128xf32>
    %148 = arith.extui %147 : vector<100x128xi1> to vector<100x128xi32>
    %149 = arith.sitofp %148 : vector<100x128xi32> to vector<100x128xf32>
    %150 = arith.subf %145, %149 : vector<100x128xf32>
    %c0_146 = arith.constant 0 : index
    %c0_147 = arith.constant 0 : index
    %c0_148 = arith.constant 0 : index
    %151 = vector.load %arg13[%c0_146, %c0_147, %c0_148] : memref<1x100x128xf32, #tpu.memory_space<vmem>>, vector<1x100x128xf32>
    %152 = vector.shape_cast %151 : vector<1x100x128xf32> to vector<100x128xf32>
    %153 = vector.shape_cast %150 : vector<100x128xf32> to vector<1x100x128xf32>
    tpu.vector_store %arg13[%c0_146, %c0_147, %c0_148], %153 {strides = array<i32>} : memref<1x100x128xf32, #tpu.memory_space<vmem>>, vector<1x100x128xf32>,
    %154 = arith.truncf %149 : vector<100x128xf32> to vector<100x128xbf16>
    %c0_149 = arith.constant 0 : index
    %c0_150 = arith.constant 0 : index
    %c0_151 = arith.constant 0 : index
    %155 = vector.load %arg14[%c0_149, %c0_150, %c0_151] : memref<1x100x128xbf16, #tpu.memory_space<vmem>>, vector<1x100x128xbf16>
    %156 = vector.shape_cast %155 : vector<1x100x128xbf16> to vector<100x128xbf16>
    %157 = vector.shape_cast %154 : vector<100x128xbf16> to vector<1x100x128xbf16>
    tpu.vector_store %arg14[%c0_149, %c0_150, %c0_151], %157 {strides = array<i32>} : memref<1x100x128xbf16, #tpu.memory_space<vmem>>, vector<1x100x128xbf16>,
    %cst_152 = arith.constant 0.000000e+00 : f32
    %158 = vector.broadcast %cst_152 : f32 to vector<1x1xf32>
    %c0_153 = arith.constant 0 : index
    %c0_154 = arith.constant 0 : index
    %c0_155 = arith.constant 0 : index
    %c0_156 = arith.constant 0 : index
    %159 = vector.load %arg1[%c0_153, %c0_154, %c0_155, %c0_156] : memref<1x4x111x4xbf16, #tpu.memory_space<vmem>>, vector<1x1x111x4xbf16>
    %160 = vector.shape_cast %159 : vector<1x1x111x4xbf16> to vector<111x4xbf16>
    %161 = arith.extf %160 : vector<111x4xbf16> to vector<111x4xf32>
    %162 = math.absf %161 : vector<111x4xf32>
    %cst_157 = arith.constant dense<0.000000e+00> : vector<111xf32>
    %163 = vector.multi_reduction <add>, %162, %cst_157 [1] : vector<111x4xf32> to vector<111xf32>
    %164 = vector.shape_cast %163 : vector<111xf32> to vector<111x1xf32>
    %cst_158 = arith.constant dense<0.000000e+00> : vector<1xf32>
    %165 = vector.multi_reduction <add>, %164, %cst_158 [0] : vector<111x1xf32> to vector<1xf32>
    %166 = vector.shape_cast %165 : vector<1xf32> to vector<1x1xf32>
    %167 = arith.addf %158, %166 : vector<1x1xf32>
    %c0_159 = arith.constant 0 : index
    %c1_160 = arith.constant 1 : index
    %c0_161 = arith.constant 0 : index
    %c0_162 = arith.constant 0 : index
    %168 = vector.load %arg1[%c0_159, %c1_160, %c0_161, %c0_162] : memref<1x4x111x4xbf16, #tpu.memory_space<vmem>>, vector<1x1x111x4xbf16>
    %169 = vector.shape_cast %168 : vector<1x1x111x4xbf16> to vector<111x4xbf16>
    %170 = arith.extf %169 : vector<111x4xbf16> to vector<111x4xf32>
    %171 = math.absf %170 : vector<111x4xf32>
    %cst_163 = arith.constant dense<0.000000e+00> : vector<111xf32>
    %172 = vector.multi_reduction <add>, %171, %cst_163 [1] : vector<111x4xf32> to vector<111xf32>
    %173 = vector.shape_cast %172 : vector<111xf32> to vector<111x1xf32>
    %cst_164 = arith.constant dense<0.000000e+00> : vector<1xf32>
    %174 = vector.multi_reduction <add>, %173, %cst_164 [0] : vector<111x1xf32> to vector<1xf32>
    %175 = vector.shape_cast %174 : vector<1xf32> to vector<1x1xf32>
    %176 = arith.addf %167, %175 : vector<1x1xf32>
    %c0_165 = arith.constant 0 : index
    %c2_166 = arith.constant 2 : index
    %c0_167 = arith.constant 0 : index
    %c0_168 = arith.constant 0 : index
    %177 = vector.load %arg1[%c0_165, %c2_166, %c0_167, %c0_168] : memref<1x4x111x4xbf16, #tpu.memory_space<vmem>>, vector<1x1x111x4xbf16>
    %178 = vector.shape_cast %177 : vector<1x1x111x4xbf16> to vector<111x4xbf16>
    %179 = arith.extf %178 : vector<111x4xbf16> to vector<111x4xf32>
    %180 = math.absf %179 : vector<111x4xf32>
    %cst_169 = arith.constant dense<0.000000e+00> : vector<111xf32>
    %181 = vector.multi_reduction <add>, %180, %cst_169 [1] : vector<111x4xf32> to vector<111xf32>
    %182 = vector.shape_cast %181 : vector<111xf32> to vector<111x1xf32>
    %cst_170 = arith.constant dense<0.000000e+00> : vector<1xf32>
    %183 = vector.multi_reduction <add>, %182, %cst_170 [0] : vector<111x1xf32> to vector<1xf32>
    %184 = vector.shape_cast %183 : vector<1xf32> to vector<1x1xf32>
    %185 = arith.addf %176, %184 : vector<1x1xf32>
    %c0_171 = arith.constant 0 : index
    %c3_172 = arith.constant 3 : index
    %c0_173 = arith.constant 0 : index
    %c0_174 = arith.constant 0 : index
    %186 = vector.load %arg1[%c0_171, %c3_172, %c0_173, %c0_174] : memref<1x4x111x4xbf16, #tpu.memory_space<vmem>>, vector<1x1x111x4xbf16>
    %187 = vector.shape_cast %186 : vector<1x1x111x4xbf16> to vector<111x4xbf16>
    %188 = arith.extf %187 : vector<111x4xbf16> to vector<111x4xf32>
    %189 = math.absf %188 : vector<111x4xf32>
    %cst_175 = arith.constant dense<0.000000e+00> : vector<111xf32>
    %190 = vector.multi_reduction <add>, %189, %cst_175 [1] : vector<111x4xf32> to vector<111xf32>
    %191 = vector.shape_cast %190 : vector<111xf32> to vector<111x1xf32>
    %cst_176 = arith.constant dense<0.000000e+00> : vector<1xf32>
    %192 = vector.multi_reduction <add>, %191, %cst_176 [0] : vector<111x1xf32> to vector<1xf32>
    %193 = vector.shape_cast %192 : vector<1xf32> to vector<1x1xf32>
    %194 = arith.addf %185, %193 : vector<1x1xf32>
    %195 = vector.shape_cast %194 : vector<1x1xf32> to vector<1x1xf32>
    %196 = vector.broadcast %195 : vector<1x1xf32> to vector<8x128xf32>
    %c0_177 = arith.constant 0 : index
    %c0_178 = arith.constant 0 : index
    %197 = vector.load %arg15[%c0_177, %c0_178] : memref<8x128xf32, #tpu.memory_space<vmem>>, vector<8x128xf32>
    tpu.vector_store %arg15[%c0_177, %c0_178], %196 {strides = array<i32>} : memref<8x128xf32, #tpu.memory_space<vmem>>, vector<8x128xf32>,
    %198 = math.absf %142 : vector<100x128xf32>
    %cst_179 = arith.constant dense<0.000000e+00> : vector<100xf32>
    %199 = vector.multi_reduction <add>, %198, %cst_179 [1] : vector<100x128xf32> to vector<100xf32>
    %200 = vector.shape_cast %199 : vector<100xf32> to vector<100x1xf32>
    %cst_180 = arith.constant dense<0.000000e+00> : vector<1xf32>
    %201 = vector.multi_reduction <add>, %200, %cst_180 [0] : vector<100x1xf32> to vector<1xf32>
    %202 = vector.shape_cast %201 : vector<1xf32> to vector<1x1xf32>
    %203 = vector.shape_cast %202 : vector<1x1xf32> to vector<1x1xf32>
    %204 = vector.broadcast %203 : vector<1x1xf32> to vector<8x128xf32>
    %c0_181 = arith.constant 0 : index
    %c0_182 = arith.constant 0 : index
    %205 = vector.load %arg16[%c0_181, %c0_182] : memref<8x128xf32, #tpu.memory_space<vmem>>, vector<8x128xf32>
    tpu.vector_store %arg16[%c0_181, %c0_182], %204 {strides = array<i32>} : memref<8x128xf32, #tpu.memory_space<vmem>>, vector<8x128xf32>,
    return
  }
  func.func @transform_0(%arg0: i32) -> (i32, i32, i32, i32) {
    %c0_i32 = arith.constant 0 : i32
    %c0_i32_0 = arith.constant 0 : i32
    %c0_i32_1 = arith.constant 0 : i32
    %c0_i32_2 = arith.constant 0 : i32
    return %arg0, %c0_i32, %c0_i32_0, %c0_i32_1 : i32, i32, i32, i32
  }
  func.func @transform_1(%arg0: i32) -> (i32, i32, i32) {
    %c0_i32 = arith.constant 0 : i32
    %c0_i32_0 = arith.constant 0 : i32
    %c0_i32_1 = arith.constant 0 : i32
    return %arg0, %c0_i32, %c0_i32_0 : i32, i32, i32
  }
  func.func @transform_2(%arg0: i32) -> (i32, i32, i32) {
    %c0_i32 = arith.constant 0 : i32
    %c0_i32_0 = arith.constant 0 : i32
    %c0_i32_1 = arith.constant 0 : i32
    return %arg0, %c0_i32, %c0_i32_0 : i32, i32, i32
  }
  func.func @transform_3(%arg0: i32) -> (i32, i32, i32) {
    %c0_i32 = arith.constant 0 : i32
    %c0_i32_0 = arith.constant 0 : i32
    %c0_i32_1 = arith.constant 0 : i32
    return %arg0, %c0_i32, %c0_i32_0 : i32, i32, i32
  }
  func.func @transform_4(%arg0: i32) -> (i32, i32) {
    %c0_i32 = arith.constant 0 : i32
    %c0_i32_0 = arith.constant 0 : i32
    %c0_i32_1 = arith.constant 0 : i32
    return %c0_i32, %c0_i32_0 : i32, i32
  }
  func.func @transform_5(%arg0: i32) -> (i32, i32, i32) {
    %c0_i32 = arith.constant 0 : i32
    %c0_i32_0 = arith.constant 0 : i32
    %c0_i32_1 = arith.constant 0 : i32
    %c0_i32_2 = arith.constant 0 : i32
    return %c0_i32, %c0_i32_0, %c0_i32_1 : i32, i32, i32
  }
  func.func @transform_6(%arg0: i32) -> (i32, i32) {
    %c0_i32 = arith.constant 0 : i32
    %c0_i32_0 = arith.constant 0 : i32
    %c0_i32_1 = arith.constant 0 : i32
    return %c0_i32, %c0_i32_0 : i32, i32
  }
  func.func @transform_7(%arg0: i32) -> (i32, i32, i32) {
    %c0_i32 = arith.constant 0 : i32
    %c0_i32_0 = arith.constant 0 : i32
    %c0_i32_1 = arith.constant 0 : i32
    %c0_i32_2 = arith.constant 0 : i32
    return %c0_i32, %c0_i32_0, %c0_i32_1 : i32, i32, i32
  }
  func.func @transform_8(%arg0: i32) -> (i32, i32) {
    %c0_i32 = arith.constant 0 : i32
    %c0_i32_0 = arith.constant 0 : i32
    %c0_i32_1 = arith.constant 0 : i32
    return %c0_i32, %c0_i32_0 : i32, i32
  }
  func.func @transform_9(%arg0: i32) -> (i32, i32) {
    %c0_i32 = arith.constant 0 : i32
    %c0_i32_0 = arith.constant 0 : i32
    %c0_i32_1 = arith.constant 0 : i32
    return %c0_i32, %c0_i32_0 : i32, i32
  }
  func.func @transform_10(%arg0: i32) -> (i32, i32, i32) {
    %c0_i32 = arith.constant 0 : i32
    %c0_i32_0 = arith.constant 0 : i32
    %c0_i32_1 = arith.constant 0 : i32
    return %arg0, %c0_i32, %c0_i32_0 : i32, i32, i32
  }
  func.func @transform_11(%arg0: i32) -> (i32, i32, i32) {
    %c0_i32 = arith.constant 0 : i32
    %c0_i32_0 = arith.constant 0 : i32
    %c0_i32_1 = arith.constant 0 : i32
    return %arg0, %c0_i32, %c0_i32_0 : i32, i32, i32
  }
  func.func @transform_12(%arg0: i32) -> (i32, i32, i32) {
    %c0_i32 = arith.constant 0 : i32
    %c0_i32_0 = arith.constant 0 : i32
    %c0_i32_1 = arith.constant 0 : i32
    return %arg0, %c0_i32, %c0_i32_0 : i32, i32, i32
  }
  func.func @transform_13(%arg0: i32) -> (i32, i32, i32) {
    %c0_i32 = arith.constant 0 : i32
    %c0_i32_0 = arith.constant 0 : i32
    %c0_i32_1 = arith.constant 0 : i32
    return %arg0, %c0_i32, %c0_i32_0 : i32, i32, i32
  }
  func.func @transform_14(%arg0: i32) -> (i32, i32) {
    %c0_i32 = arith.constant 0 : i32
    %c0_i32_0 = arith.constant 0 : i32
    return %arg0, %c0_i32 : i32, i32
  }
  func.func @transform_15(%arg0: i32) -> (i32, i32) {
    %c0_i32 = arith.constant 0 : i32
    %c0_i32_0 = arith.constant 0 : i32
    return %arg0, %c0_i32 : i32, i32
  }
}

</mosaic_0001>

<bundles_post_ra>
// kernel: spiking_resblock_step.1
= control target key start
LH: loop header
LB: loop body
LE: loop exit
PB: predicated region body
PF: predicated region fallthrough
CT: control target
= control target key end

     0   :  { %s7470_s18 = smov 0   ;;  %s9661_s0 = inlined_call_operand.vmem [shape: bf16[2,4,111,4], index: 0, kind: input, shape index: {}]   ;;  %s9662_s1 = inlined_call_operand.vmem [shape: bf16[2,132,128], index: 1, kind: input, shape index: {}, may-alias: {1,11}]   ;;  %s9663_s2 = inlined_call_operand.vmem [shape: f32[2,100,128], index: 2, kind: input, shape index: {}, may-alias: {2,10}]   ;;  %s9664_s3 = inlined_call_operand.vmem [shape: f32[2,100,128], index: 3, kind: input, shape index: {}, may-alias: {3,12}]   ;;  %s9665_s4 = inlined_call_operand.vmem [shape: f32[100,1], index: 4, kind: input, shape index: {}]   ;;  %s9666_s5 = inlined_call_operand.vmem [shape: bf16[9,4,128], index: 5, kind: input, shape index: {}]   ;;  %s9667_s6 = inlined_call_operand.vmem [shape: bf16[4,128], index: 6, kind: input, shape index: {}]   ;;  %s9668_s7 = inlined_call_operand.vmem [shape: bf16[9,128,128], index: 7, kind: input, shape index: {}]   ;;  %s9669_s8 = inlined_call_operand.vmem [shape: f32[1,128], index: 8, kind: input, shape index: {}]   ;;  %s9670_s9 = inlined_call_operand.vmem [shape: f32[1,128], index: 9, kind: input, shape index: {}]   ;;  %s9671_s10 = inlined_call_operand.vmem [shape: f32[2,100,128], index: 10, kind: output, shape index: {0}, may-alias: {2,10}]   ;;  %s9672_s11 = inlined_call_operand.vmem [shape: bf16[2,132,128], index: 11, kind: output, shape index: {1}, may-alias: {1,11}]   ;;  %s9673_s12 = inlined_call_operand.vmem [shape: f32[2,100,128], index: 12, kind: output, shape index: {2}, may-alias: {3,12}]   ;;  %s9674_s13 = inlined_call_operand.vmem [shape: bf16[2,100,128], index: 13, kind: output, shape index: {3}]   ;;  %s9675_s14 = inlined_call_operand.vmem [shape: f32[16,128], index: 14, kind: output, shape index: {4}]   ;;  %s9676_s15 = inlined_call_operand.vmem [shape: f32[16,128], index: 15, kind: output, shape index: {5}]  }
   0x1 LB: > { %s5565_s19 = sadd.s32 4294967295, %s7385_s18   ;;  %p5569_p0 = scmp.ge.s32.totalorder %s7385_s18, 1  ;;  %s7385_s18 = sphi %s7470_s18, %s26_s18  }
   0x2   : > { %p478_p1 = scmp.lt.s32.totalorder %s7385_s18, 3 }
   0x4   : > { %p479_p2 = pnand %p5569_p0, %p478_p1 }
   0x6   : > { %482 = sbr.rel (%p479_p2) target bundleno = 1114 (0x45a), region = 60 }
   0xb   : > { %v5593_v0 = vld [vmem:[%s9666_s5 + $0x2] sm:$0x3]  ;;  %vm711_vm0 = vcmask 1041408   ;;  %p564_p3 = scmp.lt.s32.totalorder %s5565_s19, 1  ;;  %v9686_v1 = vmov 0.0   ;;  %vm7388_vm1 = vmmov 0  }
   0xc   : > { %6514 = vmatprep.subr.bf16.mxu0 %v9686_v1  ;;  %7210 = vmatprep.subr.bf16.mxu1 %v9686_v1  ;;  %v713_v2 = vsel %vm711_vm0, %v5593_v0, 0  ;;  %vm689_vm2 = vcmask 31744   ;;  %v5622_v3 = vld [vmem:[%s9666_s5 + $0x4] sm:$0x3]  ;;  %v639_v4 = vld [vmem:[%s9666_s5] sm:$0x3] }
   0xd   : > { %6515 = vmatpush3.bf16.msra.mxu0 %v713_v2  ;;  %7211 = vmatpush3.bf16.msra.mxu1 %v713_v2  ;;  %s9779_s19 = smov (!%p564_p3, %s5565_s19), 1  ;;  %v1026_v6 = vsel %vm711_vm0, %v5622_v3, 0  ;;  %v858_v8 = vsel %vm711_vm0, %v639_v4, 0  ;;  %v5644_v16 = vld [vmem:[%s9666_s5 + $0x6] sm:$0x3]  ;;  %vm1705_vm4 = vcmask 1046528  }
   0xe   : > { %6516 = vmatprep.mubr.msk.bf16.mxu0 %vm7388_vm1, %v9686_v1  ;;  %6532 = vmatprep.mubr.msk.bf16.mxu1 %vm7388_vm1, %v9686_v1  ;;  %s7212_s22 = smul.u32 224, %s9779_s19  ;;  %v1200_v21 = vsel %vm711_vm0, %v5644_v16, 0  ;;  %vm954_vm3 = vsmask.f32 7424  ;;  %v5672_v25 = vld [vmem:[%s9666_s5 + $0x8] sm:$0x3] }
   0xf   : > { %6574 = vmatprep.subr.bf16.mxu0 %v9686_v1  ;;  %6544 = vmatprep.subr.bf16.mxu1 %v9686_v1  ;;  %v1374_v29 = vsel %vm711_vm0, %v5672_v25, 0  ;;  %v5688_v59 = vld [vmem:[%s9666_s5 + $0xa] sm:$0x3]  ;;  %v5697_v63 = vld [vmem:[%s9666_s5 + $0xc] sm:$0x3]  ;;  %s7213_s17 = smul.u32 68, %s9779_s19 }
  0x10   : > { %s7502_s29 = scalar_lea.vmem %s9661_s0, %s7212_s22  ;;  %v1554_v62 = vsel %vm711_vm0, %v5688_v59, 0  ;;  %v1741_v3 = vsel %vm711_vm0, %v5697_v63, 0  ;;  %v618_v63 = vld [vmem:[%s9665_s4 + $0x28] sm:$0xff]  ;;  %vm2036_vm5 = vsmask.f32 6400  ;;  %s8208_s27 = smul.u32 104, %s9779_s19 }
  0x11   : > { %v7229_v5 = vld [vmem:[%s7502_s29 + $0x38] sm:$0xff]   ;;  %v7231_v9 = vld [vmem:[%s7502_s29 + $0x40] sm:$0xff]   ;;  %v7233_v11 = vld [vmem:[%s7502_s29 + $0x48] sm:$0xff]   ;;  %s7986_s22 = scalar_lea.vmem %s9672_s11, %s7213_s17  ;;  %s8392_s30 = scalar_lea.vmem %s9662_s1, %s7213_s17 }
  0x12   : > { %v7230_v7 = vld [vmem:[%s7502_s29 + $0x58] sm:$0xff]   ;;  %6517 = vmatmul.mubr.msk.bf16.vlgmr.msra.gmra.mxu0 %vm689_vm2, %v7229_v5  ;;  %v7232_v10 = vld [vmem:[%s7502_s29 + $0x60] sm:$0xff]   ;;  %v7234_v12 = vld [vmem:[%s7502_s29 + $0x68] ss:$0 sps:$4 sm:$0x33]   ;;  %s8223_s21 = scalar_lea.vmem %s9663_s2, %s8208_s27  ;;  %s8267_s25 = scalar_lea.vmem %s9671_s10, %s8208_s27 }
  0x13   : > { %6533 = vmatmul.mubr.msk.bf16.vlgmr.msra.gmra.mxu1 %vm689_vm2, %v7230_v7  ;;  %6575 = vmatpush3.bf16.msra.mxu0 %v1026_v6  ;;  %v7236_v13 = vld [vmem:[%s7502_s29] sm:$0xff]   ;;  %v7237_v14 = vld [vmem:[%s7502_s29 + $0x8] sm:$0xff]   ;;  %v7235_v17 = vld [vmem:[%s7502_s29 + $0x50] sm:$0xff]  }
  0x14   : > { %6545 = vmatpush3.bf16.msra.mxu1 %v858_v8  ;;  %6520 = vmatprep.mubr.msk.bf16.mxu0 %vm7388_vm1, %v9686_v1  ;;  %v957_v15 = vshll.u32 %v7236_v13, 16  ;;  %v955_v18 = vshrl.u32 %v7236_v13, 16  ;;  %v961_v19 = vshll.u32 %v7237_v14, 16  ;;  %v7238_v22 = vld [vmem:[%s7502_s29 + $0x10] sm:$0xff]   ;;  %v965_v26 = vshrl.u32 %v7237_v14, 16  ;;  %v7239_v30 = vld [vmem:[%s7502_s29 + $0x18] sm:$0xff]  }
  0x15   : > { %6536 = vmatprep.mubr.msk.bf16.mxu1 %vm7388_vm1, %v9686_v1  ;;  %6604 = vmatprep.subr.bf16.mxu1 %v9686_v1  ;;  %v968_v27 = vshll.u32 %v7238_v22, 16  ;;  %v975_v33 = vshll.u32 %v7239_v30, 16  ;;  %v972_v34 = vshrl.u32 %v7238_v22, 16  ;;  %v7240_v37 = vld [vmem:[%s7502_s29 + $0x20] sm:$0xff]   ;;  %v979_v40 = vshrl.u32 %v7239_v30, 16  ;;  %v7241_v43 = vld [vmem:[%s7502_s29 + $0x28] sm:$0xff]  }
  0x16   : > { %6634 = vmatprep.subr.bf16.mxu0 %v9686_v1  ;;  %v959_v20 = vrot.slane %v957_v15, 1  ;;  %v963_v23 = vrot.slane %v961_v19, 1  ;;  %v982_v39 = vshll.u32 %v7240_v37, 16  ;;  %v7243_v44 = vld [vmem:[%s7502_s29 + $0x30] ss:$0 sps:$4 sm:$0x77]  }
  0x17   : > { %v970_v32 = vrot.slane %v968_v27, 1  ;;  %v977_v36 = vrot.slane %v975_v33, 1  ;;  %v989_v46 = vshll.u32 %v7241_v43, 16  ;;  %v986_v47 = vshrl.u32 %v7240_v37, 16  ;;  %v7244_v61 = vld [vmem:[%s7502_s29 + $0x70] sm:$0xff]   ;;  %v7245_v0 = vld [vmem:[%s7502_s29 + $0x78] sm:$0xff]  }
  0x18   : > { %v960_v24 = vor.u32 %v959_v20, %v955_v18  ;;  %v967_v31 = vor.u32 %v965_v26, %v963_v23  ;;  %v984_v42 = vrot.slane %v982_v39, 1  ;;  %v997_v50 = vshll.u32 %v7243_v44, 16  ;;  %v7242_v56 = vld [vmem:[%s7502_s29 + $0x30] ss:$0 sps:$4 sm:$0x33]   ;;  %v7616_v2 = vld [vmem:[%s7502_s29 + $0xa8] sm:$0xff]  }
  0x19   : > { %v974_v38 = vor.u32 %v972_v34, %v970_v32  ;;  %v981_v45 = vor.u32 %v979_v40, %v977_v36  ;;  %v991_v49 = vrot.slane %v989_v46, 1  ;;  %v993_v52 = vshrl.u32 %v7241_v43, 16  ;;  %v7628_v4 = vld [vmem:[%s7502_s29 + $0x80] sm:$0xff]   ;;  %v7631_v5 = vld [vmem:[%s7502_s29 + $0xb0] sm:$0xff]   ;;  %v7642_v6 = vld [vmem:[%s7502_s29 + $0xb8] sm:$0xff]  }
  0x1a   : > { %6521 = vmatmul.mubr.msk.bf16.gmra.mxu0 %vm689_vm2, %v7231_v9  ;;  %v964_v28 = vsel %vm954_vm3, %v960_v24, %v963_v23  ;;  %v971_v35 = vsel %vm954_vm3, %v967_v31, %v970_v32  ;;  %v988_v51 = vor.u32 %v986_v47, %v984_v42  ;;  %v999_v54 = vrot.slane %v997_v50, 1  ;;  %v7645_v7 = vld [vmem:[%s7502_s29 + $0x88] sm:$0xff]   ;;  %v7656_v8 = vld [vmem:[%s7502_s29 + $0xc0] sm:$0xff]   ;;  %v7659_v9 = vld [vmem:[%s7502_s29 + $0x90] sm:$0xff]  }
  0x1b   : > { %6537 = vmatmul.mubr.msk.bf16.gmra.mxu1 %vm689_vm2, %v7232_v10  ;;  %6524 = vmatprep.mubr.msk.bf16.mxu0 %vm7388_vm1, %v9686_v1  ;;  %v978_v41 = vsel %vm954_vm3, %v974_v38, %v977_v36  ;;  %v985_v48 = vsel %vm954_vm3, %v981_v45, %v984_v42  ;;  %v995_v55 = vor.u32 %v993_v52, %v991_v49  ;;  %v1001_v58 = vshrl.u32 %v7243_v44, 16  ;;  %v7670_v10 = vld [vmem:[%s7502_s29 + $0xc8] sm:$0xff]   ;;  %v7695_v20 = vld [vmem:[%s7502_s29 + $0xd8] ss:$0 sps:$4 sm:$0x33]   ;;  %v7745_v45 = vld [vmem:[%s7502_s29 + $0x1c] sm:$0xff]  }
  0x1c   : > { %6540 = vmatprep.mubr.msk.bf16.mxu1 %vm7388_vm1, %v9686_v1  ;;  %v992_v53 = vsel %vm954_vm3, %v988_v51, %v991_v49  ;;  %v1489_v15 = vshll.u32 %v7245_v0, 16  ;;  %v1483_v16 = vshrl.u32 %v7244_v61, 16  ;;  %v7704_v23 = vld [vmem:[%s7502_s29 + $0xc] sm:$0xff]   ;;  %v1493_v25 = vshrl.u32 %v7245_v0, 16  ;;  %v7724_v34 = vld [vmem:[%s7502_s29 + $0x14] sm:$0xff]   ;;  %v617_v52 = vld [vmem:[%s9665_s4 + $0x20] sm:$0xff] }
  0x1d   : > { %v1000_v57 = vsel %vm954_vm3, %v995_v55, %v999_v54  ;;  %v1003_v60 = vor.u32 %v1001_v58, %v999_v54  ;;  %v1496_v26 = vshll.u32 %v7628_v4, 16  ;;  %v5740_v32 = vld [vmem:[%s9666_s5 + $0x10] sm:$0x3]  ;;  %v1503_v38 = vshll.u32 %v7645_v7, 16  ;;  %v614_v46 = vld [vmem:[%s9665_s4 + $0x8] sm:$0xff] }
  0x1e   : > { %v1491_v18 = vrot.slane %v1489_v15, 1  ;;  %v2121_v36 = vsel %vm711_vm0, %v5740_v32, 0  ;;  %v7389_v39 = vmov 0   ;;  %v1709_v40 = vrot.slane %v7724_v34, 1  ;;  %v615_v51 = vld [vmem:[%s9665_s4 + $0x10] sm:$0xff] }
  0x1f   : > { %v1498_v31 = vrot.slane %v1496_v26, 1  ;;  %7227 = vset.pattern.permute.xlu0 %v7389_v39  ;;  %7228 = vset.pattern.permute.xlu1 %v7389_v39  ;;  %v1510_v49 = vshll.u32 %v7659_v9, 16  ;;  %v1711_v50 = vrot.slane %v7745_v45, 1  ;;  %v619_v58 = vld [vmem:[%s9665_s4 + $0x30] sm:$0xff]  ;;  %2507 = vst [vmem:[%s7986_s22 + $0x8] sm:$0xf] %v7389_v39 }
  0x20   : > { %2348 = vperm.xlu1 %7228, %v615_v51   ;;  %v623_v15 = vld [vmem:[%s9665_s4 + $0x50] sm:$0xff]  ;;  %2508 = vst [vmem:[%s7986_s22 + $0xc] sm:$0xf] %v7389_v39  ;;  %2505 = vst [vmem:[%s7986_s22] sm:$0xf] %v7389_v39 }
  0x21   : > { %v1512_v54 = vrot.slane %v1510_v49, 1  ;;  %v1712_v55 = vsel %vm1705_vm4, %v1709_v40, %v1711_v50  ;;  %2506 = vst [vmem:[%s7986_s22 + $0x4] sm:$0xf] %v7389_v39  ;;  %2509 = vst [vmem:[%s7986_s22 + $0x10] sm:$0xf] %v7389_v39 }
  0x22   : > { %6525 = vmatmul.mubr.msk.bf16.gmra.mxu0 %vm689_vm2, %v7233_v11  ;;  %v7673_v11 = vld [vmem:[%s7502_s29 + $0x98] sm:$0xff]   ;;  %2510 = vst [vmem:[%s7986_s22 + $0x14] sm:$0xf] %v7389_v39  ;;  %2511 = vst [vmem:[%s7986_s22 + $0x18] sm:$0xf] %v7389_v39 }
  0x23   : > { %6541 = vmatmul.mubr.msk.bf16.gmra.mxu1 %vm689_vm2, %v7234_v12  ;;  %6528 = vmatprep.mubr.msk.bf16.mxu0 %vm7388_vm1, %v9686_v1  ;;  %v1485_v12 = vshll.u32 %v7244_v61, 16  ;;  %2512 = vst [vmem:[%s7986_s22 + $0x1c] sm:$0xf] %v7389_v39  ;;  %2513 = vst [vmem:[%s7986_s22 + $0x20] sm:$0xf] %v7389_v39 }
  0x24   : > { %6546 = vmatprep.mubr.msk.bf16.mxu1 %vm7388_vm1, %v9686_v1  ;;  %2514 = vst [vmem:[%s7986_s22 + $0x24] sm:$0xf] %v7389_v39  ;;  %2515 = vst [vmem:[%s7986_s22 + $0x28] sm:$0xf] %v7389_v39 }
  0x25   : > { %2516 = vst [vmem:[%s7986_s22 + $0x2c] sm:$0xf] %v7389_v39  ;;  %2517 = vst [vmem:[%s7986_s22 + $0x30] sm:$0xf] %v7389_v39 }
  0x26   : > { %2518 = vst [vmem:[%s7986_s22 + $0x34] sm:$0xf] %v7389_v39  ;;  %2519 = vst [vmem:[%s7986_s22 + $0x38] sm:$0xf] %v7389_v39 }
  0x27   : > { %2520 = vst [vmem:[%s7986_s22 + $0x3c] sm:$0xf] %v7389_v39  ;;  %2521 = vst [vmem:[%s7986_s22 + $0x40] sm:$0x3] %v7389_v39 }
  0x2a   : > { %6529 = vmatmul.mubr.msk.bf16.gmra.mxu0 %vm689_vm2, %v7235_v17  ;;  %v1487_v17 = vrot.slane %v1485_v12, 1  ;;  %v7795_v12 = vld [vmem:[%s7502_s29 + $0x2c] sm:$0xff]  }
  0x2b   : > { %6547 = vmatmul.mubr.msk.bf16.vlgmr.msra.gmra.mxu1 %vm689_vm2, %v7236_v13  ;;  %6576 = vmatprep.mubr.msk.bf16.mxu0 %vm7388_vm1, %v9686_v1  ;;  %v7684_v13 = vld [vmem:[%s7502_s29 + $0xd0] sm:$0xff]  }
  0x2c   : > { %6605 = vmatpush3.bf16.msra.mxu1 %v1200_v21  ;;  %6550 = vmatprep.mubr.msk.bf16.mxu1 %vm7388_vm1, %v9686_v1  ;;  %v1488_v19 = vor.u32 %v1487_v17, %v1483_v16  ;;  %v5725_v21 = vld [vmem:[%s9666_s5 + $0xe] sm:$0x3]  ;;  %v1521_v17 = vshrl.u32 %v7673_v11, 16 }
  0x2d   : > { %6664 = vmatprep.subr.bf16.mxu1 %v9686_v1  ;;  %v1927_v27 = vsel %vm711_vm0, %v5725_v21, 0  ;;  %v622_v21 = vld [vmem:[%s9665_s4 + $0x48] sm:$0xff] }
  0x2e   : > { %v1492_v24 = vsel %vm954_vm3, %v1488_v19, %v1491_v18  ;;  %v1715_v19 = vrot.slane %v7795_v12, 1 }
  0x32   : > { %6577 = vmatmul.mubr.msk.bf16.vlgmr.msra.gmra.mxu0 %vm689_vm2, %v964_v28 }
  0x33   : > { %6551 = vmatmul.mubr.msk.bf16.gmra.mxu1 %vm689_vm2, %v7237_v14  ;;  %6635 = vmatpush3.bf16.msra.mxu0 %v1374_v29  ;;  %v7255_v14 = vld [vmem:[%s7502_s29 + $0xa0] ss:$0 sps:$4 sm:$0x33]   ;;  %v1707_v29 = vrot.slane %v7704_v23, 1 }
  0x34   : > { %6554 = vmatprep.mubr.msk.bf16.mxu1 %vm7388_vm1, %v9686_v1  ;;  %6580 = vmatprep.mubr.msk.bf16.mxu0 %vm7388_vm1, %v9686_v1 }
  0x35   : > { %6694 = vmatprep.subr.bf16.mxu0 %v9686_v1  ;;  %v1710_v44 = vsel %vm1705_vm4, %v1707_v29, %v1709_v40  ;;  %v2046_v40 = vshrl.u32 %v7704_v23, 16 }
  0x3a   : > { %6581 = vmatmul.mubr.msk.bf16.gmra.mxu0 %vm689_vm2, %v971_v35 }
  0x3b   : > { %6555 = vmatmul.mubr.msk.bf16.gmra.mxu1 %vm689_vm2, %v7238_v22  ;;  %6584 = vmatprep.mubr.msk.bf16.mxu0 %vm7388_vm1, %v9686_v1  ;;  %v7701_v22 = vld [vmem:[%s7502_s29 + $0x4] sm:$0xfe]  }
  0x3c   : > { %6558 = vmatprep.mubr.msk.bf16.mxu1 %vm7388_vm1, %v9686_v1  ;;  %v1706_v28 = vrot.slane %v7701_v22, 1 }
  0x3e   : > { %v1708_v33 = vsel %vm1705_vm4, %v1706_v28, %v1707_v29  ;;  %v624_v28 = vld [vmem:[%s9665_s4 + $0x58] sm:$0xff] }
  0x42   : > { %6585 = vmatmul.mubr.msk.bf16.gmra.mxu0 %vm689_vm2, %v978_v41  ;;  %v613_v41 = vld [vmem:[%s9665_s4] sm:$0xff] }
  0x43   : > { %6559 = vmatmul.mubr.msk.bf16.gmra.mxu1 %vm689_vm2, %v7239_v30  ;;  %6588 = vmatprep.mubr.msk.bf16.mxu0 %vm7388_vm1, %v9686_v1  ;;  %v1495_v30 = vor.u32 %v1493_v25, %v1491_v18 }
  0x44   : > { %6562 = vmatprep.mubr.msk.bf16.mxu1 %vm7388_vm1, %v9686_v1  ;;  %2338 = vperm.xlu0 %7227, %v613_v41   ;;  %v2049_v41 = vshll.u32 %v7704_v23, 16 }
  0x45   : > { %v1499_v35 = vsel %vm954_vm3, %v1495_v30, %v1498_v31 }
  0x48   : > { %2343 = vperm.xlu0 %7227, %v614_v46  }
  0x4a   : > { %6589 = vmatmul.mubr.msk.bf16.gmra.mxu0 %vm689_vm2, %v985_v48  ;;  %v1507_v48 = vshrl.u32 %v7645_v7, 16 }
  0x4b   : > { %6563 = vmatmul.mubr.msk.bf16.gmra.mxu1 %vm689_vm2, %v7240_v37  ;;  %6592 = vmatprep.mubr.msk.bf16.mxu0 %vm7388_vm1, %v9686_v1  ;;  %v1500_v37 = vshrl.u32 %v7628_v4, 16 }
  0x4c   : > { %6566 = vmatprep.mubr.msk.bf16.mxu1 %vm7388_vm1, %v9686_v1  ;;  %2358 = vperm.xlu0 %7227, %v617_v52  }
  0x4d   : > { %v1502_v42 = vor.u32 %v1500_v37, %v1498_v31  ;;  %v2038_v37 = vshrl.u32 %v7701_v22, 16 }
  0x50   : > { %2368 = vperm.xlu0 %7227, %v619_v58  }
  0x52   : > { %6593 = vmatmul.mubr.msk.bf16.gmra.mxu0 %vm689_vm2, %v992_v53 }
  0x53   : > { %6567 = vmatmul.mubr.msk.bf16.gmra.mxu1 %vm689_vm2, %v7241_v43  ;;  %6596 = vmatprep.mubr.msk.bf16.mxu0 %vm7388_vm1, %v9686_v1  ;;  %v1505_v43 = vrot.slane %v1503_v38, 1  ;;  %v2041_v38 = vshll.u32 %v7701_v22, 16 }
  0x54   : > { %6570 = vmatprep.mubr.msk.bf16.mxu1 %vm7388_vm1, %v9686_v1 }
  0x55   : > { %v1506_v47 = vsel %vm954_vm3, %v1502_v42, %v1505_v43  ;;  %v1509_v53 = vor.u32 %v1507_v48, %v1505_v43  ;;  %v2043_v46 = vrot.slane %v2041_v38, 2  ;;  %v2051_v48 = vrot.slane %v2049_v41, 2 }
  0x57   : > { %v1513_v59 = vsel %vm954_vm3, %v1509_v53, %v1512_v54  ;;  %v2055_v53 = vshrl.u32 %v7724_v34, 16 }
  0x5a   : > { %6597 = vmatmul.mubr.msk.bf16.gmra.mxu0 %vm689_vm2, %v1000_v57  ;;  %v616_v57 = vld [vmem:[%s9665_s4 + $0x18] sm:$0xff] }
  0x5b   : > { %6571 = vmatmul.mubr.msk.bf16.gmra.mxu1 %vm689_vm2, %v7242_v56  ;;  %6600 = vmatprep.mubr.msk.bf16.mxu0 %vm7388_vm1, %v9686_v1  ;;  %v7768_v56 = vld [vmem:[%s7502_s29 + $0x24] sm:$0xff]  }
  0x5c   : > { %6606 = vmatprep.mubr.msk.bf16.mxu1 %vm7388_vm1, %v9686_v1  ;;  %2353 = vperm.xlu1 %7228, %v616_v57  }
  0x60   : > { %2363 = vperm.xlu1 %7228, %v618_v63  }
  0x62   : > { %6601 = vmatmul.mubr.msk.bf16.gmra.mxu0 %vm689_vm2, %v1003_v60  ;;  %v1514_v60 = vshrl.u32 %v7659_v9, 16 }
  0x63   : > { %6607 = vmatmul.mubr.msk.bf16.vlgmr.msra.gmra.mxu1 %vm689_vm2, %v7244_v61  ;;  %6636 = vmatprep.mubr.msk.bf16.mxu0 %vm7388_vm1, %v9686_v1  ;;  %v1517_v61 = vshll.u32 %v7673_v11, 16 }
  0x64   : > { %6665 = vmatpush3.bf16.msra.mxu1 %v1554_v62  ;;  %6610 = vmatprep.mubr.msk.bf16.mxu1 %vm7388_vm1, %v9686_v1  ;;  %v1713_v62 = vrot.slane %v7768_v56, 1 }
  0x65   : > { %6724 = vmatprep.subr.bf16.mxu1 %v9686_v1 }
  0x66   : > { %v1716_v26 = vsel %vm1705_vm4, %v1713_v62, %v1715_v19 }
  0x6a   : > { %6637 = vmatmul.mubr.msk.bf16.vlgmr.msra.gmra.mxu0 %vm689_vm2, %v7616_v2 }
  0x6b   : > { %6611 = vmatmul.mubr.msk.bf16.gmra.mxu1 %vm689_vm2, %v7245_v0  ;;  %6695 = vmatpush3.bf16.msra.mxu0 %v1741_v3  ;;  %v621_v0 = vld [vmem:[%s9665_s4 + $0x40] sm:$0xff]  ;;  %v1516_v3 = vor.u32 %v1514_v60, %v1512_v54  ;;  %v2058_v54 = vshll.u32 %v7724_v34, 16 }
  0x6c   : > { %6614 = vmatprep.mubr.msk.bf16.mxu1 %vm7388_vm1, %v9686_v1  ;;  %6640 = vmatprep.mubr.msk.bf16.mxu0 %vm7388_vm1, %v9686_v1 }
  0x6d   : > { %6754 = vmatprep.subr.bf16.mxu0 %v9686_v1  ;;  %2378 = vperm.xlu0 %7227, %v621_v0   ;;  %v2060_v63 = vrot.slane %v2058_v54, 2 }
  0x71   : > { %2388 = vperm.xlu0 %7227, %v623_v15   ;;  %v2064_v15 = vshrl.u32 %v7745_v45, 16 }
  0x72   : > { %6641 = vmatmul.mubr.msk.bf16.gmra.mxu0 %vm689_vm2, %v7631_v5 }
  0x73   : > { %6615 = vmatmul.mubr.msk.bf16.gmra.mxu1 %vm689_vm2, %v7628_v4  ;;  %6644 = vmatprep.mubr.msk.bf16.mxu0 %vm7388_vm1, %v9686_v1  ;;  %v1519_v4 = vrot.slane %v1517_v61, 1 }
  0x74   : > { %6618 = vmatprep.mubr.msk.bf16.mxu1 %vm7388_vm1, %v9686_v1 }
  0x75   : > { %v1520_v16 = vsel %vm954_vm3, %v1516_v3, %v1519_v4 }
  0x7a   : > { %6645 = vmatmul.mubr.msk.bf16.gmra.mxu0 %vm689_vm2, %v7642_v6 }
  0x7b   : > { %6619 = vmatmul.mubr.msk.bf16.gmra.mxu1 %vm689_vm2, %v7645_v7  ;;  %6648 = vmatprep.mubr.msk.bf16.mxu0 %vm7388_vm1, %v9686_v1  ;;  %v7263_v7 = vld [vmem:[%s7502_s29 + $0xa0] ss:$0 sps:$4 sm:$0x77]  }
  0x7c   : > { %6622 = vmatprep.mubr.msk.bf16.mxu1 %vm7388_vm1, %v9686_v1  ;;  %v1525_v18 = vshll.u32 %v7263_v7, 16  ;;  %v1529_v30 = vshrl.u32 %v7263_v7, 16 }
  0x7e   : > { %v1527_v25 = vrot.slane %v1525_v18, 1 }
  0x80   : > { %v1531_v32 = vor.u32 %v1529_v30, %v1527_v25 }
  0x82   : > { %6649 = vmatmul.mubr.msk.bf16.gmra.mxu0 %vm689_vm2, %v7656_v8 }
  0x83   : > { %6623 = vmatmul.mubr.msk.bf16.gmra.mxu1 %vm689_vm2, %v7659_v9  ;;  %6652 = vmatprep.mubr.msk.bf16.mxu0 %vm7388_vm1, %v9686_v1  ;;  %v1714_v9 = vsel %vm1705_vm4, %v1711_v50, %v1713_v62  ;;  %v7268_v50 = vld [vmem:[%s7502_s29 + $0x4c] sm:$0xff]   ;;  %v2057_v62 = vrot.slane %v2055_v53, 1  ;;  %v2085_v53 = vshll.u32 %v7795_v12, 16 }
  0x84   : > { %6626 = vmatprep.mubr.msk.bf16.mxu1 %vm7388_vm1, %v9686_v1  ;;  %v1895_v57 = vrot.slane %v7268_v50, 1 }
  0x8a   : > { %6653 = vmatmul.mubr.msk.bf16.gmra.mxu0 %vm689_vm2, %v7670_v10 }
  0x8b   : > { %6627 = vmatmul.mubr.msk.bf16.gmra.mxu1 %vm689_vm2, %v7673_v11  ;;  %6656 = vmatprep.mubr.msk.bf16.mxu0 %vm7388_vm1, %v9686_v1  ;;  %v625_v11 = vld [vmem:[%s9665_s4 + $0x60] sm:$0xf] }
  0x8c   : > { %6630 = vmatprep.mubr.msk.bf16.mxu1 %vm7388_vm1, %v9686_v1  ;;  %2398 = vperm.xlu0 %7227, %v625_v11  }
  0x92   : > { %6657 = vmatmul.mubr.msk.bf16.gmra.mxu0 %vm689_vm2, %v7684_v13 }
  0x93   : > { %6631 = vmatmul.mubr.msk.bf16.gmra.mxu1 %vm689_vm2, %v7255_v14  ;;  %6660 = vmatprep.mubr.msk.bf16.mxu0 %vm7388_vm1, %v9686_v1  ;;  %v620_v14 = vld [vmem:[%s9665_s4 + $0x38] sm:$0xff] }
  0x94   : > { %6666 = vmatprep.mubr.msk.bf16.mxu1 %vm7388_vm1, %v9686_v1  ;;  %2373 = vperm.xlu1 %7228, %v620_v14   ;;  %v2061_v14 = vor.u32 %v2060_v63, %v2057_v62 }
  0x98   : > { %2383 = vperm.xlu1 %7228, %v622_v21  }
  0x9a   : > { %6661 = vmatmul.mubr.msk.bf16.gmra.mxu0 %vm689_vm2, %v7695_v20 }
  0x9b   : > { %6667 = vmatmul.mubr.msk.bf16.vlgmr.msra.gmra.mxu1 %vm689_vm2, %v1492_v24  ;;  %6696 = vmatprep.mubr.msk.bf16.mxu0 %vm7388_vm1, %v9686_v1  ;;  %v1523_v24 = vor.u32 %v1521_v17, %v1519_v4  ;;  %v7269_v4 = vld [vmem:[%s7502_s29 + $0x54] sm:$0xff]  }
  0x9c   : > { %6725 = vmatpush3.bf16.msra.mxu1 %v1927_v27  ;;  %6670 = vmatprep.mubr.msk.bf16.mxu1 %vm7388_vm1, %v9686_v1  ;;  %v7265_v27 = vld [vmem:[%s7502_s29 + $0x34] ss:$0 sps:$4 sm:$0x77]   ;;  %v1897_v18 = vrot.slane %v7269_v4, 1 }
  0x9d   : > { %6784 = vmatprep.subr.bf16.mxu1 %v9686_v1  ;;  %v1528_v29 = vsel %vm954_vm3, %v1523_v24, %v1527_v25  ;;  %2393 = vperm.xlu1 %7228, %v624_v28   ;;  %v1717_v31 = vrot.slane %v7265_v27, 1  ;;  %v2066_v25 = vrot.slane %v2064_v15, 1  ;;  %v7273_v4 = vld [vmem:[%s7502_s29 + $0x34] ss:$0 sps:$4 sm:$0xff]  }
  0x9e   : > { %v1898_v28 = vsel %vm1705_vm4, %v1895_v57, %v1897_v18 }
  0xa2   : > { %6697 = vmatmul.mubr.msk.bf16.vlgmr.msra.gmra.mxu0 %vm689_vm2, %v1708_v33  ;;  %v1718_v33 = vsel %vm1705_vm4, %v1715_v19, %v1717_v31 }
  0xa3   : > { %6671 = vmatmul.mubr.msk.bf16.gmra.mxu1 %vm689_vm2, %v1499_v35  ;;  %6755 = vmatpush3.bf16.msra.mxu0 %v2121_v36  ;;  %v7266_v35 = vld [vmem:[%s7502_s29 + $0x3c] sm:$0xfe]   ;;  %v7267_v36 = vld [vmem:[%s7502_s29 + $0x44] sm:$0xff]  }
  0xa4   : > { %6674 = vmatprep.mubr.msk.bf16.mxu1 %vm7388_vm1, %v9686_v1  ;;  %6700 = vmatprep.mubr.msk.bf16.mxu0 %vm7388_vm1, %v9686_v1  ;;  %v1892_v42 = vrot.slane %v7266_v35, 1  ;;  %v1893_v43 = vrot.slane %v7267_v36, 1  ;;  %v2076_v35 = vshll.u32 %v7768_v56, 16 }
  0xa5   : > { %6814 = vmatprep.subr.bf16.mxu0 %v9686_v1 }
  0xa6   : > { %v1894_v49 = vsel %vm1705_vm4, %v1892_v42, %v1893_v43  ;;  %v1896_v3 = vsel %vm1705_vm4, %v1893_v43, %v1895_v57 }
  0xaa   : > { %6701 = vmatmul.mubr.msk.bf16.gmra.mxu0 %vm689_vm2, %v1710_v44  ;;  %v2040_v44 = vrot.slane %v2038_v37, 1 }
  0xab   : > { %6675 = vmatmul.mubr.msk.bf16.gmra.mxu1 %vm689_vm2, %v1506_v47  ;;  %6704 = vmatprep.mubr.msk.bf16.mxu0 %vm7388_vm1, %v9686_v1  ;;  %v2048_v47 = vrot.slane %v2046_v40, 1 }
  0xac   : > { %6678 = vmatprep.mubr.msk.bf16.mxu1 %vm7388_vm1, %v9686_v1  ;;  %v2044_v23 = vor.u32 %v2043_v46, %v2040_v44  ;;  %v2078_v44 = vrot.slane %v2076_v35, 2 }
  0xad   : > { %v2052_v52 = vor.u32 %v2051_v48, %v2048_v47  ;;  %v7271_v48 = vld [vmem:[%s7502_s29 + $0x64] sm:$0xff]  }
  0xae   : > { %v1901_v57 = vrot.slane %v7271_v48, 1 }
  0xaf   : > { %v2053_v61 = vsel %vm2036_vm5, %v2044_v23, %v2052_v52  ;;  %v2062_v24 = vsel %vm2036_vm5, %v2052_v52, %v2061_v14  ;;  %v2082_v52 = vshrl.u32 %v7795_v12, 16 }
  0xb2   : > { %6705 = vmatmul.mubr.msk.bf16.gmra.mxu0 %vm689_vm2, %v1712_v55 }
  0xb3   : > { %6679 = vmatmul.mubr.msk.bf16.gmra.mxu1 %vm689_vm2, %v1513_v59  ;;  %6708 = vmatprep.mubr.msk.bf16.mxu0 %vm7388_vm1, %v9686_v1 }
  0xb4   : > { %6682 = vmatprep.mubr.msk.bf16.mxu1 %vm7388_vm1, %v9686_v1 }
  0xba   : > { %6709 = vmatmul.mubr.msk.bf16.gmra.mxu0 %vm689_vm2, %v1714_v9 }
  0xbb   : > { %6683 = vmatmul.mubr.msk.bf16.gmra.mxu1 %vm689_vm2, %v1520_v16  ;;  %6712 = vmatprep.mubr.msk.bf16.mxu0 %vm7388_vm1, %v9686_v1  ;;  %v2067_v16 = vshll.u32 %v7745_v45, 16 }
  0xbc   : > { %6686 = vmatprep.mubr.msk.bf16.mxu1 %vm7388_vm1, %v9686_v1 }
  0xc2   : > { %6713 = vmatmul.mubr.msk.bf16.gmra.mxu0 %vm689_vm2, %v1716_v26  ;;  %v2069_v26 = vrot.slane %v2067_v16, 2 }
  0xc3   : > { %6687 = vmatmul.mubr.msk.bf16.gmra.mxu1 %vm689_vm2, %v1528_v29  ;;  %6716 = vmatprep.mubr.msk.bf16.mxu0 %vm7388_vm1, %v9686_v1  ;;  %v7270_v29 = vld [vmem:[%s7502_s29 + $0x5c] sm:$0xff]  }
  0xc4   : > { %6690 = vmatprep.mubr.msk.bf16.mxu1 %vm7388_vm1, %v9686_v1  ;;  %v1899_v37 = vrot.slane %v7270_v29, 1 }
  0xc6   : > { %v1900_v47 = vsel %vm1705_vm4, %v1897_v18, %v1899_v37  ;;  %v1902_v12 = vsel %vm1705_vm4, %v1899_v37, %v1901_v57 }
  0xca   : > { %6717 = vmatmul.mubr.msk.bf16.gmra.mxu0 %vm689_vm2, %v1718_v33  ;;  %v2073_v33 = vshrl.u32 %v7768_v56, 16 }
  0xcb   : > { %6691 = vmatmul.mubr.msk.bf16.gmra.mxu1 %vm689_vm2, %v1531_v32  ;;  %6720 = vmatprep.mubr.msk.bf16.mxu0 %vm7388_vm1, %v9686_v1  ;;  %v2070_v32 = vor.u32 %v2069_v26, %v2066_v25  ;;  %v2094_v25 = vshll.u32 %v7273_v4, 16 }
  0xcc   : > { %6726 = vmatprep.mubr.msk.bf16.mxu1 %vm7388_vm1, %v9686_v1  ;;  %v2075_v43 = vrot.slane %v2073_v33, 1 }
  0xcd   : > { %v2071_v42 = vsel %vm2036_vm5, %v2061_v14, %v2070_v32 }
  0xce   : > { %v2079_v23 = vor.u32 %v2078_v44, %v2075_v43 }
  0xd0   : > { %v2080_v63 = vsel %vm2036_vm5, %v2070_v32, %v2079_v23 }
  0xd2   : > { %v7845_v51 = vpop.f32.mrf.mxu0  ;;  %6721 = vmatmul.mubr.msk.bf16.gmra.mxu0 %vm689_vm2, %v1717_v31 }
  0xd3   : > { %v7848_v22 = vpop.f32.mrf.mxu1  ;;  %6727 = vmatmul.mubr.msk.bf16.vlgmr.msra.gmra.mxu1 %vm689_vm2, %v1894_v49  ;;  %6756 = vmatprep.mubr.msk.bf16.mxu0 %vm7388_vm1, %v9686_v1 }
  0xd4   : > { %v6518_v55 = vpop.f32.mrf.mxu0  ;;  %6730 = vmatprep.mubr.msk.bf16.mxu1 %vm7388_vm1, %v9686_v1 }
  0xd5   : > { %v6534_v58 = vpop.f32.mrf.mxu1 }
  0xd6   : > { %v7857_v59 = vpop.f32.mrf.mxu0 }
  0xd7   : > { %v7859_v60 = vpop.f32.mrf.mxu1 }
  0xd8   : > { %v6519_v0 = vpop.f32.mrf.mxu0 }
  0xd9   : > { %v6535_v34 = vpop.f32.mrf.mxu1  ;;  %v2084_v0 = vrot.slane %v2082_v52, 1 }
  0xda   : > { %v7864_v7 = vpop.f32.mrf.mxu0  ;;  %6757 = vmatmul.mubr.msk.bf16.vlgmr.msra.gmra.mxu0 %vm689_vm2, %v2053_v61 }
  0xdb   : > { %v7867_v9 = vpop.f32.mrf.mxu1  ;;  %6731 = vmatmul.mubr.msk.bf16.gmra.mxu1 %vm689_vm2, %v1896_v3  ;;  %6760 = vmatprep.mubr.msk.bf16.mxu0 %vm7388_vm1, %v9686_v1  ;;  %v2087_v3 = vrot.slane %v2085_v53, 2 }
  0xdc   : > { %v6522_v17 = vpop.f32.mrf.mxu0  ;;  %6734 = vmatprep.mubr.msk.bf16.mxu1 %vm7388_vm1, %v9686_v1 }
  0xdd   : > { %v6538_v19 = vpop.f32.mrf.mxu1 }
  0xde   : > { %v7876_v21 = vpop.f32.mrf.mxu0  ;;  %v2088_v19 = vor.u32 %v2087_v3, %v2084_v0 }
  0xdf   : > { %v7878_v11 = vpop.f32.mrf.mxu1 }
  0xe0   : > { %v6523_v27 = vpop.f32.mrf.mxu0  ;;  %v2089_v33 = vsel %vm2036_vm5, %v2079_v23, %v2088_v19 }
  0xe1   : > { %v6539_v30 = vpop.f32.mrf.mxu1 }
  0xe2   : > { %v7883_v45 = vpop.f32.mrf.mxu0  ;;  %6761 = vmatmul.mubr.msk.bf16.gmra.mxu0 %vm689_vm2, %v2062_v24  ;;  %v2091_v24 = vshrl.u32 %v7273_v4, 16 }
  0xe3   : > { %v7886_v31 = vpop.f32.mrf.mxu1  ;;  %6735 = vmatmul.mubr.msk.bf16.gmra.mxu1 %vm689_vm2, %v1898_v28  ;;  %6764 = vmatprep.mubr.msk.bf16.mxu0 %vm7388_vm1, %v9686_v1 }
  0xe4   : > { %v6526_v36 = vpop.f32.mrf.mxu0  ;;  %6738 = vmatprep.mubr.msk.bf16.mxu1 %vm7388_vm1, %v9686_v1  ;;  %v2093_v35 = vrot.slane %v2091_v24, 1 }
  0xe5   : > { %v6542_v38 = vpop.f32.mrf.mxu1  ;;  %v2096_v36 = vrot.slane %v2094_v25, 2 }
  0xe6   : > { %v7895_v40 = vpop.f32.mrf.mxu0 }
  0xe7   : > { %v800_v41 = vpop.f32.mrf.mxu1 }
  0xe8   : > { %v6527_v46 = vpop.f32.mrf.mxu0 }
  0xe9   : > { %v6543_v49 = vpop.f32.mrf.mxu1  ;;  %v2097_v46 = vor.u32 %v2096_v36, %v2093_v35 }
  0xea   : > { %v7900_v50 = vpop.f32.mrf.mxu0  ;;  %6765 = vmatmul.mubr.msk.bf16.gmra.mxu0 %vm689_vm2, %v2071_v42 }
  0xeb   : > { %v894_v56 = vpop.f32.mrf.mxu1  ;;  %6739 = vmatmul.mubr.msk.bf16.gmra.mxu1 %vm689_vm2, %v1900_v47  ;;  %6768 = vmatprep.mubr.msk.bf16.mxu0 %vm7388_vm1, %v9686_v1  ;;  %v2098_v52 = vsel %vm2036_vm5, %v2088_v19, %v2097_v46 }
  0xec   : > { %v895_v54 = vadd.f32 %v894_v56, %v7845_v51  ;;  %v6530_v55 = vpop.f32.mrf.mxu0  ;;  %6742 = vmatprep.mubr.msk.bf16.mxu1 %vm7388_vm1, %v9686_v1  ;;  %v7272_v51 = vld [vmem:[%s7502_s29 + $0x6c] ss:$0 sps:$4 sm:$0x77]  }
  0xed   : > { %v6548_v58 = vpop.f32.mrf.mxu1  ;;  %v1903_v27 = vrot.slane %v7272_v51, 1 }
  0xee   : > { %v7911_v61 = vpop.f32.mrf.mxu0 }
  0xef   : > { %v897_v62 = vpop.f32.mrf.mxu1  ;;  %v1904_v41 = vsel %vm1705_vm4, %v1901_v57, %v1903_v27 }
  0xf0   : > { %v898_v34 = vadd.f32 %v897_v62, %v7857_v59  ;;  %v6531_v14 = vpop.f32.mrf.mxu0 }
  0xf1   : > { %v6549_v15 = vpop.f32.mrf.mxu1 }
  0xf2   : > { %v1062_v16 = vpop.f32.mrf.mxu0  ;;  %6769 = vmatmul.mubr.msk.bf16.gmra.mxu0 %vm689_vm2, %v2080_v63 }
  0xf3   : > { %v902_v17 = vpop.f32.mrf.mxu1  ;;  %v7919_v18 = vadd.f32 %v1062_v16, %v895_v54  ;;  %6743 = vmatmul.mubr.msk.bf16.gmra.mxu1 %vm689_vm2, %v1902_v12  ;;  %6772 = vmatprep.mubr.msk.bf16.mxu0 %vm7388_vm1, %v9686_v1 }
  0xf4   : > { %v903_v59 = vadd.f32 %v902_v17, %v7864_v7  ;;  %v6578_v26 = vpop.f32.mrf.mxu0  ;;  %6746 = vmatprep.mubr.msk.bf16.mxu1 %vm7388_vm1, %v9686_v1 }
  0xf5   : > { %v6552_v28 = vpop.f32.mrf.mxu1 }
  0xf6   : > { %v1065_v29 = vpop.f32.mrf.mxu0 }
  0xf7   : > { %v905_v30 = vpop.f32.mrf.mxu1  ;;  %v7927_v32 = vadd.f32 %v1065_v29, %v898_v34 }
  0xf8   : > { %v906_v37 = vadd.f32 %v905_v30, %v7876_v21  ;;  %v6579_v38 = vpop.f32.mrf.mxu0 }
  0xf9   : > { %v6553_v7 = vpop.f32.mrf.mxu1 }
  0xfa   : > { %v1070_v42 = vpop.f32.mrf.mxu0  ;;  %6773 = vmatmul.mubr.msk.bf16.gmra.mxu0 %vm689_vm2, %v2089_v33 }
  0xfb   : > { %v910_v43 = vpop.f32.mrf.mxu1  ;;  %v7933_v44 = vadd.f32 %v1070_v42, %v903_v59  ;;  %6747 = vmatmul.mubr.msk.bf16.gmra.mxu1 %vm689_vm2, %v1904_v41  ;;  %6776 = vmatprep.mubr.msk.bf16.mxu0 %vm7388_vm1, %v9686_v1 }
  0xfc   : > { %v911_v47 = vadd.f32 %v910_v43, %v7883_v45  ;;  %v6582_v48 = vpop.f32.mrf.mxu0  ;;  %6750 = vmatprep.mubr.msk.bf16.mxu1 %vm7388_vm1, %v9686_v1 }
  0xfd   : > { %v6556_v21 = vpop.f32.mrf.mxu1 }
  0xfe   : > { %v1073_v49 = vpop.f32.mrf.mxu0 }
  0xff   : > { %v913_v56 = vpop.f32.mrf.mxu1  ;;  %v7941_v23 = vadd.f32 %v1073_v49, %v906_v37 }
 0x100   : > { %v914_v53 = vadd.f32 %v913_v56, %v7895_v40  ;;  %v6583_v54 = vpop.f32.mrf.mxu0 }
 0x101   : > { %v6557_v55 = vpop.f32.mrf.mxu1 }
 0x102   : > { %v1078_v57 = vpop.f32.mrf.mxu0  ;;  %6777 = vmatmul.mubr.msk.bf16.gmra.mxu0 %vm689_vm2, %v2098_v52 }
 0x103   : > { %v918_v58 = vpop.f32.mrf.mxu1  ;;  %v7946_v45 = vadd.f32 %v1078_v57, %v911_v47  ;;  %6751 = vmatmul.mubr.msk.bf16.gmra.mxu1 %vm689_vm2, %v1903_v27  ;;  %6780 = vmatprep.mubr.msk.bf16.mxu0 %vm7388_vm1, %v9686_v1 }
 0x104   : > { %v919_v62 = vadd.f32 %v918_v58, %v7900_v50  ;;  %v6586_v63 = vpop.f32.mrf.mxu0  ;;  %6786 = vmatprep.mubr.msk.bf16.mxu1 %vm7388_vm1, %v9686_v1 }
 0x105   : > { %v6560_v40 = vpop.f32.mrf.mxu1 }
 0x106   : > { %v1081_v0 = vpop.f32.mrf.mxu0 }
 0x107   : > { %v921_v3 = vpop.f32.mrf.mxu1  ;;  %v7954_v4 = vadd.f32 %v1081_v0, %v914_v53 }
 0x108   : > { %v922_v34 = vadd.f32 %v921_v3, %v7911_v61  ;;  %v6587_v14 = vpop.f32.mrf.mxu0 }
 0x109   : > { %v6561_v12 = vpop.f32.mrf.mxu1 }
 0x10a   : > { %v1086_v51 = vpop.f32.mrf.mxu0  ;;  %6781 = vmatmul.mubr.msk.bf16.gmra.mxu0 %vm689_vm2, %v2097_v46 }
 0x10b   : > { %v926_v15 = vpop.f32.mrf.mxu1  ;;  %v7958_v16 = vadd.f32 %v1086_v51, %v919_v62  ;;  %6830 = vmatprep.mubr.msk.bf16.mxu0 %vm7388_vm1, %v9686_v1  ;;  %v2224_v51 = vld [vmem:[%s9667_s6] sm:$0x3] }
 0x10c   : > { %v927_v50 = vadd.f32 %v926_v15, %v7848_v22  ;;  %v6590_v17 = vpop.f32.mrf.mxu0 }
 0x10d   : > { %v6564_v19 = vpop.f32.mrf.mxu1 }
 0x10e   : > { %v1089_v24 = vpop.f32.mrf.mxu0 }
 0x10f   : > { %v929_v25 = vpop.f32.mrf.mxu1  ;;  %v7963_v59 = vadd.f32 %v1089_v24, %v922_v34 }
 0x110   : > { %v930_v61 = vadd.f32 %v929_v25, %v7859_v60  ;;  %v6591_v26 = vpop.f32.mrf.mxu0 }
 0x111   : > { %v6565_v27 = vpop.f32.mrf.mxu1 }
 0x112   : > { %v1094_v28 = vpop.f32.mrf.mxu0 }
 0x113   : > { %v934_v29 = vpop.f32.mrf.mxu1  ;;  %v7966_v30 = vadd.f32 %v1094_v28, %v927_v50  ;;  %v2226_v50 = vsel %vm711_vm0, %v2224_v51, 0 }
 0x114   : > { %v935_v33 = vadd.f32 %v934_v29, %v7867_v9  ;;  %v6594_v35 = vpop.f32.mrf.mxu0  ;;  %6785 = vmatpush3.bf16.msra.mxu1 %v2226_v50 }
 0x115   : > { %v6568_v36 = vpop.f32.mrf.mxu1  ;;  %6858 = vmatprep.subr.bf16.mxu1 %v9686_v1 }
 0x116   : > { %v1097_v37 = vpop.f32.mrf.mxu0 }
 0x117   : > { %v937_v22 = vpop.f32.mrf.mxu1  ;;  %v7969_v38 = vadd.f32 %v1097_v37, %v930_v61  ;;  %6787 = vmatmul.mubr.msk.bf16.vlgmr.msra.gmra.mxu1 %vm689_vm2, %v7616_v2 }
 0x118   : > { %v938_v41 = vadd.f32 %v937_v22, %v7878_v11  ;;  %v6595_v7 = vpop.f32.mrf.mxu0  ;;  %6790 = vmatprep.mubr.msk.bf16.mxu1 %vm7388_vm1, %v9686_v1 }
 0x119   : > { %v6569_v42 = vpop.f32.mrf.mxu1 }
 0x11a   : > { %v1102_v43 = vpop.f32.mrf.mxu0 }
 0x11b   : > { %v942_v60 = vpop.f32.mrf.mxu1  ;;  %v7972_v46 = vadd.f32 %v1102_v43, %v935_v33 }
 0x11c   : > { %v943_v47 = vadd.f32 %v942_v60, %v7886_v31  ;;  %v6598_v48 = vpop.f32.mrf.mxu0 }
 0x11d   : > { %v6572_v9 = vpop.f32.mrf.mxu1 }
 0x11e   : > { %v1105_v21 = vpop.f32.mrf.mxu0 }
 0x11f   : > { %v945_v49 = vpop.f32.mrf.mxu1  ;;  %v7975_v56 = vadd.f32 %v1105_v21, %v938_v41  ;;  %6791 = vmatmul.mubr.msk.bf16.gmra.mxu1 %vm689_vm2, %v7631_v5 }
 0x120   : > { %v6599_v52 = vpop.f32.mrf.mxu0  ;;  %6794 = vmatprep.mubr.msk.bf16.mxu1 %vm7388_vm1, %v9686_v1 }
 0x121   : > { %v6573_v53 = vpop.f32.mrf.mxu1 }
 0x122   : > { %v1110_v54 = vpop.f32.mrf.mxu0 }
 0x123   : > { %v7977_v11 = vadd.f32 %v1110_v54, %v943_v47  ;;  %v1236_v55 = vpop.f32.mrf.mxu1 }
 0x124   : > { %v1290_v57 = vadd.f32 %v1236_v55, %v7919_v18  ;;  %v6602_v58 = vpop.f32.mrf.mxu0 }
 0x125   : > { %v6608_v62 = vpop.f32.mrf.mxu1 }
 0x126   : > { %v1113_v63 = vpop.f32.mrf.mxu0 }
 0x127   : > { %v1239_v31 = vpop.f32.mrf.mxu1  ;;  %6795 = vmatmul.mubr.msk.bf16.gmra.mxu1 %vm689_vm2, %v7642_v6 }
 0x128   : > { %v1291_v18 = vadd.f32 %v1239_v31, %v7927_v32  ;;  %v6603_v40 = vpop.f32.mrf.mxu0  ;;  %6798 = vmatprep.mubr.msk.bf16.mxu1 %vm7388_vm1, %v9686_v1 }
 0x129   : > { %v6609_v32 = vpop.f32.mrf.mxu1 }
 0x12a   : > { %v1410_v0 = vpop.f32.mrf.mxu0 }
 0x12b   : > { %v1244_v3 = vpop.f32.mrf.mxu1  ;;  %v8023_v34 = vadd.f32 %v1410_v0, %v1290_v57 }
 0x12c   : > { %v1292_v14 = vadd.f32 %v1244_v3, %v7933_v44  ;;  %v6638_v12 = vpop.f32.mrf.mxu0 }
 0x12d   : > { %v6612_v15 = vpop.f32.mrf.mxu1 }
 0x12e   : > { %v1413_v17 = vpop.f32.mrf.mxu0 }
 0x12f   : > { %v1247_v19 = vpop.f32.mrf.mxu1  ;;  %v8030_v24 = vadd.f32 %v1413_v17, %v1291_v18  ;;  %6799 = vmatmul.mubr.msk.bf16.gmra.mxu1 %vm689_vm2, %v7656_v8  ;;  %v7280_v8 = vld [vmem:[%s9668_s7 + $0x30] sm:$0xff]  }
 0x130   : > { %v1293_v39 = vadd.f32 %v1247_v19, %v7941_v23  ;;  %v6639_v25 = vpop.f32.mrf.mxu0  ;;  %v7274_v23 = vld [vmem:[%s9668_s7 + $0x78] sm:$0xff]   ;;  %6802 = vmatprep.mubr.msk.bf16.mxu1 %vm7388_vm1, %v9686_v1 }
 0x131   : > { %v6613_v61 = vpop.f32.mrf.mxu1  ;;  %6815 = vmatpush3.bf16.msra.mxu0 %v7274_v23 }
 0x132   : > { %v1418_v44 = vpop.f32.mrf.mxu0  ;;  %6816 = vmatprep.subr.bf16.mxu0 %v9686_v1 }
 0x133   : > { %v1252_v26 = vpop.f32.mrf.mxu1  ;;  %v8038_v27 = vadd.f32 %v1418_v44, %v1292_v14 }
 0x134   : > { %v1294_v28 = vadd.f32 %v1252_v26, %v7946_v45  ;;  %v6642_v29 = vpop.f32.mrf.mxu0 }
 0x135   : > { %v6616_v33 = vpop.f32.mrf.mxu1 }
 0x136   : > { %v1421_v35 = vpop.f32.mrf.mxu0 }
 0x137   : > { %v1255_v36 = vpop.f32.mrf.mxu1  ;;  %v8044_v37 = vadd.f32 %v1421_v35, %v1293_v39  ;;  %6803 = vmatmul.mubr.msk.bf16.gmra.mxu1 %vm689_vm2, %v7670_v10  ;;  %v7283_v10 = vld [vmem:[%s9668_s7 + $0x20] sm:$0xff]  }
 0x138   : > { %v1295_v2 = vadd.f32 %v1255_v36, %v7954_v4  ;;  %v6643_v22 = vpop.f32.mrf.mxu0  ;;  %v7275_v4 = vld [vmem:[%s9668_s7 + $0x70] sm:$0xff]   ;;  %6806 = vmatprep.mubr.msk.bf16.mxu1 %vm7388_vm1, %v9686_v1 }
 0x139   : > { %v6617_v41 = vpop.f32.mrf.mxu1  ;;  %6817 = vmatpush3.bf16.msra.mxu0 %v7275_v4 }
 0x13a   : > { %v1426_v45 = vpop.f32.mrf.mxu0  ;;  %6818 = vmatprep.subr.bf16.mxu0 %v9686_v1 }
 0x13b   : > { %v1260_v7 = vpop.f32.mrf.mxu1  ;;  %v8052_v42 = vadd.f32 %v1426_v45, %v1294_v28  ;;  %v7284_v45 = vld [vmem:[%s9668_s7 + $0x48] sm:$0xff]  }
 0x13c   : > { %v1296_v43 = vadd.f32 %v1260_v7, %v7958_v16  ;;  %v6646_v60 = vpop.f32.mrf.mxu0 }
 0x13d   : > { %v6620_v47 = vpop.f32.mrf.mxu1 }
 0x13e   : > { %v1429_v48 = vpop.f32.mrf.mxu0 }
 0x13f   : > { %v1263_v9 = vpop.f32.mrf.mxu1  ;;  %v8058_v21 = vadd.f32 %v1429_v48, %v1295_v2  ;;  %v7281_v2 = vld [vmem:[%s9668_s7 + $0x50] sm:$0xff]   ;;  %6807 = vmatmul.mubr.msk.bf16.gmra.mxu1 %vm689_vm2, %v7684_v13  ;;  %v7286_v13 = vld [vmem:[%s9668_s7 + $0x40] sm:$0xff]  }
 0x140   : > { %v1297_v5 = vadd.f32 %v1263_v9, %v7963_v59  ;;  %v6647_v49 = vpop.f32.mrf.mxu0  ;;  %v7276_v59 = vld [vmem:[%s9668_s7 + $0x68] sm:$0xff]   ;;  %6810 = vmatprep.mubr.msk.bf16.mxu1 %vm7388_vm1, %v9686_v1 }
 0x141   : > { %v6621_v52 = vpop.f32.mrf.mxu1  ;;  %6819 = vmatpush3.bf16.msra.mxu0 %v7276_v59 }
 0x142   : > { %v1434_v16 = vpop.f32.mrf.mxu0  ;;  %6820 = vmatprep.subr.bf16.mxu0 %v9686_v1 }
 0x143   : > { %v1268_v53 = vpop.f32.mrf.mxu1  ;;  %v8066_v54 = vadd.f32 %v1434_v16, %v1296_v43  ;;  %v7287_v43 = vld [vmem:[%s9668_s7 + $0x10] sm:$0xff]  }
 0x144   : > { %v1298_v55 = vadd.f32 %v1268_v53, %v7966_v30  ;;  %v6650_v57 = vpop.f32.mrf.mxu0  ;;  %v7279_v30 = vld [vmem:[%s9668_s7 + $0x38] sm:$0xff]  }
 0x145   : > { %v6624_v58 = vpop.f32.mrf.mxu1  ;;  %6859 = vmatpush3.bf16.msra.mxu1 %v7279_v30 }
 0x146   : > { %v1437_v62 = vpop.f32.mrf.mxu0  ;;  %6860 = vmatprep.subr.bf16.mxu1 %v9686_v1  ;;  %v7292_v58 = vld [vmem:[%s9668_s7] sm:$0xff]  }
 0x147   : > { %v1271_v63 = vpop.f32.mrf.mxu1  ;;  %v8072_v31 = vadd.f32 %v1437_v62, %v1297_v5  ;;  %v7288_v5 = vld [vmem:[%s9668_s7 + $0x8] sm:$0xff]   ;;  %6811 = vmatmul.mubr.msk.bf16.gmra.mxu1 %vm689_vm2, %v7695_v20 }
 0x148   : > { %v1299_v6 = vadd.f32 %v1271_v63, %v7969_v38  ;;  %v6651_v18 = vpop.f32.mrf.mxu0  ;;  %v7277_v38 = vld [vmem:[%s9668_s7 + $0x60] sm:$0xff]   ;;  %6874 = vmatprep.mubr.msk.bf16.mxu1 %vm7388_vm1, %v9686_v1 }
 0x149   : > { %v6625_v40 = vpop.f32.mrf.mxu1  ;;  %6821 = vmatpush3.bf16.msra.mxu0 %v7277_v38  ;;  %6861 = vmatpush3.bf16.msra.mxu1 %v7280_v8 }
 0x14a   : > { %v1442_v32 = vpop.f32.mrf.mxu0  ;;  %6822 = vmatprep.subr.bf16.mxu0 %v9686_v1  ;;  %6862 = vmatprep.subr.bf16.mxu1 %v9686_v1 }
 0x14b   : > { %v1276_v0 = vpop.f32.mrf.mxu1  ;;  %v8083_v3 = vadd.f32 %v1442_v32, %v1298_v55 }
 0x14c   : > { %v1300_v14 = vadd.f32 %v1276_v0, %v7972_v46  ;;  %v6654_v12 = vpop.f32.mrf.mxu0  ;;  %v7282_v46 = vld [vmem:[%s9668_s7 + $0x28] sm:$0xff]  }
 0x14d   : > { %v6628_v51 = vpop.f32.mrf.mxu1  ;;  %6863 = vmatpush3.bf16.msra.mxu1 %v7282_v46 }
 0x14e   : > { %v1445_v15 = vpop.f32.mrf.mxu0  ;;  %6864 = vmatprep.subr.bf16.mxu1 %v9686_v1 }
 0x14f   : > { %v1279_v50 = vpop.f32.mrf.mxu1  ;;  %v8094_v17 = vadd.f32 %v1445_v15, %v1299_v6 }
 0x150   : > { %v1301_v19 = vadd.f32 %v1279_v50, %v7975_v56  ;;  %v6655_v39 = vpop.f32.mrf.mxu0  ;;  %v7278_v56 = vld [vmem:[%s9668_s7 + $0x58] sm:$0xff]  }
 0x151   : > { %v6629_v25 = vpop.f32.mrf.mxu1  ;;  %6823 = vmatpush3.bf16.msra.mxu0 %v7278_v56  ;;  %6865 = vmatpush3.bf16.msra.mxu1 %v7283_v10 }
 0x152   : > { %v1450_v61 = vpop.f32.mrf.mxu0  ;;  %6824 = vmatprep.subr.bf16.mxu0 %v9686_v1  ;;  %6866 = vmatprep.subr.bf16.mxu1 %v9686_v1 }
 0x153   : > { %v1284_v44 = vpop.f32.mrf.mxu1  ;;  %v8105_v26 = vadd.f32 %v1450_v61, %v1300_v14 }
 0x154   : > { %v1302_v28 = vadd.f32 %v1284_v44, %v7977_v11  ;;  %v6658_v29 = vpop.f32.mrf.mxu0  ;;  %v7285_v11 = vld [vmem:[%s9668_s7 + $0x18] sm:$0xff]  }
 0x155   : > { %v6632_v33 = vpop.f32.mrf.mxu1  ;;  %6825 = vmatpush3.bf16.msra.mxu0 %v7281_v2  ;;  %6867 = vmatpush3.bf16.msra.mxu1 %v7285_v11 }
 0x156   : > { %v1453_v23 = vpop.f32.mrf.mxu0  ;;  %6826 = vmatprep.subr.bf16.mxu0 %v9686_v1  ;;  %6868 = vmatprep.subr.bf16.mxu1 %v9686_v1 }
 0x157   : > { %v1287_v35 = vpop.f32.mrf.mxu1  ;;  %v8116_v36 = vadd.f32 %v1453_v23, %v1301_v19 }
 0x158   : > { %v6659_v22 = vpop.f32.mrf.mxu0 }
 0x159   : > { %v6633_v41 = vpop.f32.mrf.mxu1  ;;  %6827 = vmatpush3.bf16.msra.mxu0 %v7284_v45  ;;  %6869 = vmatpush3.bf16.msra.mxu1 %v7287_v43 }
 0x15a   : > { %v1458_v7 = vpop.f32.mrf.mxu0  ;;  %6828 = vmatprep.subr.bf16.mxu0 %v9686_v1  ;;  %6870 = vmatprep.subr.bf16.mxu1 %v9686_v1 }
 0x15b   : > { %v8134_v60 = vadd.f32 %v1458_v7, %v1302_v28  ;;  %v8136_v47 = vpop.f32.mrf.mxu1 }
 0x15c   : > { %v6662_v4 = vpop.f32.mrf.mxu0 }
 0x15d   : > { %v6668_v48 = vpop.f32.mrf.mxu1  ;;  %6829 = vmatpush3.bf16.msra.mxu0 %v7286_v13  ;;  %6871 = vmatpush3.bf16.msra.mxu1 %v7288_v5 }
 0x15e   : > { %v1461_v9 = vpop.f32.mrf.mxu0  ;;  %6902 = vmatprep.subr.bf16.mxu0 %v9686_v1  ;;  %6872 = vmatprep.subr.bf16.mxu1 %v9686_v1 }
 0x15f   : > { %v8148_v49 = vpop.f32.mrf.mxu1 }
 0x160   : > { %v6663_v52 = vpop.f32.mrf.mxu0 }
 0x161   : > { %v6669_v16 = vpop.f32.mrf.mxu1  ;;  %6873 = vmatpush3.bf16.msra.mxu1 %v7292_v58 }
 0x162   : > { %v1777_v53 = vpop.f32.mrf.mxu0  ;;  %6946 = vmatprep.subr.bf16.mxu1 %v9686_v1 }
 0x163   : > { %v8154_v55 = vpop.f32.mrf.mxu1 }
 0x164   : > { %v6698_v57 = vpop.f32.mrf.mxu0 }
 0x165   : > { %v6672_v59 = vpop.f32.mrf.mxu1 }
 0x166   : > { %v1780_v62 = vpop.f32.mrf.mxu0 }
 0x167   : > { %v8162_v20 = vpop.f32.mrf.mxu1 }
 0x168   : > { %v6699_v63 = vpop.f32.mrf.mxu0 }
 0x169   : > { %v6673_v6 = vpop.f32.mrf.mxu1 }
 0x16a   : > { %v8165_v18 = vpop.f32.mrf.mxu0  ;;  %v1644_v6 = vadd.f32 %v8136_v47, %v8023_v34  ;;  %v8217_v34 = vpop.permute.xlu0 %2338 }
 0x16b   : > { %v8167_v30 = vpop.f32.mrf.mxu1 }
 0x16c   : > { %v6702_v40 = vpop.f32.mrf.mxu0 }
 0x16d   : > { %v6676_v32 = vpop.f32.mrf.mxu1 }
 0x16e   : > { %v8169_v0 = vpop.f32.mrf.mxu0 }
 0x16f   : > { %v8171_v38 = vpop.f32.mrf.mxu1 }
 0x170   : > { %v6703_v14 = vpop.f32.mrf.mxu0 }
 0x171   : > { %v6677_v12 = vpop.f32.mrf.mxu1  ;;  %v1831_v14 = vadd.f32 %v1777_v53, %v1644_v6  ;;  %v2415_v6 = vld [vmem:[%s8223_s21 + $0x8] sm:$0xff] }
 0x172   : > { %v8173_v8 = vpop.f32.mrf.mxu0 }
 0x173   : > { %v8175_v51 = vpop.f32.mrf.mxu1 }
 0x174   : > { %v6706_v15 = vpop.f32.mrf.mxu0 }
 0x175   : > { %v6680_v50 = vpop.f32.mrf.mxu1 }
 0x176   : > { %v8177_v19 = vpop.f32.mrf.mxu0  ;;  %v1645_v50 = vadd.f32 %v8148_v49, %v8030_v24  ;;  %v1646_v49 = vadd.f32 %v8154_v55, %v8038_v27  ;;  %v8231_v27 = vpop.permute.xlu0 %2343  ;;  %v1647_v55 = vadd.f32 %v8162_v20, %v8044_v37  ;;  %v8245_v37 = vld [vmem:[%s8223_s21 + $0x28] sm:$0xff]  ;;  %v8248_v20 = vld [vmem:[%s8223_s21 + $0x30] sm:$0xff] }
 0x177   : > { %v8179_v39 = vpop.f32.mrf.mxu1 }
 0x178   : > { %v6707_v46 = vpop.f32.mrf.mxu0  ;;  %v1832_v47 = vadd.f32 %v1780_v62, %v1645_v50  ;;  %v1834_v50 = vadd.f32 %v8169_v0, %v1647_v55 }
 0x179   : > { %v6681_v25 = vpop.f32.mrf.mxu1 }
 0x17a   : > { %v8181_v61 = vpop.f32.mrf.mxu0 }
 0x17b   : > { %v8183_v44 = vpop.f32.mrf.mxu1 }
 0x17c   : > { %v6710_v56 = vpop.f32.mrf.mxu0 }
 0x17d   : > { %v6684_v28 = vpop.f32.mrf.mxu1 }
 0x17e   : > { %v8185_v29 = vpop.f32.mrf.mxu0  ;;  %v8215_v28 = vld [vmem:[%s9669_s8] ss:$0 sm:$0xff] }
 0x17f   : > { %v8187_v10 = vpop.f32.mrf.mxu1 }
 0x180   : > { %v6711_v33 = vpop.f32.mrf.mxu0 }
 0x181   : > { %v6685_v23 = vpop.f32.mrf.mxu1 }
 0x182   : > { %v8189_v35 = vpop.f32.mrf.mxu0 }
 0x183   : > { %v8191_v2 = vpop.f32.mrf.mxu1 }
 0x184   : > { %v6714_v11 = vpop.f32.mrf.mxu0 }
 0x185   : > { %v6688_v22 = vpop.f32.mrf.mxu1 }
 0x186   : > { %v8193_v41 = vpop.f32.mrf.mxu0 }
 0x187   : > { %v8195_v45 = vpop.f32.mrf.mxu1 }
 0x188   : > { %v6715_v7 = vpop.f32.mrf.mxu0 }
 0x189   : > { %v6689_v43 = vpop.f32.mrf.mxu1  ;;  %v2414_v7 = vld [vmem:[%s8223_s21] sm:$0xff] }
 0x18a   : > { %v8197_v4 = vpop.f32.mrf.mxu0  ;;  %v1833_v43 = vadd.f32 %v8165_v18, %v1646_v49 }
 0x18b   : > { %v8199_v48 = vpop.f32.mrf.mxu1 }
 0x18c   : > { %v6718_v13 = vpop.f32.mrf.mxu0 }
 0x18d   : > { %v6692_v9 = vpop.f32.mrf.mxu1 }
 0x18e   : > { %v8201_v5 = vpop.f32.mrf.mxu0 }
 0x18f   : > { %v1641_v52 = vpop.f32.mrf.mxu1 }
 0x190   : > { %v6719_v16 = vpop.f32.mrf.mxu0 }
 0x191   : > { %v6693_v57 = vpop.f32.mrf.mxu1 }
 0x192   : > { %v8203_v58 = vpop.f32.mrf.mxu0 }
 0x193   : > { %v1963_v59 = vpop.f32.mrf.mxu1 }
 0x194   : > { %v6722_v63 = vpop.f32.mrf.mxu0  ;;  %v2017_v46 = vadd.f32 %v1963_v59, %v1831_v14  ;;  %v2416_v14 = vld [vmem:[%s8223_s21 + $0x10] sm:$0xff] }
 0x195   : > { %v6728_v40 = vpop.f32.mrf.mxu1 }
 0x196   : > { %v1828_v32 = vpop.f32.mrf.mxu0 }
 0x197   : > { %v1966_v12 = vpop.f32.mrf.mxu1  ;;  %v8237_v32 = vpop.permute.xlu1 %2348 }
 0x198   : > { %v6723_v15 = vpop.f32.mrf.mxu0  ;;  %v2018_v23 = vadd.f32 %v1966_v12, %v1832_v47  ;;  %v2417_v12 = vld [vmem:[%s8223_s21 + $0x18] sm:$0xff] }
 0x199   : > { %v6729_v25 = vpop.f32.mrf.mxu1  ;;  %v8242_v15 = vld [vmem:[%s8223_s21 + $0x20] sm:$0xff]  ;;  %v8253_v47 = vld [vmem:[%s8223_s21 + $0x38] sm:$0xff] }
 0x19a   : > { %v2157_v56 = vpop.f32.mrf.mxu0 }
 0x19b   : > { %v1971_v53 = vpop.f32.mrf.mxu1  ;;  %v2211_v33 = vadd.f32 %v2157_v56, %v2017_v46 }
 0x19c   : > { %v6758_v24 = vpop.f32.mrf.mxu0  ;;  %v2019_v57 = vadd.f32 %v1971_v53, %v1833_v43  ;;  %v8256_v53 = vld [vmem:[%s8223_s21 + $0x40] sm:$0xff] }
 0x19d   : > { %v2323_v11 = vadd.f32 %v8215_v28, %v2211_v33  ;;  %v6732_v22 = vpop.f32.mrf.mxu1  ;;  %v8259_v33 = vld [vmem:[%s8223_s21 + $0x48] sm:$0xff]  ;;  %v1648_v24 = vadd.f32 %v8167_v30, %v8052_v42 }
 0x19e   : > { %v2160_v62 = vpop.f32.mrf.mxu0  ;;  %v8277_v22 = vld [vmem:[%s8223_s21 + $0x60] sm:$0xf] }
 0x19f   : > { %v2401_v13 = vmul.f32 %v8217_v34, %v2323_v11  ;;  %v1974_v9 = vpop.f32.mrf.mxu1  ;;  %v2212_v52 = vadd.f32 %v2160_v62, %v2018_v23  ;;  %v8271_v23 = vld [vmem:[%s8223_s21 + $0x50] sm:$0xff]  ;;  %v8274_v11 = vld [vmem:[%s8223_s21 + $0x58] sm:$0xff]  ;;  %s9463_s21 = scalar_lea.vmem %s9664_s3, %s8208_s27 }
 0x1a0   : > { %v6759_v16 = vpop.f32.mrf.mxu0  ;;  %v2020_v62 = vadd.f32 %v1974_v9, %v1834_v50 }
 0x1a1   : > { %v2427_v59 = vadd.f32 %v2414_v7, %v2401_v13  ;;  %v2324_v63 = vadd.f32 %v8215_v28, %v2212_v52  ;;  %v6733_v18 = vpop.f32.mrf.mxu1  ;;  %v1835_v13 = vadd.f32 %v8173_v8, %v1648_v24 }
 0x1a2   : > { %v2165_v40 = vpop.f32.mrf.mxu0 }
 0x1a3   : > { %vm2440_vm6 = vcmp.ge.f32.partialorder %v2427_v59, 1.0  ;;  %v2402_v46 = vmul.f32 %v8231_v27, %v2324_v63  ;;  %v1979_v25 = vpop.f32.mrf.mxu1  ;;  %v2213_v56 = vadd.f32 %v2165_v40, %v2019_v57  ;;  %v1649_v63 = vadd.f32 %v8171_v38, %v8058_v21 }
 0x1a4   : > { %v5757_v0 = vsel %vm2440_vm6, 1.0, %v9686_v1  ;;  %v6762_v49 = vpop.f32.mrf.mxu0  ;;  %v2021_v9 = vadd.f32 %v1979_v25, %v1835_v13  ;;  %v1650_v25 = vadd.f32 %v8175_v51, %v8066_v54  ;;  %v1651_v51 = vadd.f32 %v8179_v39, %v8072_v31 }
 0x1a5   : > { %v2479_v7 = vsub.f32 %v2427_v59, %v5757_v0  ;;  %v2428_v43 = vadd.f32 %v2415_v6, %v2402_v46  ;;  %v2325_v42 = vadd.f32 %v8215_v28, %v2213_v56  ;;  %v6736_v30 = vpop.f32.mrf.mxu1  ;;  %v8286_v6 = vpop.permute.xlu1 %2353  ;;  %v1836_v49 = vadd.f32 %v8177_v19, %v1649_v63 }
 0x1a6   : > { %v2168_v52 = vpop.f32.mrf.mxu0  ;;  %v1837_v13 = vadd.f32 %v8181_v61, %v1650_v25 }
 0x1a7   : > { %vm2441_vm7 = vcmp.ge.f32.partialorder %v2428_v43, 1.0  ;;  %v2403_v16 = vmul.f32 %v8237_v32, %v2325_v42  ;;  %v1982_v55 = vpop.f32.mrf.mxu1  ;;  %v2214_v57 = vadd.f32 %v2168_v52, %v2020_v62  ;;  %2492 = vst [vmem:[%s8267_s25] sm:$0xff] %v2479_v7  ;;  %v8298_v52 = vpop.permute.xlu0 %2358 }
 0x1a8   : > { %v5758_v59 = vsel %vm2441_vm7, 1.0, %v9686_v1  ;;  %v6763_v18 = vpop.f32.mrf.mxu0 }
 0x1a9   : > { %v2480_v40 = vsub.f32 %v2428_v43, %v5758_v59  ;;  %v6114_v8 = vpack.c.bf16 %v5758_v59, %v5757_v0  ;;  %v2429_v50 = vadd.f32 %v2416_v14, %v2403_v16  ;;  %v2326_v46 = vadd.f32 %v8215_v28, %v2214_v57  ;;  %v6737_v56 = vpop.f32.mrf.mxu1 }
 0x1aa   : > { %v2173_v24 = vpop.f32.mrf.mxu0  ;;  %v2022_v43 = vadd.f32 %v1982_v55, %v1836_v49  ;;  %v1838_v56 = vadd.f32 %v8185_v29, %v1651_v51  ;;  %v1652_v49 = vadd.f32 %v8183_v44, %v8083_v3 }
 0x1ab   : > { %6261 = vst [vmem:[%s7986_s22 + $0x8] sm:$0xff] %v6114_v8   ;;  %vm2442_vm8 = vcmp.ge.f32.partialorder %v2429_v50, 1.0  ;;  %v2404_v21 = vmul.f32 %v8286_v6, %v2326_v46  ;;  %v1987_v38 = vpop.f32.mrf.mxu1  ;;  %v2215_v7 = vadd.f32 %v2173_v24, %v2021_v9  ;;  %2493 = vst [vmem:[%s8267_s25 + $0x8] sm:$0xff] %v2480_v40 }
 0x1ac   : > { %v5759_v0 = vsel %vm2442_vm8, 1.0, %v9686_v1  ;;  %v6766_v14 = vpop.f32.mrf.mxu0  ;;  %v2023_v55 = vadd.f32 %v1987_v38, %v1837_v13  ;;  %vm2671_vm8 = vcmask 1044480  }
 0x1ad   : > { %v2481_v62 = vsub.f32 %v2429_v50, %v5759_v0  ;;  %v2430_v42 = vadd.f32 %v2417_v12, %v2404_v21  ;;  %v2327_v30 = vadd.f32 %v8215_v28, %v2215_v7  ;;  %v6740_v19 = vpop.f32.mrf.mxu1  ;;  %v8307_v50 = vpop.permute.xlu1 %2363  ;;  %v1839_v14 = vadd.f32 %v8189_v35, %v1652_v49 }
 0x1ae   : > { %v2176_v16 = vpop.f32.mrf.mxu0  ;;  %v1655_v49 = vadd.f32 %v8195_v45, %v8116_v36 }
 0x1af   : > { %vm2443_vm9 = vcmp.ge.f32.partialorder %v2430_v42, 1.0  ;;  %v2405_v57 = vmul.f32 %v8298_v52, %v2327_v30  ;;  %v1990_v63 = vpop.f32.mrf.mxu1  ;;  %v2216_v54 = vadd.f32 %v2176_v16, %v2022_v43  ;;  %2494 = vst [vmem:[%s8267_s25 + $0x10] sm:$0xff] %v2481_v62  ;;  %v8319_v62 = vpop.permute.xlu0 %2368  ;;  %v1653_v30 = vadd.f32 %v8187_v10, %v8094_v17 }
 0x1b0   : > { %v5760_v12 = vsel %vm2443_vm9, 1.0, %v9686_v1  ;;  %v6767_v59 = vpop.f32.mrf.mxu0  ;;  %v2024_v7 = vadd.f32 %v1990_v63, %v1838_v56  ;;  %vm2831_vm9 = vsmask.f32 5376 }
 0x1b1   : > { %v2482_v9 = vsub.f32 %v2430_v42, %v5760_v12  ;;  %v6117_v61 = vpack.c.bf16 %v5760_v12, %v5759_v0  ;;  %v2431_v18 = vadd.f32 %v8242_v15, %v2405_v57  ;;  %v2328_v40 = vadd.f32 %v8215_v28, %v2216_v54  ;;  %v6741_v8 = vpop.f32.mrf.mxu1  ;;  %v8328_v51 = vpop.permute.xlu1 %2373 }
 0x1b2   : > { %v2181_v46 = vpop.f32.mrf.mxu0 }
 0x1b3   : > { %6262 = vst [vmem:[%s7986_s22 + $0x10] sm:$0xff] %v6117_v61   ;;  %vm2444_vm10 = vcmp.ge.f32.partialorder %v2431_v18, 1.0  ;;  %v2406_v31 = vmul.f32 %v8307_v50, %v2328_v40  ;;  %v1995_v39 = vpop.f32.mrf.mxu1  ;;  %v2217_v24 = vadd.f32 %v2181_v46, %v2023_v55  ;;  %2495 = vst [vmem:[%s8267_s25 + $0x18] sm:$0xff] %v2482_v9  ;;  %v1840_v55 = vadd.f32 %v8193_v41, %v1653_v30 }
 0x1b4   : > { %v5761_v15 = vsel %vm2444_vm10, 1.0, %v9686_v1  ;;  %v6770_v21 = vpop.f32.mrf.mxu0  ;;  %v2025_v19 = vadd.f32 %v1995_v39, %v1839_v14  ;;  %v1654_v9 = vadd.f32 %v8191_v2, %v8105_v26  ;;  %vm3058_vm10 = vsmask.f32 4352 }
 0x1b5   : > { %v2483_v38 = vsub.f32 %v2431_v18, %v5761_v15  ;;  %v2432_v25 = vadd.f32 %v8245_v37, %v2406_v31  ;;  %v2329_v29 = vadd.f32 %v8215_v28, %v2217_v24  ;;  %v6744_v0 = vpop.f32.mrf.mxu1  ;;  %v8340_v31 = vpop.permute.xlu0 %2378 }
 0x1b6   : > { %v2184_v43 = vpop.f32.mrf.mxu0  ;;  %v1841_v56 = vadd.f32 %v8197_v4, %v1654_v9  ;;  %9694 = vst [vmem:[#allocation2_spill] sm:$0xff] %v8340_v31  ;;  %v8349_v0 = vpop.permute.xlu1 %2383 }
 0x1b7   : > { %vm2445_vm11 = vcmp.ge.f32.partialorder %v2432_v25, 1.0  ;;  %v2407_v42 = vmul.f32 %v8319_v62, %v2329_v29  ;;  %v1998_v3 = vpop.f32.mrf.mxu1  ;;  %v2218_v44 = vadd.f32 %v2184_v43, %v2024_v7  ;;  %2496 = vst [vmem:[%s8267_s25 + $0x20] sm:$0xff] %v2483_v38  ;;  %9695 = vst [vmem:[#allocation3_spill] sm:$0xff] %v8349_v0  ;;  %v1842_v43 = vadd.f32 %v8201_v5, %v1655_v49 }
 0x1b8   : > { %v5762_v37 = vsel %vm2445_vm11, 1.0, %v9686_v1  ;;  %v6771_v13 = vpop.f32.mrf.mxu0  ;;  %v2026_v40 = vadd.f32 %v1998_v3, %v1840_v55  ;;  %v1656_v3 = vadd.f32 %v8199_v48, %v8134_v60 }
 0x1b9   : > { %v2484_v16 = vsub.f32 %v2432_v25, %v5762_v37  ;;  %v6120_v35 = vpack.c.bf16 %v5762_v37, %v5761_v15  ;;  %v2433_v57 = vadd.f32 %v8248_v20, %v2407_v42  ;;  %v2330_v63 = vadd.f32 %v8215_v28, %v2218_v44  ;;  %v6745_v54 = vpop.f32.mrf.mxu1 }
 0x1ba   : > { %v2189_v12 = vpop.f32.mrf.mxu0  ;;  %v8368_v9 = vpop.permute.xlu1 %2393 }
 0x1bb   : > { %6263 = vst [vmem:[%s7986_s22 + $0x18] sm:$0xff] %v6120_v35   ;;  %vm2446_vm12 = vcmp.ge.f32.partialorder %v2433_v57, 1.0  ;;  %v2408_v17 = vmul.f32 %v8328_v51, %v2330_v63  ;;  %v2003_v10 = vpop.f32.mrf.mxu1  ;;  %v2219_v59 = vadd.f32 %v2189_v12, %v2025_v19  ;;  %2497 = vst [vmem:[%s8267_s25 + $0x28] sm:$0xff] %v2484_v16  ;;  %v1843_v16 = vadd.f32 %v8203_v58, %v1656_v3  ;;  %v8361_v35 = vpop.permute.xlu0 %2388  ;;  %v7291_v3 = vld [vmem:[%s9668_s7 + $0xb8] sm:$0xff]  }
 0x1bc   : > { %v5763_v20 = vsel %vm2446_vm12, 1.0, %v9686_v1  ;;  %v6774_v61 = vpop.f32.mrf.mxu0  ;;  %v2027_v15 = vadd.f32 %v2003_v10, %v1841_v56  ;;  %9696 = vst [vmem:[#allocation4_spill] sm:$0xff] %v8361_v35  ;;  %9697 = vst [vmem:[#allocation5_spill] sm:$0xff] %v8368_v9 }
 0x1bd   : > { %v2485_v18 = vsub.f32 %v2433_v57, %v5763_v20  ;;  %v2434_v8 = vadd.f32 %v8253_v47, %v2408_v17  ;;  %v2331_v41 = vadd.f32 %v8215_v28, %v2219_v59  ;;  %v6748_v46 = vpop.f32.mrf.mxu1 }
 0x1be   : > { %v2192_v39 = vpop.f32.mrf.mxu0 }
 0x1bf   : > { %vm2447_vm13 = vcmp.ge.f32.partialorder %v2434_v8, 1.0  ;;  %v2409_v24 = vmul.f32 %v8340_v31, %v2331_v41  ;;  %v2006_v26 = vpop.f32.mrf.mxu1  ;;  %v2220_v2 = vadd.f32 %v2192_v39, %v2026_v40  ;;  %2498 = vst [vmem:[%s8267_s25 + $0x30] sm:$0xff] %v2485_v18  ;;  %v8376_v56 = vpop.permute.xlu0 %2398 }
 0x1c0   : > { %v5764_v47 = vsel %vm2447_vm13, 1.0, %v9686_v1  ;;  %v6775_v21 = vpop.f32.mrf.mxu0  ;;  %v2028_v37 = vadd.f32 %v2006_v26, %v1842_v43  ;;  %9698 = vst [vmem:[#allocation6_spill] sm:$0xff] %v8376_v56 }
 0x1c1   : > { %v2486_v38 = vsub.f32 %v2434_v8, %v5764_v47  ;;  %v6123_v4 = vpack.c.bf16 %v5764_v47, %v5763_v20  ;;  %v2435_v7 = vadd.f32 %v8256_v53, %v2409_v24  ;;  %v2332_v25 = vadd.f32 %v8215_v28, %v2220_v2  ;;  %v6749_v29 = vpop.f32.mrf.mxu1 }
 0x1c2   : > { %v2197_v14 = vpop.f32.mrf.mxu0 }
 0x1c3   : > { %6264 = vst [vmem:[%s7986_s22 + $0x20] sm:$0xff] %v6123_v4   ;;  %vm2448_vm14 = vcmp.ge.f32.partialorder %v2435_v7, 1.0  ;;  %v2410_v36 = vmul.f32 %v8349_v0, %v2332_v25  ;;  %v2011_v45 = vpop.f32.mrf.mxu1  ;;  %v2221_v42 = vadd.f32 %v2197_v14, %v2027_v15  ;;  %2499 = vst [vmem:[%s8267_s25 + $0x38] sm:$0xff] %v2486_v38 }
 0x1c4   : > { %v5765_v53 = vsel %vm2448_vm14, 1.0, %v9686_v1  ;;  %v6778_v44 = vpop.f32.mrf.mxu0  ;;  %v2029_v12 = vadd.f32 %v2011_v45, %v1843_v16 }
 0x1c5   : > { %v2487_v30 = vsub.f32 %v2435_v7, %v5765_v53  ;;  %v2436_v19 = vadd.f32 %v8259_v33, %v2410_v36  ;;  %v2333_v5 = vadd.f32 %v8215_v28, %v2221_v42  ;;  %v6752_v13 = vpop.f32.mrf.mxu1 }
 0x1c6   : > { %v2200_v57 = vpop.f32.mrf.mxu0 }
 0x1c7   : > { %vm2449_vm15 = vcmp.ge.f32.partialorder %v2436_v19, 1.0  ;;  %v2411_v63 = vmul.f32 %v8361_v35, %v2333_v5  ;;  %v2014_v60 = vpop.f32.mrf.mxu1  ;;  %v2222_v48 = vadd.f32 %v2200_v57, %v2028_v37  ;;  %2500 = vst [vmem:[%s8267_s25 + $0x40] sm:$0xff] %v2487_v30 }
 0x1c8   : > { %v5766_v54 = vsel %vm2449_vm15, 1.0, %v9686_v1  ;;  %v6779_v33 = vpop.f32.mrf.mxu0 }
 0x1c9   : > { %v2488_v55 = vsub.f32 %v2436_v19, %v5766_v54  ;;  %v6126_v17 = vpack.c.bf16 %v5766_v54, %v5765_v53  ;;  %v2437_v10 = vadd.f32 %v8271_v23, %v2411_v63  ;;  %v2334_v58 = vadd.f32 %v8215_v28, %v2222_v48  ;;  %v6753_v59 = vpop.f32.mrf.mxu1  ;;  %v7294_v48 = vld [vmem:[%s9668_s7 + $0xb0] sm:$0xff]   ;;  %v7301_v54 = vld [vmem:[%s9668_s7 + $0xf8] sm:$0xff]  }
 0x1ca   : > { %v2205_v20 = vpop.f32.mrf.mxu0  ;;  %v7303_v59 = vld [vmem:[%s9668_s7 + $0xf0] sm:$0xff]  }
 0x1cb   : > { %6265 = vst [vmem:[%s7986_s22 + $0x28] sm:$0xff] %v6126_v17   ;;  %vm2450_vm0 = vcmp.ge.f32.partialorder %v2437_v10, 1.0  ;;  %v2412_v61 = vmul.f32 %v8368_v9, %v2334_v58  ;;  %v2223_v18 = vadd.f32 %v2205_v20, %v2029_v12  ;;  %2501 = vst [vmem:[%s8267_s25 + $0x48] sm:$0xff] %v2488_v55  ;;  %v7296_v58 = vld [vmem:[%s9668_s7 + $0xa8] sm:$0xff]  }
 0x1cc   : > { %v5767_v40 = vsel %vm2450_vm0, 1.0, %v9686_v1  ;;  %v6782_v8 = vpop.f32.mrf.mxu0 }
 0x1cd   : > { %v2489_v41 = vsub.f32 %v2437_v10, %v5767_v40  ;;  %v2438_v23 = vadd.f32 %v8274_v11, %v2412_v61  ;;  %v2335_v46 = vadd.f32 %v8215_v28, %v2223_v18 }
 0x1ce   : > { %v2208_v39 = vpop.f32.mrf.mxu0 }
 0x1cf   : > { %vm2451_vm6 = vcmp.ge.f32.partialorder %v2438_v23, 1.0  ;;  %v2413_v24 = vmul.f32 %v8376_v56, %v2335_v46  ;;  %2502 = vst [vmem:[%s8267_s25 + $0x50] sm:$0xff] %v2489_v41  ;;  %v7305_v46 = vld [vmem:[%s9668_s7 + $0xe8] sm:$0xff]  }
 0x1d0   : > { %v5768_v26 = vsel %vm2451_vm6, 1.0, %v9686_v1  ;;  %v6783_v2 = vpop.f32.mrf.mxu0 }
 0x1d1   : > { %v2490_v49 = vsub.f32 %v2438_v23, %v5768_v26  ;;  %v6129_v47 = vpack.c.bf16 %v5768_v26, %v5767_v40  ;;  %v2439_v15 = vadd.f32 %v8277_v22, %v2413_v24  ;;  %v7298_v23 = vld [vmem:[%s9668_s7 + $0xa0] sm:$0xff]  }
 0x1d3   : > { %6266 = vst [vmem:[%s7986_s22 + $0x30] sm:$0xff] %v6129_v47   ;;  %vm2452_vm7 = vcmp.ge.f32.partialorder %v2439_v15, 1.0  ;;  %2503 = vst [vmem:[%s8267_s25 + $0x58] sm:$0xff] %v2490_v49 }
 0x1d4   : > { %v5769_v28 = vsel %vm2452_vm7, 1.0, %v9686_v1 }
 0x1d5   : > { %v2491_v11 = vsub.f32 %v2439_v15, %v5769_v28  ;;  %v6099_v21 = vpack.c.bf16 %v5769_v28, %v5769_v28 }
 0x1d7   : > { %2504 = vst [vmem:[%s8267_s25 + $0x60] sm:$0xf] %v2491_v11  ;;  %2587 = vst [vmem:[%s7986_s22 + $0x38] sm:$0x3] %v6099_v21  ;;  %v8478_v11 = vpop.f32.mrf.mxu1  ;;  %v7300_v21 = vld [vmem:[%s9668_s7 + $0x98] sm:$0xff]   ;;  %s9505_s25 = scalar_lea.vmem %s9673_s12, %s8208_s27  ;;  %s7215_s27 = smul.u32 52, %s9779_s19 }
 0x1d8   : > { %s5578_s22 = sshll.u32 %s9779_s19, 3 }
 0x1d9   : > { %s9533_s17 = scalar_lea.vmem %s9674_s13, %s7215_s27  ;;  %s607_s16 = scalar_lea.vmem %s9675_s14, %s5578_s22 }
 0x1da   : > { %s611_s23 = scalar_lea.vmem %s9676_s15, %s5578_s22 }
 0x1de   : > { %v2589_v22 = vld [vmem:[%s8392_s30 + $0x4] sm:$0xf]  ;;  %v2618_v38 = vld [vmem:[%s8392_s30] sm:$0x8]  ;;  %v8397_v4 = vld [vmem:[%s8392_s30 + $0x8] sm:$0xff]  }
 0x1df   : > { %v2588_v7 = vld [vmem:[%s8392_s30] sm:$0xc]  ;;  %v8400_v25 = vcombine.low %v2618_v38, %v2589_v22  ;;  %v8403_v14 = vld [vmem:[%s8392_s30 + $0x10] sm:$0xff]   ;;  %v2673_v43 = vrot.slane %v8397_v4, 3  ;;  %v2841_v36 = vshrl.u32 %v8397_v4, 16  ;;  %v2844_v45 = vshll.u32 %v8397_v4, 16 }
 0x1e0   : > { %v5814_v29 = vcombine.low %v2588_v7, %v2589_v22  ;;  %v2850_v19 = vshrl.u32 %v8403_v14, 16  ;;  %v2853_v57 = vshll.u32 %v8403_v14, 16  ;;  %v2675_v33 = vrot.slane %v8403_v14, 3  ;;  %v8435_v10 = vld [vmem:[%s8392_s30 + $0x18] sm:$0xff]   ;;  %v8451_v8 = vld [vmem:[%s8392_s30 + $0xc] sm:$0xf] }
 0x1e1   : > { %v2672_v42 = vrot.slane %v8400_v25, 3  ;;  %v2843_v30 = vrot.slane %v2841_v36, 2  ;;  %v2846_v37 = vrot.slane %v2844_v45, 3  ;;  %v2859_v18 = vshrl.u32 %v8435_v10, 16  ;;  %v3255_v41 = vld [vmem:[%s8392_s30 + $0x10] sm:$0xf] }
 0x1e2   : > { %v2833_v53 = vshrl.u32 %v5814_v29, 16  ;;  %v2836_v44 = vshll.u32 %v5814_v29, 16  ;;  %v2852_v55 = vrot.slane %v2850_v19, 2  ;;  %v2855_v17 = vrot.slane %v2853_v57, 3  ;;  %v8465_v24 = vld [vmem:[%s8392_s30 + $0x20] sm:$0xff]   ;;  %v7313_v4 = vld [vmem:[%s9668_s7 + $0x138] sm:$0xff]  }
 0x1e3   : > { %v2674_v5 = vsel %vm2671_vm8, %v2672_v42, %v2673_v43  ;;  %v2847_v63 = vor.u32 %v2846_v37, %v2843_v30  ;;  %v2676_v20 = vsel %vm2671_vm8, %v2673_v43, %v2675_v33  ;;  %v2862_v40 = vshll.u32 %v8435_v10, 16  ;;  %v3256_v26 = vld [vmem:[%s8392_s30 + $0x14] sm:$0xf]  ;;  %v8469_v2 = vld [vmem:[%s8392_s30 + $0x18] sm:$0xf] }
 0x1e4   : > { %v2835_v13 = vrot.slane %v2833_v53, 2  ;;  %v2838_v16 = vrot.slane %v2836_v44, 3  ;;  %6831 = vmatmul.mubr.bf16.vlgmr.msra.gmra.mxu0 %v2674_v5  ;;  %v2856_v61 = vor.u32 %v2855_v17, %v2852_v55  ;;  %v2677_v39 = vrot.slane %v8435_v10, 3  ;;  %v6788_v53 = vpop.f32.mrf.mxu1  ;;  %v7325_v14 = vld [vmem:[%s9668_s7 + $0x178] sm:$0xff]   ;;  %v7329_v10 = vld [vmem:[%s9668_s7 + $0x168] sm:$0xff]  }
 0x1e5   : > { %6903 = vmatpush3.bf16.msra.mxu0 %v7291_v3  ;;  %6834 = vmatprep.mubr.msk.bf16.mxu0 %vm7388_vm1, %v9686_v1  ;;  %v2861_v47 = vrot.slane %v2859_v18, 2  ;;  %v2864_v15 = vrot.slane %v2862_v40, 3  ;;  %v5865_v28 = vcombine.low %v8451_v8, %v3255_v41  ;;  %v5866_v7 = vcombine.low %v3256_v26, %v8469_v2  ;;  %v7307_v3 = vld [vmem:[%s9668_s7 + $0xe0] sm:$0xff]  }
 0x1e6   : > { %v2839_v60 = vor.u32 %v2838_v16, %v2835_v13  ;;  %6904 = vmatprep.subr.bf16.mxu0 %v9686_v1  ;;  %v2857_v49 = vsel %vm2831_vm9, %v2847_v63, %v2856_v61  ;;  %v2678_v29 = vsel %vm2671_vm8, %v2675_v33, %v2677_v39  ;;  %v2868_v43 = vshrl.u32 %v8465_v24, 16  ;;  %v8499_v13 = vld [vmem:[%s8392_s30 + $0x28] sm:$0xff]   ;;  %v7309_v33 = vld [vmem:[%s9668_s7 + $0xd8] sm:$0xff]  }
 0x1e7   : > { %v3327_v22 = vshrl.u32 %v5865_v28, 16  ;;  %v3330_v38 = vshll.u32 %v5865_v28, 16  ;;  %v9677_v42 = vshll.u32 %v8465_v24, 16  ;;  %v8495_v44 = vor.u32 %v2864_v15, %v2861_v47  ;;  %v2601_v28 = vld [vmem:[%s8392_s30 + $0x34] sm:$0x1] }
 0x1e8   : > { %v2848_v12 = vsel %vm2831_vm9, %v2839_v60, %v2847_v63  ;;  %v3336_v5 = vshrl.u32 %v5866_v7, 16  ;;  %v3339_v16 = vshll.u32 %v5866_v7, 16  ;;  %v8501_v63 = vcombine.low %v3255_v41, %v3256_v26  ;;  %v8503_v60 = vpop.f32.mrf.mxu1 }
 0x1e9   : > { %6875 = vmatmul.mubr.bf16.vlgmr.msra.gmra.mxu1 %v2848_v12  ;;  %6905 = vmatpush3.bf16.msra.mxu0 %v7294_v48  ;;  %v3329_v30 = vrot.slane %v3327_v22, 3  ;;  %v3332_v37 = vrot.slane %v3330_v38, 4  ;;  %v7304_v48 = vld [vmem:[%s9668_s7 + $0x90] sm:$0xff]   ;;  %v2679_v12 = vrot.slane %v8465_v24, 3  ;;  %v2873_v41 = vrot.slane %v9677_v42, 3 }
 0x1ea   : > { %6878 = vmatprep.mubr.msk.bf16.mxu1 %vm7388_vm1, %v9686_v1  ;;  %6906 = vmatprep.subr.bf16.mxu0 %v9686_v1  ;;  %v3341_v17 = vrot.slane %v3339_v16, 4  ;;  %v2880_v26 = vshll.u32 %v8499_v13, 16  ;;  %v8543_v22 = vld [vmem:[%s8392_s30 + $0x8] sm:$0xf]  ;;  %v2681_v16 = vrot.slane %v8499_v13, 3 }
 0x1eb   : > { %6947 = vmatpush3.bf16.msra.mxu1 %v7301_v54  ;;  %v3338_v54 = vrot.slane %v3336_v5, 3  ;;  %v8515_v55 = vor.u32 %v3332_v37, %v3329_v30 }
 0x1ec   : > { %6948 = vmatprep.subr.bf16.mxu1 %v9686_v1  ;;  %6835 = vmatmul.mubr.bf16.gmra.mxu0 %v2676_v20  ;;  %v2870_v20 = vrot.slane %v2868_v43, 2  ;;  %v3084_v30 = vrot.slane %v2880_v26, 4 }
 0x1ed   : > { %6907 = vmatpush3.bf16.msra.mxu0 %v7296_v58  ;;  %6838 = vmatprep.mubr.msk.bf16.mxu0 %vm7388_vm1, %v9686_v1  ;;  %v6789_v58 = vpop.f32.mrf.mxu1  ;;  %v8533_v47 = vor.u32 %v3341_v17, %v3338_v54  ;;  %v7312_v54 = vld [vmem:[%s9668_s7 + $0xc8] sm:$0xff]  }
 0x1ee   : > { %6908 = vmatprep.subr.bf16.mxu0 %v9686_v1  ;;  %v2882_v58 = vrot.slane %v2880_v26, 3  ;;  %v2682_v26 = vsel %vm2671_vm8, %v2679_v12, %v2681_v16 }
 0x1ef   : > { %6949 = vmatpush3.bf16.msra.mxu1 %v7303_v59  ;;  %v2866_v59 = vsel %vm2831_vm9, %v2856_v61, %v8495_v44  ;;  %v7311_v61 = vld [vmem:[%s9668_s7 + $0xd0] sm:$0xff]   ;;  %v8535_v15 = vpop.f32.mrf.mxu1  ;;  %v8548_v38 = vsel %vm3058_vm10, %v8515_v55, %v8533_v47 }
 0x1f0   : > { %6950 = vmatprep.subr.bf16.mxu1 %v9686_v1 }
 0x1f1   : > { %6879 = vmatmul.mubr.bf16.gmra.mxu1 %v2857_v49  ;;  %6909 = vmatpush3.bf16.msra.mxu0 %v7298_v23  ;;  %v7308_v23 = vld [vmem:[%s9668_s7 + $0x88] sm:$0xff]   ;;  %v2600_v49 = vld [vmem:[%s8392_s30 + $0x30] sm:$0xf]  ;;  %v6792_v7 = vpop.f32.mrf.mxu1 }
 0x1f2   : > { %6882 = vmatprep.mubr.msk.bf16.mxu1 %vm7388_vm1, %v9686_v1  ;;  %6910 = vmatprep.subr.bf16.mxu0 %v9686_v1 }
 0x1f3   : > { %6951 = vmatpush3.bf16.msra.mxu1 %v7305_v46  ;;  %v2877_v46 = vshrl.u32 %v8499_v13, 16  ;;  %v8554_v5 = vpop.f32.mrf.mxu1 }
 0x1f4   : > { %6952 = vmatprep.subr.bf16.mxu1 %v9686_v1  ;;  %6839 = vmatmul.mubr.bf16.gmra.mxu0 %v2678_v29  ;;  %v2680_v29 = vsel %vm2671_vm8, %v2677_v39, %v2679_v12  ;;  %v7310_v39 = vld [vmem:[%s9668_s7 + $0x80] sm:$0xff]  }
 0x1f5   : > { %6842 = vmatprep.mubr.msk.bf16.mxu0 %vm7388_vm1, %v9686_v1  ;;  %6911 = vmatpush3.bf16.msra.mxu0 %v7300_v21  ;;  %v3037_v21 = vld [vmem:[%s8392_s30 + $0x34] sm:$0x3]  ;;  %v3083_v53 = vrot.slane %v2877_v46, 3  ;;  %v2879_v17 = vrot.slane %v2877_v46, 2  ;;  %v7314_v12 = vld [vmem:[%s9668_s7 + $0xc0] sm:$0xff]  }
 0x1f6   : > { %6912 = vmatprep.subr.bf16.mxu0 %v9686_v1  ;;  %v5839_v37 = vcombine.low %v2600_v49, %v3037_v21  ;;  %v3745_v21 = vshll.u32 %v8501_v63, 16 }
 0x1f7   : > { %6953 = vmatpush3.bf16.msra.mxu1 %v7307_v3  ;;  %v2874_v3 = vor.u32 %v2873_v41, %v2870_v20  ;;  %v6793_v20 = vpop.f32.mrf.mxu1  ;;  %v2883_v7 = vor.u32 %v2882_v58, %v2879_v17 }
 0x1f8   : > { %6954 = vmatprep.subr.bf16.mxu1 %v9686_v1  ;;  %v3088_v13 = vshrl.u32 %v5839_v37, 16  ;;  %v3747_v58 = vrot.slane %v3745_v21, 1 }
 0x1f9   : > { %6883 = vmatmul.mubr.bf16.gmra.mxu1 %v2866_v59  ;;  %6913 = vmatpush3.bf16.msra.mxu0 %v7304_v48  ;;  %v8559_v48 = vcombine.low %v2600_v49, %v2601_v28  ;;  %v3091_v59 = vshll.u32 %v5839_v37, 16  ;;  %v2875_v41 = vsel %vm2831_vm9, %v8495_v44, %v2874_v3  ;;  %v8578_v49 = vor.u32 %v3084_v30, %v3083_v53  ;;  %v8580_v46 = vpop.f32.mrf.mxu1 }
 0x1fa   : > { %6886 = vmatprep.mubr.msk.bf16.mxu1 %vm7388_vm1, %v9686_v1  ;;  %6914 = vmatprep.subr.bf16.mxu0 %v9686_v1 }
 0x1fb   : > { %6955 = vmatpush3.bf16.msra.mxu1 %v7309_v33  ;;  %v8569_v33 = vcombine.low %v8543_v22, %v8451_v8  ;;  %v3090_v8 = vrot.slane %v3088_v13, 3  ;;  %v3093_v28 = vrot.slane %v3091_v59, 4  ;;  %v6796_v37 = vpop.f32.mrf.mxu1 }
 0x1fc   : > { %6956 = vmatprep.subr.bf16.mxu1 %v9686_v1  ;;  %6843 = vmatmul.mubr.bf16.gmra.mxu0 %v2680_v29  ;;  %v2889_v29 = vshll.u32 %v8559_v48, 16 }
 0x1fd   : > { %6846 = vmatprep.mubr.msk.bf16.mxu0 %vm7388_vm1, %v9686_v1  ;;  %6915 = vmatpush3.bf16.msra.mxu0 %v7308_v23  ;;  %v8576_v23 = vld [vmem:[%s8392_s30 + $0x1c] sm:$0xf]  ;;  %v3740_v44 = vshll.u32 %v8569_v33, 16  ;;  %v8593_v53 = vor.u32 %v3093_v28, %v3090_v8  ;;  %v8608_v20 = vpop.f32.mrf.mxu1  ;;  %v2683_v8 = vrot.slane %v8559_v48, 3 }
 0x1fe   : > { %6916 = vmatprep.subr.bf16.mxu0 %v9686_v1  ;;  %v8597_v30 = vcombine.low %v8469_v2, %v8576_v23  ;;  %v2891_v37 = vrot.slane %v2889_v29, 3  ;;  %v3252_v29 = vld [vmem:[%s8392_s30 + $0x4] sm:$0x8] }
 0x1ff   : > { %6957 = vmatpush3.bf16.msra.mxu1 %v7311_v61  ;;  %v2886_v61 = vshrl.u32 %v8559_v48, 16  ;;  %v3742_v17 = vrot.slane %v3740_v44, 1  ;;  %v8605_v13 = vsel %vm3058_vm10, %v8578_v49, %v8593_v53  ;;  %v2884_v44 = vsel %vm2831_vm9, %v2874_v3, %v2883_v7 }
 0x200   : > { %6958 = vmatprep.subr.bf16.mxu1 %v9686_v1  ;;  %v3753_v59 = vshll.u32 %v8597_v30, 16  ;;  %v2684_v3 = vsel %vm2671_vm8, %v2681_v16, %v2683_v8 }
 0x201   : > { %6887 = vmatmul.mubr.bf16.gmra.mxu1 %v2875_v41  ;;  %6917 = vmatpush3.bf16.msra.mxu0 %v7310_v39  ;;  %v3738_v39 = vshrl.u32 %v8569_v33, 16  ;;  %v2888_v21 = vrot.slane %v2886_v61, 2 }
 0x202   : > { %6890 = vmatprep.mubr.msk.bf16.mxu1 %vm7388_vm1, %v9686_v1  ;;  %6990 = vmatprep.subr.bf16.mxu0 %v9686_v1  ;;  %v8613_v28 = vrot.slane %v3753_v59, 1 }
 0x203   : > { %6959 = vmatpush3.bf16.msra.mxu1 %v7312_v54  ;;  %v3749_v54 = vshrl.u32 %v8501_v63, 16  ;;  %v3743_v2 = vor.u32 %v3742_v17, %v3738_v39  ;;  %v2892_v61 = vor.u32 %v2891_v37, %v2888_v21  ;;  %v3067_v37 = vrot.slane %v2841_v36, 3 }
 0x204   : > { %6960 = vmatprep.subr.bf16.mxu1 %v9686_v1  ;;  %6847 = vmatmul.mubr.bf16.gmra.mxu0 %v2682_v26  ;;  %v6797_v26 = vpop.f32.mrf.mxu1 }
 0x205   : > { %6850 = vmatprep.mubr.msk.bf16.mxu0 %vm7388_vm1, %v9686_v1  ;;  %v3751_v41 = vor.u32 %v3749_v54, %v3747_v58  ;;  %v8618_v42 = vsel %vm954_vm3, %v3743_v2, %v3747_v58  ;;  %v3060_v58 = vshrl.u32 %v8400_v25, 16  ;;  %v3063_v54 = vshll.u32 %v8400_v25, 16 }
 0x206   : > { %v8624_v48 = vpop.f32.mrf.mxu1  ;;  %v2893_v2 = vsel %vm2831_vm9, %v2883_v7, %v2892_v61  ;;  %v3068_v25 = vrot.slane %v2844_v45, 4  ;;  %vm5289_vm9 = vcmask 1043456  }
 0x207   : > { %6961 = vmatpush3.bf16.msra.mxu1 %v7314_v12  ;;  %v8622_v39 = vsel %vm954_vm3, %v3751_v41, %v8613_v28  ;;  %v5864_v41 = vcombine.low %v3252_v29, %v8543_v22  ;;  %v3062_v16 = vrot.slane %v3060_v58, 3 }
 0x208   : > { %7034 = vmatprep.subr.bf16.mxu1 %v9686_v1  ;;  %v6800_v12 = vpop.f32.mrf.mxu1  ;;  %v3069_v58 = vor.u32 %v3068_v25, %v3067_v37 }
 0x209   : > { %6891 = vmatmul.mubr.bf16.gmra.mxu1 %v2884_v44  ;;  %v3065_v44 = vrot.slane %v3063_v54, 4  ;;  %v3319_v12 = vshrl.u32 %v5864_v41, 16 }
 0x20a   : > { %6894 = vmatprep.mubr.msk.bf16.mxu1 %vm7388_vm1, %v9686_v1  ;;  %v8630_v17 = vpop.f32.mrf.mxu1 }
 0x20b   : > { %v3066_v29 = vor.u32 %v3065_v44, %v3062_v16  ;;  %v3321_v54 = vrot.slane %v3319_v12, 3  ;;  %v3072_v16 = vrot.slane %v2853_v57, 4 }
 0x20c   : > { %6851 = vmatmul.mubr.bf16.gmra.mxu0 %v2684_v3  ;;  %v6801_v59 = vpop.f32.mrf.mxu1  ;;  %v3322_v3 = vshll.u32 %v5864_v41, 16  ;;  %v3071_v41 = vrot.slane %v2850_v19, 3 }
 0x20d   : > { %6854 = vmatprep.mubr.msk.bf16.mxu0 %vm7388_vm1, %v9686_v1  ;;  %v3070_v45 = vsel %vm3058_vm10, %v3066_v29, %v3069_v58 }
 0x20e   : > { %v8638_v26 = vpop.f32.mrf.mxu1  ;;  %v3324_v59 = vrot.slane %v3322_v3, 4  ;;  %v3073_v37 = vor.u32 %v3072_v16, %v3071_v41  ;;  %v7320_v3 = vld [vmem:[%s9668_s7 + $0x128] sm:$0xff]  }
 0x210   : > { %v6804_v21 = vpop.f32.mrf.mxu1  ;;  %v3074_v29 = vsel %vm3058_vm10, %v3069_v58, %v3073_v37  ;;  %v7322_v58 = vld [vmem:[%s9668_s7 + $0x120] sm:$0xff]  }
 0x211   : > { %6895 = vmatmul.mubr.bf16.gmra.mxu1 %v2893_v2  ;;  %v7317_v21 = vld [vmem:[%s9668_s7 + $0x130] sm:$0xff]  }
 0x212   : > { %6898 = vmatprep.mubr.msk.bf16.mxu1 %vm7388_vm1, %v9686_v1  ;;  %v8646_v7 = vpop.f32.mrf.mxu1 }
 0x213   : > { %9699 = vst [vmem:[#allocation7_spill] sm:$0xff] %v8646_v7 }
 0x214   : > { %6855 = vmatmul.mubr.bf16.gmra.mxu0 %v2683_v8  ;;  %v6805_v22 = vpop.f32.mrf.mxu1  ;;  %v3325_v8 = vor.u32 %v3324_v59, %v3321_v54  ;;  %v3076_v54 = vrot.slane %v2862_v40, 4 }
 0x215   : > { %6918 = vmatprep.mubr.msk.bf16.mxu0 %vm7388_vm1, %v9686_v1 }
 0x216   : > { %v8650_v2 = vpop.f32.mrf.mxu1  ;;  %v3334_v57 = vsel %vm3058_vm10, %v3325_v8, %v8515_v55  ;;  %v3075_v55 = vrot.slane %v2859_v18, 3 }
 0x217   : > { %9700 = vst [vmem:[#allocation8_spill] sm:$0xff] %v8650_v2 }
 0x218   : > { %v6808_v36 = vpop.f32.mrf.mxu1  ;;  %v3077_v8 = vor.u32 %v3076_v54, %v3075_v55 }
 0x219   : > { %6899 = vmatmul.mubr.bf16.gmra.mxu1 %v2892_v61  ;;  %v8663_v61 = vld [vmem:[%s8392_s30 + $0x20] sm:$0xf]  ;;  %v8698_v36 = vld [vmem:[%s8392_s30 + $0x24] sm:$0xf] }
 0x21a   : > { %6962 = vmatprep.mubr.msk.bf16.mxu1 %vm7388_vm1, %v9686_v1  ;;  %v8665_v44 = vpop.f32.mrf.mxu1  ;;  %v5867_v25 = vcombine.low %v8576_v23, %v8663_v61  ;;  %v7326_v23 = vld [vmem:[%s9668_s7 + $0x170] sm:$0xff]  }
 0x21b   : > { %9701 = vst [vmem:[#allocation9_spill] sm:$0xff] %v8665_v44 }
 0x21c   : > { %6919 = vmatmul.mubr.bf16.vlgmr.msra.gmra.mxu0 %v3070_v45  ;;  %v6809_v19 = vpop.f32.mrf.mxu1  ;;  %v3345_v59 = vshrl.u32 %v5867_v25, 16  ;;  %v8701_v45 = vld [vmem:[%s8392_s30 + $0x28] sm:$0xf] }
 0x21d   : > { %6991 = vmatpush3.bf16.msra.mxu0 %v7313_v4  ;;  %6922 = vmatprep.mubr.msk.bf16.mxu0 %vm7388_vm1, %v9686_v1  ;;  %v3348_v4 = vshll.u32 %v5867_v25, 16  ;;  %v3079_v19 = vrot.slane %v2868_v43, 3  ;;  %v8735_v43 = vld [vmem:[%s8392_s30 + $0x30] sm:$0xf] }
 0x21e   : > { %6992 = vmatprep.subr.bf16.mxu0 %v9686_v1  ;;  %v8680_v12 = vpop.f32.mrf.mxu1  ;;  %v3347_v41 = vrot.slane %v3345_v59, 3 }
 0x21f   : > { %9702 = vst [vmem:[#allocation10_spill] sm:$0xff] %v8680_v12  ;;  %v3350_v16 = vrot.slane %v3348_v4, 4 }
 0x220   : > { %v6812_v22 = vpop.f32.mrf.mxu1 }
 0x221   : > { %6963 = vmatmul.mubr.bf16.vlgmr.msra.gmra.mxu1 %v3334_v57  ;;  %6993 = vmatpush3.bf16.msra.mxu0 %v7317_v21  ;;  %v5868_v21 = vcombine.low %v8698_v36, %v8701_v45  ;;  %v9703_v57 = vshll.u32 %v8465_v24, 16  ;;  %v3351_v55 = vor.u32 %v3350_v16, %v3347_v41  ;;  %v7327_v24 = vld [vmem:[%s9668_s7 + $0x110] sm:$0xff]  }
 0x222   : > { %6966 = vmatprep.mubr.msk.bf16.mxu1 %vm7388_vm1, %v9686_v1  ;;  %6994 = vmatprep.subr.bf16.mxu0 %v9686_v1  ;;  %v2313_v18 = vpop.f32.mrf.mxu1 }
 0x223   : > { %7035 = vmatpush3.bf16.msra.mxu1 %v7325_v14  ;;  %v7324_v14 = vld [vmem:[%s9668_s7 + $0x118] sm:$0xff]   ;;  %v3080_v25 = vrot.slane %v9703_v57, 4  ;;  %v3357_v22 = vshll.u32 %v5868_v21, 16  ;;  %v3352_v59 = vsel %vm3058_vm10, %v8533_v47, %v3351_v55  ;;  %v7336_v47 = vld [vmem:[%s9668_s7 + $0x150] sm:$0xff]   ;;  %v7335_v57 = vld [vmem:[%s9668_s7 + $0x100] sm:$0xff]  }
 0x224   : > { %7036 = vmatprep.subr.bf16.mxu1 %v9686_v1  ;;  %6923 = vmatmul.mubr.bf16.gmra.mxu0 %v3074_v29  ;;  %v6813_v40 = vpop.f32.mrf.mxu1  ;;  %v8732_v29 = vld [vmem:[%s8392_s30 + $0x2c] sm:$0xf] }
 0x225   : > { %6995 = vmatpush3.bf16.msra.mxu0 %v7320_v3  ;;  %6926 = vmatprep.mubr.msk.bf16.mxu0 %vm7388_vm1, %v9686_v1  ;;  %v3078_v3 = vsel %vm3058_vm10, %v3073_v37, %v3077_v8  ;;  %v3081_v54 = vor.u32 %v3080_v25, %v3079_v19  ;;  %v7334_v37 = vld [vmem:[%s9668_s7 + $0x158] sm:$0xff]   ;;  %v3359_v18 = vrot.slane %v3357_v22, 4  ;;  %v7340_v22 = vld [vmem:[%s9668_s7 + $0x140] sm:$0xff]  }
 0x226   : > { %6996 = vmatprep.subr.bf16.mxu0 %v9686_v1  ;;  %v8766_v19 = vld [vmem:[%s8392_s30 + $0x38] sm:$0x3] }
 0x227   : > { %7037 = vmatpush3.bf16.msra.mxu1 %v7326_v23  ;;  %v3354_v23 = vshrl.u32 %v5868_v21, 16  ;;  %v3082_v40 = vsel %vm3058_vm10, %v3077_v8, %v3081_v54  ;;  %v7337_v8 = vld [vmem:[%s9668_s7 + $0x148] sm:$0xff]  }
 0x228   : > { %7038 = vmatprep.subr.bf16.mxu1 %v9686_v1 }
 0x229   : > { %6967 = vmatmul.mubr.bf16.gmra.mxu1 %v8548_v38  ;;  %6997 = vmatpush3.bf16.msra.mxu0 %v7322_v58  ;;  %v7331_v38 = vld [vmem:[%s9668_s7 + $0x160] sm:$0xff]   ;;  %v3356_v4 = vrot.slane %v3354_v23, 3  ;;  %v5869_v58 = vcombine.low %v8732_v29, %v8735_v43 }
 0x22a   : > { %6970 = vmatprep.mubr.msk.bf16.mxu1 %vm7388_vm1, %v9686_v1  ;;  %6998 = vmatprep.subr.bf16.mxu0 %v9686_v1 }
 0x22b   : > { %7039 = vmatpush3.bf16.msra.mxu1 %v7329_v10  ;;  %v7332_v10 = vld [vmem:[%s9668_s7 + $0x108] sm:$0xff]   ;;  %v3360_v41 = vor.u32 %v3359_v18, %v3356_v4  ;;  %v3363_v16 = vshrl.u32 %v5869_v58, 16  ;;  %v3366_v21 = vshll.u32 %v5869_v58, 16 }
 0x22c   : > { %7040 = vmatprep.subr.bf16.mxu1 %v9686_v1  ;;  %6927 = vmatmul.mubr.bf16.gmra.mxu0 %v3078_v3 }
 0x22d   : > { %6930 = vmatprep.mubr.msk.bf16.mxu0 %vm7388_vm1, %v9686_v1  ;;  %6999 = vmatpush3.bf16.msra.mxu0 %v7324_v14  ;;  %v8763_v14 = vld [vmem:[%s8392_s30 + $0x34] sm:$0xf]  ;;  %v3361_v25 = vsel %vm3058_vm10, %v3351_v55, %v3360_v41  ;;  %v3368_v3 = vrot.slane %v3366_v21, 4  ;;  %v3086_v55 = vsel %vm3058_vm10, %v3081_v54, %v8578_v49 }
 0x22e   : > { %7000 = vmatprep.subr.bf16.mxu0 %v9686_v1  ;;  %v5870_v23 = vcombine.low %v8763_v14, %v8766_v19 }
 0x22f   : > { %7041 = vmatpush3.bf16.msra.mxu1 %v7331_v38  ;;  %v3365_v38 = vrot.slane %v3363_v16, 3 }
 0x230   : > { %7042 = vmatprep.subr.bf16.mxu1 %v9686_v1 }
 0x231   : > { %6971 = vmatmul.mubr.bf16.gmra.mxu1 %v3352_v59  ;;  %7001 = vmatpush3.bf16.msra.mxu0 %v7327_v24  ;;  %v3369_v24 = vor.u32 %v3368_v3, %v3365_v38  ;;  %v3375_v59 = vshll.u32 %v5870_v23, 16 }
 0x232   : > { %6974 = vmatprep.mubr.msk.bf16.mxu1 %vm7388_vm1, %v9686_v1  ;;  %7002 = vmatprep.subr.bf16.mxu0 %v9686_v1 }
 0x233   : > { %7043 = vmatpush3.bf16.msra.mxu1 %v7334_v37  ;;  %v3372_v37 = vshrl.u32 %v5870_v23, 16  ;;  %v3370_v4 = vsel %vm3058_vm10, %v3360_v41, %v3369_v24  ;;  %v3377_v58 = vrot.slane %v3375_v59, 4  ;;  %v8840_v41 = vld [vmem:[%s7502_s29] sm:$0xff]  }
 0x234   : > { %7044 = vmatprep.subr.bf16.mxu1 %v9686_v1  ;;  %6931 = vmatmul.mubr.bf16.gmra.mxu0 %v3082_v40  ;;  %v7345_v40 = vld [vmem:[%s9668_s7 + $0x1a0] sm:$0xff]   ;;  %v6151_v16 = vunpack.c.l.bf16 %v8840_v41 }
 0x235   : > { %6934 = vmatprep.mubr.msk.bf16.mxu0 %vm7388_vm1, %v9686_v1  ;;  %7003 = vmatpush3.bf16.msra.mxu0 %v7332_v10  ;;  %v3374_v18 = vrot.slane %v3372_v37, 3  ;;  %v7339_v10 = vld [vmem:[%s9668_s7 + $0x1b8] sm:$0xff]   ;;  %v8875_v37 = vld [vmem:[%s7502_s29 + $0x10] sm:$0xff]  }
 0x236   : > { %7004 = vmatprep.subr.bf16.mxu0 %v9686_v1  ;;  %v6160_v59 = vunpack.c.h.bf16 %v8875_v37 }
 0x237   : > { %7045 = vmatpush3.bf16.msra.mxu1 %v7336_v47  ;;  %v3378_v49 = vor.u32 %v3377_v58, %v3374_v18  ;;  %v7349_v47 = vld [vmem:[%s9668_s7 + $0x1f0] sm:$0xff]   ;;  %v7354_v58 = vld [vmem:[%s9668_s7 + $0x188] sm:$0xff]  }
 0x238   : > { %7046 = vmatprep.subr.bf16.mxu1 %v9686_v1 }
 0x239   : > { %6975 = vmatmul.mubr.bf16.gmra.mxu1 %v3361_v25  ;;  %7005 = vmatpush3.bf16.msra.mxu0 %v7335_v57  ;;  %v3379_v54 = vsel %vm3058_vm10, %v3369_v24, %v3378_v49  ;;  %v7347_v57 = vld [vmem:[%s9668_s7 + $0x198] sm:$0xff]   ;;  %v7350_v24 = vld [vmem:[%s9668_s7 + $0x190] sm:$0xff]  }
 0x23a   : > { %6978 = vmatprep.mubr.msk.bf16.mxu1 %vm7388_vm1, %v9686_v1  ;;  %7078 = vmatprep.subr.bf16.mxu0 %v9686_v1 }
 0x23b   : > { %7047 = vmatpush3.bf16.msra.mxu1 %v7337_v8  ;;  %v8856_v8 = vld [vmem:[%s7502_s29 + $0x8] sm:$0xff]  }
 0x23c   : > { %7048 = vmatprep.subr.bf16.mxu1 %v9686_v1  ;;  %6935 = vmatmul.mubr.bf16.gmra.mxu0 %v3086_v55  ;;  %v6156_v38 = vunpack.c.h.bf16 %v8856_v8  ;;  %v5899_v55 = vcombine.low %v8701_v45, %v8732_v29  ;;  %v4862_v29 = vand.u32 2147483647, %v6160_v59 }
 0x23d   : > { %6938 = vmatprep.mubr.msk.bf16.mxu0 %vm7388_vm1, %v9686_v1 }
 0x23e   : > { %v4860_v23 = vand.u32 2147483647, %v6156_v38  ;;  %v3769_v18 = vshll.u32 %v5899_v55, 16  ;;  %v7364_v38 = vld [vmem:[%s9668_s7 + $0x1c0] sm:$0xff]  }
 0x23f   : > { %7049 = vmatpush3.bf16.msra.mxu1 %v7340_v22 }
 0x240   : > { %7122 = vmatprep.subr.bf16.mxu1 %v9686_v1 }
 0x241   : > { %6979 = vmatmul.mubr.bf16.gmra.mxu1 %v3370_v4 }
 0x242   : > { %6982 = vmatprep.mubr.msk.bf16.mxu1 %vm7388_vm1, %v9686_v1 }
 0x244   : > { %6939 = vmatmul.mubr.bf16.gmra.mxu0 %v8605_v13  ;;  %v7348_v13 = vld [vmem:[%s9668_s7 + $0x1f8] sm:$0xff]  }
 0x245   : > { %6942 = vmatprep.mubr.msk.bf16.mxu0 %vm7388_vm1, %v9686_v1 }
 0x249   : > { %6983 = vmatmul.mubr.bf16.gmra.mxu1 %v3379_v54  ;;  %v7359_v54 = vld [vmem:[%s9668_s7 + $0x1d0] sm:$0xff]  }
 0x24a   : > { %6986 = vmatprep.mubr.msk.bf16.mxu1 %vm7388_vm1, %v9686_v1 }
 0x24c   : > { %6943 = vmatmul.mubr.bf16.gmra.mxu0 %v8593_v53  ;;  %v7341_v53 = vld [vmem:[%s9668_s7 + $0x1b0] sm:$0xff]  }
 0x24d   : > { %7006 = vmatprep.mubr.msk.bf16.mxu0 %vm7388_vm1, %v9686_v1 }
 0x251   : > { %6987 = vmatmul.mubr.bf16.gmra.mxu1 %v3378_v49  ;;  %v8891_v49 = vld [vmem:[%s7502_s29 + $0x18] sm:$0xff]  }
 0x252   : > { %7050 = vmatprep.mubr.msk.bf16.mxu1 %vm7388_vm1, %v9686_v1 }
 0x254   : > { %7007 = vmatmul.mubr.bf16.vlgmr.msra.gmra.mxu0 %v8569_v33  ;;  %v7343_v33 = vld [vmem:[%s9668_s7 + $0x1a8] sm:$0xff]  }
 0x255   : > { %7079 = vmatpush3.bf16.msra.mxu0 %v7339_v10  ;;  %7010 = vmatprep.mubr.msk.bf16.mxu0 %vm7388_vm1, %v9686_v1  ;;  %v4886_v10 = vsel %vm689_vm2, %v4862_v29, 0.0  ;;  %v8939_v29 = vld [vmem:[%s7502_s29 + $0x38] sm:$0xff]  }
 0x256   : > { %7080 = vmatprep.subr.bf16.mxu0 %v9686_v1 }
 0x259   : > { %7051 = vmatmul.mubr.bf16.vlgmr.msra.gmra.mxu1 %v8618_v42  ;;  %7081 = vmatpush3.bf16.msra.mxu0 %v7341_v53  ;;  %v5898_v42 = vcombine.low %v8663_v61, %v8698_v36  ;;  %v4857_v61 = vand.u32 2147483647, %v6151_v16  ;;  %v3757_v36 = vshrl.u32 %v8597_v30, 16  ;;  %v6164_v53 = vunpack.c.h.bf16 %v8891_v49  ;;  %v8908_v16 = vld [vmem:[%s7502_s29 + $0x20] sm:$0xff]  }
 0x25a   : > { %7054 = vmatprep.mubr.msk.bf16.mxu1 %vm7388_vm1, %v9686_v1  ;;  %7082 = vmatprep.subr.bf16.mxu0 %v9686_v1 }
 0x25b   : > { %7123 = vmatpush3.bf16.msra.mxu1 %v7348_v13  ;;  %v3761_v21 = vshll.u32 %v5898_v42, 16  ;;  %v4871_v25 = vsel %vm689_vm2, %v4857_v61, 0.0  ;;  %v3759_v3 = vor.u32 %v3757_v36, %v8613_v28  ;;  %v4880_v28 = vsel %vm689_vm2, %v4860_v23, 0.0 }
 0x25c   : > { %7124 = vmatprep.subr.bf16.mxu1 %v9686_v1  ;;  %7011 = vmatmul.mubr.bf16.gmra.mxu0 %v8501_v63  ;;  %v7352_v63 = vld [vmem:[%s9668_s7 + $0x1e8] sm:$0xff]   ;;  %v3765_v4 = vshrl.u32 %v5898_v42, 16  ;;  %v6168_v36 = vunpack.c.h.bf16 %v8908_v16 }
 0x25d   : > { %7083 = vmatpush3.bf16.msra.mxu0 %v7343_v33  ;;  %7014 = vmatprep.mubr.msk.bf16.mxu0 %vm7388_vm1, %v9686_v1  ;;  %v3763_v22 = vrot.slane %v3761_v21, 1  ;;  %v4864_v33 = vand.u32 2147483647, %v6164_v53  ;;  %v3773_v21 = vshrl.u32 %v5899_v55, 16 }
 0x25e   : > { %7084 = vmatprep.subr.bf16.mxu0 %v9686_v1  ;;  %4872 = vadd.xlane.f32.xlu1 %v4871_v25  ;;  %v8922_v25 = vld [vmem:[%s7502_s29 + $0x28] sm:$0xff]  }
 0x25f   : > { %7125 = vmatpush3.bf16.msra.mxu1 %v7349_v47  ;;  %v3764_v45 = vsel %vm954_vm3, %v3759_v3, %v3763_v22  ;;  %v3767_v13 = vor.u32 %v3765_v4, %v3763_v22  ;;  %v3771_v47 = vrot.slane %v3769_v18, 1  ;;  %v4892_v61 = vsel %vm689_vm2, %v4864_v33, 0.0 }
 0x260   : > { %7126 = vmatprep.subr.bf16.mxu1 %v9686_v1  ;;  %v6172_v23 = vunpack.c.h.bf16 %v8922_v25  ;;  %v6180_v4 = vunpack.c.h.bf16 %v8939_v29 }
 0x261   : > { %7055 = vmatmul.mubr.bf16.gmra.mxu1 %v8622_v39  ;;  %7085 = vmatpush3.bf16.msra.mxu0 %v7345_v40  ;;  %v7353_v39 = vld [vmem:[%s9668_s7 + $0x1e0] sm:$0xff]   ;;  %v5900_v40 = vcombine.low %v8735_v43, %v8763_v14  ;;  %v3772_v43 = vsel %vm954_vm3, %v3767_v13, %v3771_v47  ;;  %v4866_v14 = vand.u32 2147483647, %v6168_v36  ;;  %v3775_v22 = vor.u32 %v3773_v21, %v3771_v47 }
 0x262   : > { %7058 = vmatprep.mubr.msk.bf16.mxu1 %vm7388_vm1, %v9686_v1  ;;  %7086 = vmatprep.subr.bf16.mxu0 %v9686_v1  ;;  %v4965_v53 = vand.u32 2147483647, %v6180_v4  ;;  %v6159_v47 = vunpack.c.l.bf16 %v8875_v37 }
 0x263   : > { %7127 = vmatpush3.bf16.msra.mxu1 %v7352_v63  ;;  %4881 = vadd.xlane.f32.xlu1 %v4880_v28  ;;  %v7358_v63 = vld [vmem:[%s9668_s7 + $0x180] sm:$0xff]   ;;  %v4898_v3 = vsel %vm689_vm2, %v4866_v14, 0.0  ;;  %v8934_v28 = vld [vmem:[%s8392_s30 + $0x38] ss:$0 sps:$4 sm:$0x77]  }
 0x264   : > { %7128 = vmatprep.subr.bf16.mxu1 %v9686_v1  ;;  %7015 = vmatmul.mubr.bf16.gmra.mxu0 %v8597_v30  ;;  %v7356_v30 = vld [vmem:[%s9668_s7 + $0x1d8] sm:$0xff]   ;;  %v3785_v13 = vshll.u32 %v8934_v28, 16  ;;  %v4861_v14 = vand.u32 2147483647, %v6159_v47  ;;  %v6171_v47 = vunpack.c.l.bf16 %v8922_v25 }
 0x265   : > { %7018 = vmatprep.mubr.msk.bf16.mxu0 %vm7388_vm1, %v9686_v1  ;;  %7087 = vmatpush3.bf16.msra.mxu0 %v7347_v57  ;;  %v3777_v57 = vshll.u32 %v5900_v40, 16  ;;  %v7363_v25 = vld [vmem:[%s9668_s7 + $0x238] sm:$0xff]  }
 0x266   : > { %7088 = vmatprep.subr.bf16.mxu0 %v9686_v1  ;;  %v4883_v37 = vsel %vm689_vm2, %v4861_v14, 0.0 }
 0x267   : > { %7129 = vmatpush3.bf16.msra.mxu1 %v7353_v39  ;;  %4887 = vadd.xlane.f32.xlu1 %v4886_v10  ;;  %v6152_v39 = vunpack.c.h.bf16 %v8840_v41  ;;  %v4868_v41 = vand.u32 2147483647, %v6172_v23  ;;  %v3949_v10 = vld [vmem:[%s8392_s30 + $0x10] sm:$0xf] }
 0x268   : > { %7130 = vmatprep.subr.bf16.mxu1 %v9686_v1 }
 0x269   : > { %7059 = vmatmul.mubr.bf16.gmra.mxu1 %v3764_v45  ;;  %7089 = vmatpush3.bf16.msra.mxu0 %v7350_v24  ;;  %v4858_v24 = vand.u32 2147483647, %v6152_v39  ;;  %v6155_v45 = vunpack.c.l.bf16 %v8856_v8  ;;  %v3781_v8 = vshrl.u32 %v5900_v40, 16  ;;  %v6163_v39 = vunpack.c.l.bf16 %v8891_v49 }
 0x26a   : > { %7062 = vmatprep.mubr.msk.bf16.mxu1 %vm7388_vm1, %v9686_v1  ;;  %7090 = vmatprep.subr.bf16.mxu0 %v9686_v1 }
 0x26b   : > { %7131 = vmatpush3.bf16.msra.mxu1 %v7356_v30  ;;  %4893 = vadd.xlane.f32.xlu1 %v4892_v61  ;;  %v3779_v30 = vrot.slane %v3777_v57, 1  ;;  %v4874_v59 = vsel %vm689_vm2, %v4858_v24, 0.0  ;;  %v3787_v57 = vrot.slane %v3785_v13, 1  ;;  %v4863_v24 = vand.u32 2147483647, %v6163_v39 }
 0x26c   : > { %7132 = vmatprep.subr.bf16.mxu1 %v9686_v1  ;;  %7019 = vmatmul.mubr.bf16.gmra.mxu0 %v5898_v42  ;;  %v7360_v42 = vld [vmem:[%s9668_s7 + $0x1c8] sm:$0xff]  }
 0x26d   : > { %7022 = vmatprep.mubr.msk.bf16.mxu0 %vm7388_vm1, %v9686_v1  ;;  %7091 = vmatpush3.bf16.msra.mxu0 %v7354_v58  ;;  %v3780_v18 = vsel %vm954_vm3, %v3775_v22, %v3779_v30  ;;  %v4859_v58 = vand.u32 2147483647, %v6155_v45  ;;  %v3783_v36 = vor.u32 %v3781_v8, %v3779_v30  ;;  %v8969_v30 = vld [vmem:[%s8392_s30 + $0x14] sm:$0xff]   ;;  %v4889_v49 = vsel %vm689_vm2, %v4863_v24, 0.0  ;;  %v8974_v45 = vld [vmem:[%s7502_s29 + $0xa8] sm:$0xff]  }
 0x26e   : > { %7092 = vmatprep.subr.bf16.mxu0 %v9686_v1  ;;  %4875 = vadd.xlane.f32.xlu0 %v4874_v59  ;;  %v6167_v59 = vunpack.c.l.bf16 %v8908_v16  ;;  %v4222_v8 = vld [vmem:[%s8392_s30 + $0xc] sm:$0xe] }
 0x26f   : > { %7133 = vmatpush3.bf16.msra.mxu1 %v7359_v54  ;;  %4899 = vadd.xlane.f32.xlu1 %v4898_v3  ;;  %v3948_v54 = vld [vmem:[%s8392_s30 + $0xc] sm:$0xf]  ;;  %v4877_v33 = vsel %vm689_vm2, %v4859_v58, 0.0 }
 0x270   : > { %7134 = vmatprep.subr.bf16.mxu1 %v9686_v1 }
 0x271   : > { %7063 = vmatmul.mubr.bf16.gmra.mxu1 %v3772_v43  ;;  %7093 = vmatpush3.bf16.msra.mxu0 %v7358_v63  ;;  %v8952_v63 = vld [vmem:[%s7502_s29 + $0x70] sm:$0xff]   ;;  %v5951_v43 = vcombine.low %v3948_v54, %v3949_v10  ;;  %v4865_v54 = vand.u32 2147483647, %v6167_v59 }
 0x272   : > { %7066 = vmatprep.mubr.msk.bf16.mxu1 %vm7388_vm1, %v9686_v1  ;;  %7166 = vmatprep.subr.bf16.mxu0 %v9686_v1  ;;  %v6207_v61 = vunpack.c.l.bf16 %v8952_v63 }
 0x273   : > { %7135 = vmatpush3.bf16.msra.mxu1 %v7360_v42  ;;  %4878 = vadd.xlane.f32.xlu0 %v4877_v33  ;;  %v4981_v42 = vsel %vm689_vm2, %v4965_v53, 0.0  ;;  %v4014_v22 = vshll.u32 %v5951_v43, 16  ;;  %v3789_v53 = vshrl.u32 %v8934_v28, 16  ;;  %v4012_v16 = vshrl.u32 %v5951_v43, 16 }
 0x274   : > { %7136 = vmatprep.subr.bf16.mxu1 %v9686_v1  ;;  %7023 = vmatmul.mubr.bf16.gmra.mxu0 %v5899_v55  ;;  %v4904_v55 = vsel %vm689_vm2, %v4868_v41, 0.0  ;;  %v5069_v21 = vand.u32 2147483647, %v6207_v61  ;;  %v4895_v33 = vsel %vm689_vm2, %v4865_v54, 0.0  ;;  %v4867_v43 = vand.u32 2147483647, %v6171_v47 }
 0x275   : > { %7026 = vmatprep.mubr.msk.bf16.mxu0 %vm7388_vm1, %v9686_v1  ;;  %4905 = vadd.xlane.f32.xlu1 %v4904_v55  ;;  %v5901_v55 = vcombine.low %v8766_v19, %v8766_v19  ;;  %v4016_v58 = vrot.slane %v4014_v22, 1  ;;  %v4019_v19 = vshll.u32 %v8969_v30, 16  ;;  %v3791_v61 = vor.u32 %v3789_v53, %v3787_v57  ;;  %v9024_v53 = vld [vmem:[%s7502_s29 + $0x80] sm:$0xff]  }
 0x276   : > { %v5083_v3 = vsel %vm689_vm2, %v5069_v21, 0.0  ;;  %v8992_v21 = vcombine.low %v4222_v8, %v3949_v10  ;;  %v6179_v10 = vunpack.c.l.bf16 %v8939_v29  ;;  %v7366_v29 = vld [vmem:[%s9668_s7 + $0x230] sm:$0xff]  }
 0x277   : > { %7137 = vmatpush3.bf16.msra.mxu1 %v7364_v38  ;;  %v8961_v38 = vld [vmem:[%s7502_s29 + $0x40] sm:$0xff]   ;;  %4884 = vadd.xlane.f32.xlu0 %v4883_v37  ;;  %v4017_v14 = vor.u32 %v4016_v58, %v4012_v16  ;;  %v4021_v39 = vrot.slane %v4019_v19, 1 }
 0x278   : > { %v6184_v23 = vunpack.c.h.bf16 %v8961_v38  ;;  %v4964_v59 = vand.u32 2147483647, %v6179_v10  ;;  %v6183_v54 = vunpack.c.l.bf16 %v8961_v38 }
 0x279   : > { %7067 = vmatmul.mubr.bf16.gmra.mxu1 %v3780_v18  ;;  %4982 = vadd.xlane.f32.xlu1 %v4981_v42  ;;  %v6235_v18 = vunpack.c.l.bf16 %v8974_v45  ;;  %v8988_v42 = vld [vmem:[%s7502_s29 + $0x48] sm:$0xff]   ;;  %v4022_v24 = vsel %vm954_vm3, %v4017_v14, %v4021_v39 }
 0x27a   : > { %7070 = vmatprep.mubr.msk.bf16.mxu1 %vm7388_vm1, %v9686_v1  ;;  %v4967_v41 = vand.u32 2147483647, %v6184_v23  ;;  %v9007_v23 = vld [vmem:[%s7502_s29 + $0xb0] sm:$0xff]   ;;  %v4978_v58 = vsel %vm689_vm2, %v4964_v59, 0.0  ;;  %v4966_v47 = vand.u32 2147483647, %v6183_v54 }
 0x27b   : > { %4890 = vadd.xlane.f32.xlu0 %v4889_v49  ;;  %v5174_v13 = vand.u32 2147483647, %v6235_v18  ;;  %v6239_v22 = vunpack.c.l.bf16 %v9007_v23  ;;  %v4244_v49 = vrot.slane %v8969_v30, 1 }
 0x27c   : > { %7027 = vmatmul.mubr.bf16.gmra.mxu0 %v5900_v40  ;;  %v3788_v40 = vsel %vm954_vm3, %v3783_v36, %v3787_v57  ;;  %v4987_v4 = vsel %vm689_vm2, %v4967_v41, 0.0  ;;  %v6187_v36 = vunpack.c.l.bf16 %v8988_v42  ;;  %v9002_v57 = vld [vmem:[%s8392_s30 + $0x1c] sm:$0xff]   ;;  %v4243_v41 = vrot.slane %v8992_v21, 1 }
 0x27d   : > { %7030 = vmatprep.mubr.msk.bf16.mxu0 %vm7388_vm1, %v9686_v1  ;;  %5084 = vadd.xlane.f32.xlu1 %v5083_v3  ;;  %v5188_v28 = vsel %vm689_vm2, %v5174_v13, 0.0  ;;  %v4901_v3 = vsel %vm689_vm2, %v4867_v43, 0.0  ;;  %v9684_v18 = vshll.u32 %v9002_v57, 16  ;;  %v6215_v13 = vunpack.c.l.bf16 %v9024_v53 }
 0x27e   : > { %v4968_v37 = vand.u32 2147483647, %v6187_v36  ;;  %v4245_v16 = vsel %vm1705_vm4, %v4243_v41, %v4244_v49  ;;  %v9040_v36 = vld [vmem:[%s8392_s30 + $0x24] sm:$0xff]   ;;  %v4984_v14 = vsel %vm689_vm2, %v4966_v47, 0.0  ;;  %v6208_v43 = vunpack.c.h.bf16 %v8952_v63 }
 0x27f   : > { %4896 = vadd.xlane.f32.xlu0 %v4895_v33  ;;  %v5073_v38 = vand.u32 2147483647, %v6215_v13  ;;  %v4246_v10 = vrot.slane %v9002_v57, 1  ;;  %v9685_v63 = vshrl.u32 %v9002_v57, 16  ;;  %v7370_v41 = vld [vmem:[%s9668_s7 + $0x220] sm:$0xff]  }
 0x281   : > { %7071 = vmatmul.mubr.bf16.gmra.mxu1 %v3788_v40  ;;  %4988 = vadd.xlane.f32.xlu1 %v4987_v4  ;;  %v4990_v40 = vsel %vm689_vm2, %v4968_v37, 0.0  ;;  %v4023_v4 = vshrl.u32 %v8969_v30, 16  ;;  %v6281_v37 = vld [vmem:[%s7502_s29 + $0x50] sm:$0xff]   ;;  %v4247_v13 = vsel %vm1705_vm4, %v4244_v49, %v4246_v10  ;;  %v7372_v49 = vld [vmem:[%s9668_s7 + $0x218] sm:$0xff]  }
 0x282   : > { %7074 = vmatprep.mubr.msk.bf16.mxu1 %vm7388_vm1, %v9686_v1 }
 0x283   : > { %4902 = vadd.xlane.f32.xlu0 %v4901_v3  ;;  %v4025_v33 = vor.u32 %v4023_v4, %v4021_v39  ;;  %v5095_v39 = vsel %vm689_vm2, %v5073_v38, 0.0 }
 0x284   : > { %7031 = vmatmul.mubr.bf16.gmra.mxu0 %v5901_v55  ;;  %v5176_v55 = vand.u32 2147483647, %v6239_v22 }
 0x285   : > { %7094 = vmatprep.mubr.msk.bf16.mxu0 %vm7388_vm1, %v9686_v1  ;;  %5189 = vadd.xlane.f32.xlu1 %v5188_v28  ;;  %v7368_v28 = vld [vmem:[%s9668_s7 + $0x228] sm:$0xff]  }
 0x286   : > { %v5194_v8 = vsel %vm689_vm2, %v5176_v55, 0.0  ;;  %v6286_v55 = vld [vmem:[%s7502_s29 + $0x78] sm:$0xff]  }
 0x287   : > { %4979 = vadd.xlane.f32.xlu0 %v4978_v58  ;;  %v6211_v54 = vunpack.c.l.bf16 %v6286_v55 }
 0x289   : > { %7075 = vmatmul.mubr.bf16.gmra.mxu1 %v3791_v61  ;;  %4991 = vadd.xlane.f32.xlu1 %v4990_v40  ;;  %v4029_v61 = vrot.slane %v9684_v18, 1  ;;  %v5070_v40 = vand.u32 2147483647, %v6208_v43  ;;  %v5071_v47 = vand.u32 2147483647, %v6211_v54  ;;  %v6212_v54 = vunpack.c.h.bf16 %v6286_v55 }
 0x28a   : > { %7138 = vmatprep.mubr.msk.bf16.mxu1 %vm7388_vm1, %v9686_v1 }
 0x28b   : > { %4985 = vadd.xlane.f32.xlu0 %v4984_v14  ;;  %v4030_v3 = vsel %vm954_vm3, %v4025_v33, %v4029_v61  ;;  %v5086_v59 = vsel %vm689_vm2, %v5070_v40, 0.0  ;;  %v9065_v33 = vld [vmem:[%s8392_s30 + $0x2c] sm:$0xff]   ;;  %v6236_v14 = vunpack.c.h.bf16 %v8974_v45  ;;  %v5089_v43 = vsel %vm689_vm2, %v5071_v47, 0.0 }
 0x28c   : > { %7095 = vmatmul.mubr.bf16.vlgmr.msra.gmra.mxu0 %v4022_v24  ;;  %v9682_v24 = vshll.u32 %v9040_v36, 16  ;;  %v9679_v45 = vshll.u32 %v9065_v33, 16  ;;  %v5072_v47 = vand.u32 2147483647, %v6212_v54 }
 0x28d   : > { %7167 = vmatpush3.bf16.msra.mxu0 %v7363_v25  ;;  %7098 = vmatprep.mubr.msk.bf16.mxu0 %vm7388_vm1, %v9686_v1  ;;  %v6191_v25 = vunpack.c.l.bf16 %v6281_v37  ;;  %v5175_v40 = vand.u32 2147483647, %v6236_v14 }
 0x28e   : > { %7168 = vmatprep.subr.bf16.mxu0 %v9686_v1  ;;  %5195 = vadd.xlane.f32.xlu1 %v5194_v8  ;;  %v4045_v14 = vrot.slane %v9679_v45, 1  ;;  %v5092_v55 = vsel %vm689_vm2, %v5072_v47, 0.0 }
 0x28f   : > { %v4970_v22 = vand.u32 2147483647, %v6191_v25  ;;  %5087 = vadd.xlane.f32.xlu0 %v5086_v59  ;;  %v5191_v59 = vsel %vm689_vm2, %v5175_v40, 0.0 }
 0x291   : > { %7139 = vmatmul.mubr.bf16.vlgmr.msra.gmra.mxu1 %v4245_v16  ;;  %7169 = vmatpush3.bf16.msra.mxu0 %v7366_v29  ;;  %v6294_v29 = vld [vmem:[%s7502_s29 + $0xb8] sm:$0xff]   ;;  %v4996_v58 = vsel %vm689_vm2, %v4970_v22, 0.0  ;;  %v4033_v16 = vor.u32 %v9685_v63, %v4029_v61  ;;  %v6192_v61 = vunpack.c.h.bf16 %v6281_v37  ;;  %v7374_v37 = vld [vmem:[%s9668_s7 + $0x210] sm:$0xff]  }
 0x292   : > { %7142 = vmatprep.mubr.msk.bf16.mxu1 %vm7388_vm1, %v9686_v1  ;;  %7170 = vmatprep.subr.bf16.mxu0 %v9686_v1  ;;  %v6243_v8 = vunpack.c.l.bf16 %v6294_v29 }
 0x293   : > { %5096 = vadd.xlane.f32.xlu1 %v5095_v39  ;;  %5090 = vadd.xlane.f32.xlu0 %v5089_v43  ;;  %v4971_v22 = vand.u32 2147483647, %v6192_v61  ;;  %v6282_v61 = vld [vmem:[%s7502_s29 + $0x58] sm:$0xff]  }
 0x294   : > { %7099 = vmatmul.mubr.bf16.gmra.mxu0 %v4030_v3  ;;  %v5178_v38 = vand.u32 2147483647, %v6243_v8  ;;  %v4248_v3 = vrot.slane %v9040_v36, 1  ;;  %v6244_v8 = vunpack.c.h.bf16 %v6294_v29  ;;  %v6195_v43 = vunpack.c.l.bf16 %v6282_v61 }
 0x295   : > { %7171 = vmatpush3.bf16.msra.mxu0 %v7368_v28  ;;  %7102 = vmatprep.mubr.msk.bf16.mxu0 %vm7388_vm1, %v9686_v1  ;;  %v4037_v28 = vrot.slane %v9682_v24, 1 }
 0x296   : > { %7172 = vmatprep.subr.bf16.mxu0 %v9686_v1  ;;  %v5200_v39 = vsel %vm689_vm2, %v5178_v38, 0.0  ;;  %v5179_v38 = vand.u32 2147483647, %v6244_v8  ;;  %v6240_v8 = vunpack.c.h.bf16 %v9007_v23 }
 0x297   : > { %4997 = vadd.xlane.f32.xlu1 %v4996_v58  ;;  %v4038_v25 = vsel %vm954_vm3, %v4033_v16, %v4037_v28  ;;  %v4999_v58 = vsel %vm689_vm2, %v4971_v22, 0.0  ;;  %5192 = vadd.xlane.f32.xlu0 %v5191_v59  ;;  %v4972_v59 = vand.u32 2147483647, %v6195_v43 }
 0x298   : > { %v5203_v29 = vsel %vm689_vm2, %v5179_v38, 0.0 }
 0x299   : > { %7143 = vmatmul.mubr.bf16.gmra.mxu1 %v4247_v13  ;;  %7173 = vmatpush3.bf16.msra.mxu0 %v7370_v41  ;;  %v9683_v41 = vshrl.u32 %v9040_v36, 16  ;;  %v4249_v13 = vsel %vm1705_vm4, %v4246_v10, %v4248_v3  ;;  %v7376_v10 = vld [vmem:[%s9668_s7 + $0x208] sm:$0xff]   ;;  %v5002_v47 = vsel %vm689_vm2, %v4972_v59, 0.0  ;;  %v6196_v59 = vunpack.c.h.bf16 %v6282_v61 }
 0x29a   : > { %7146 = vmatprep.mubr.msk.bf16.mxu1 %vm7388_vm1, %v9686_v1  ;;  %7174 = vmatprep.subr.bf16.mxu0 %v9686_v1 }
 0x29b   : > { %5201 = vadd.xlane.f32.xlu1 %v5200_v39  ;;  %v4041_v16 = vor.u32 %v9683_v41, %v4037_v28  ;;  %v6188_v28 = vunpack.c.h.bf16 %v8988_v42  ;;  %5093 = vadd.xlane.f32.xlu0 %v5092_v55  ;;  %v9680_v42 = vshrl.u32 %v9065_v33, 16 }
 0x29c   : > { %7103 = vmatmul.mubr.bf16.gmra.mxu0 %v4038_v25  ;;  %v4250_v25 = vrot.slane %v9065_v33, 1 }
 0x29d   : > { %7106 = vmatprep.mubr.msk.bf16.mxu0 %vm7388_vm1, %v9686_v1  ;;  %7175 = vmatpush3.bf16.msra.mxu0 %v7372_v49  ;;  %v9094_v49 = vld [vmem:[%s8392_s30 + $0x34] sm:$0xff]   ;;  %v4046_v39 = vsel %vm954_vm3, %v4041_v16, %v4045_v14  ;;  %v4969_v40 = vand.u32 2147483647, %v6188_v28 }
 0x29e   : > { %7176 = vmatprep.subr.bf16.mxu0 %v9686_v1  ;;  %v4251_v55 = vsel %vm1705_vm4, %v4248_v3, %v4250_v25 }
 0x29f   : > { %5000 = vadd.xlane.f32.xlu1 %v4999_v58  ;;  %v7377_v58 = vld [vmem:[%s9668_s7 + $0x200] sm:$0xff]   ;;  %v4993_v54 = vsel %vm689_vm2, %v4969_v40, 0.0 }
 0x2a0   : > { %4994 = vadd.xlane.f32.xlu0 %v4993_v54 }
 0x2a1   : > { %7147 = vmatmul.mubr.bf16.gmra.mxu1 %v4249_v13  ;;  %7177 = vmatpush3.bf16.msra.mxu0 %v7374_v37  ;;  %v9678_v37 = vshll.u32 %v9094_v49, 16  ;;  %v6295_v13 = vld [vmem:[%s7502_s29 + $0xc0] sm:$0xff]  }
 0x2a2   : > { %7150 = vmatprep.mubr.msk.bf16.mxu1 %vm7388_vm1, %v9686_v1  ;;  %7178 = vmatprep.subr.bf16.mxu0 %v9686_v1  ;;  %v6247_v38 = vunpack.c.l.bf16 %v6295_v13 }
 0x2a3   : > { %5204 = vadd.xlane.f32.xlu1 %v5203_v29  ;;  %v5177_v29 = vand.u32 2147483647, %v6240_v8  ;;  %v4053_v23 = vrot.slane %v9678_v37, 1 }
 0x2a4   : > { %v2774_v22 = vpop.f32.mrf.mxu0  ;;  %7107 = vmatmul.mubr.bf16.gmra.mxu0 %v4046_v39  ;;  %v9128_v39 = vld [vmem:[%s8392_s30 + $0x3c] ss:$0 sps:$4 sm:$0x77]   ;;  %v5180_v40 = vand.u32 2147483647, %v6247_v38  ;;  %v4252_v38 = vrot.slane %v9094_v49, 1 }
 0x2a5   : > { %7110 = vmatprep.mubr.msk.bf16.mxu0 %vm7388_vm1, %v9686_v1  ;;  %7179 = vmatpush3.bf16.msra.mxu0 %v7376_v10  ;;  %v4049_v10 = vor.u32 %v9680_v42, %v4045_v14  ;;  %v5197_v3 = vsel %vm689_vm2, %v5177_v29, 0.0  ;;  %v6216_v14 = vunpack.c.h.bf16 %v9024_v53  ;;  %v9681_v29 = vshrl.u32 %v9094_v49, 16 }
 0x2a6   : > { %v6832_v16 = vpop.f32.mrf.mxu0  ;;  %7180 = vmatprep.subr.bf16.mxu0 %v9686_v1  ;;  %5198 = vadd.xlane.f32.xlu0 %v5197_v3  ;;  %v4059_v53 = vshll.u32 %v9128_v39, 16  ;;  %v6288_v3 = vld [vmem:[%s7502_s29 + $0x88] sm:$0xff]  }
 0x2a7   : > { %5003 = vadd.xlane.f32.xlu1 %v5002_v47  ;;  %v5206_v47 = vsel %vm689_vm2, %v5180_v40, 0.0 }
 0x2a8   : > { %v2777_v28 = vpop.f32.mrf.mxu0 }
 0x2a9   : > { %v2983_v43 = vpop.f32.mrf.mxu1  ;;  %7151 = vmatmul.mubr.bf16.gmra.mxu1 %v4251_v55  ;;  %7181 = vmatpush3.bf16.msra.mxu0 %v7377_v58  ;;  %v4054_v55 = vsel %vm954_vm3, %v4049_v10, %v4053_v23 }
 0x2aa   : > { %v9130_v16 = vadd.f32 %v2983_v43, %v2774_v22  ;;  %7154 = vmatprep.mubr.msk.bf16.mxu1 %vm7388_vm1, %v9686_v1  ;;  %v6833_v54 = vpop.f32.mrf.mxu0  ;;  %v5074_v22 = vand.u32 2147483647, %v6216_v14  ;;  %v4973_v43 = vand.u32 2147483647, %v6196_v59 }
 0x2ab   : > { %v6876_v8 = vpop.f32.mrf.mxu1  ;;  %5207 = vadd.xlane.f32.xlu1 %v5206_v47  ;;  %v6248_v54 = vunpack.c.h.bf16 %v6295_v13  ;;  %v4253_v47 = vsel %vm1705_vm4, %v4250_v25, %v4252_v38  ;;  %v6283_v25 = vld [vmem:[%s7502_s29 + $0x60] sm:$0xff]  }
 0x2ac   : > { %v2782_v37 = vpop.f32.mrf.mxu0  ;;  %7111 = vmatmul.mubr.bf16.gmra.mxu0 %v4054_v55  ;;  %v5098_v10 = vsel %vm689_vm2, %v5074_v22, 0.0  ;;  %v5005_v40 = vsel %vm689_vm2, %v4973_v43, 0.0  ;;  %v6219_v8 = vunpack.c.l.bf16 %v6288_v3  ;;  %v4057_v55 = vor.u32 %v9681_v29, %v4053_v23 }
 0x2ad   : > { %v2986_v58 = vpop.f32.mrf.mxu1  ;;  %7114 = vmatprep.mubr.msk.bf16.mxu0 %vm7388_vm1, %v9686_v1  ;;  %5099 = vadd.xlane.f32.xlu0 %v5098_v10  ;;  %v4061_v43 = vrot.slane %v4059_v53, 1  ;;  %v6200_v41 = vunpack.c.h.bf16 %v6283_v25 }
 0x2ae   : > { %v9141_v61 = vadd.f32 %v2986_v58, %v2777_v28  ;;  %v6836_v14 = vpop.f32.mrf.mxu0  ;;  %v5181_v28 = vand.u32 2147483647, %v6248_v54  ;;  %v5075_v22 = vand.u32 2147483647, %v6219_v8 }
 0x2af   : > { %v6877_v59 = vpop.f32.mrf.mxu1  ;;  %5006 = vadd.xlane.f32.xlu1 %v5005_v40  ;;  %v6220_v14 = vunpack.c.h.bf16 %v6288_v3  ;;  %v6199_v40 = vunpack.c.l.bf16 %v6283_v25  ;;  %v4062_v54 = vsel %vm954_vm3, %v4057_v55, %v4061_v43  ;;  %vm4910_vm3 = vcmask 30720  }
 0x2b0   : > { %v2785_v58 = vpop.f32.mrf.mxu0  ;;  %v5209_v13 = vsel %vm689_vm2, %v5181_v28, 0.0  ;;  %v5101_v10 = vsel %vm689_vm2, %v5075_v22, 0.0  ;;  %v6289_v22 = vld [vmem:[%s7502_s29 + $0x90] sm:$0xff]  }
 0x2b1   : > { %v2991_v45 = vpop.f32.mrf.mxu1  ;;  %7155 = vmatmul.mubr.bf16.gmra.mxu1 %v4253_v47  ;;  %5102 = vadd.xlane.f32.xlu0 %v5101_v10  ;;  %v4974_v47 = vand.u32 2147483647, %v6199_v40  ;;  %v6223_v10 = vunpack.c.l.bf16 %v6289_v22  ;;  %v4437_v40 = vshll.u32 %v8992_v21, 16 }
 0x2b2   : > { %v9151_v42 = vadd.f32 %v2991_v45, %v2782_v37  ;;  %7158 = vmatprep.mubr.msk.bf16.mxu1 %vm7388_vm1, %v9686_v1  ;;  %v6837_v59 = vpop.f32.mrf.mxu0  ;;  %v4254_v45 = vrot.slane %v9128_v39, 1  ;;  %v5076_v37 = vand.u32 2147483647, %v6220_v14 }
 0x2b3   : > { %v6880_v23 = vpop.f32.mrf.mxu1  ;;  %5210 = vadd.xlane.f32.xlu1 %v5209_v13  ;;  %v6296_v59 = vld [vmem:[%s7502_s29 + $0xc8] sm:$0xff]   ;;  %v5008_v29 = vsel %vm689_vm2, %v4974_v47, 0.0  ;;  %v4441_v47 = vrot.slane %v4023_v4, 1  ;;  %v4439_v4 = vrot.slane %v4437_v40, 2 }
 0x2b4   : > { %v2790_v53 = vpop.f32.mrf.mxu0  ;;  %7115 = vmatmul.mubr.bf16.gmra.mxu0 %v4062_v54  ;;  %v5104_v28 = vsel %vm689_vm2, %v5076_v37, 0.0  ;;  %v6251_v13 = vunpack.c.l.bf16 %v6296_v59  ;;  %v4255_v14 = vsel %vm1705_vm4, %v4252_v38, %v4254_v45  ;;  %v6224_v38 = vunpack.c.h.bf16 %v6289_v22 }
 0x2b5   : > { %v2994_v8 = vpop.f32.mrf.mxu1  ;;  %7118 = vmatprep.mubr.msk.bf16.mxu0 %vm7388_vm1, %v9686_v1  ;;  %5105 = vadd.xlane.f32.xlu0 %v5104_v28 }
 0x2b6   : > { %v9160_v3 = vadd.f32 %v2994_v8, %v2785_v58  ;;  %v6840_v23 = vpop.f32.mrf.mxu0  ;;  %v4434_v58 = vshrl.u32 %v8992_v21, 16  ;;  %v4063_v8 = vshrl.u32 %v9128_v39, 16 }
 0x2b7   : > { %v6881_v55 = vpop.f32.mrf.mxu1  ;;  %5009 = vadd.xlane.f32.xlu1 %v5008_v29  ;;  %v5077_v23 = vand.u32 2147483647, %v6223_v10 }
 0x2b8   : > { %v2793_v54 = vpop.f32.mrf.mxu0  ;;  %v5182_v55 = vand.u32 2147483647, %v6251_v13  ;;  %v4065_v29 = vor.u32 %v4063_v8, %v4061_v43  ;;  %v4436_v18 = vrot.slane %v4434_v58, 1  ;;  %v6290_v43 = vld [vmem:[%s7502_s29 + $0x98] sm:$0xff]   ;;  %v6252_v58 = vunpack.c.h.bf16 %v6296_v59  ;;  %v6284_v59 = vld [vmem:[%s7502_s29 + $0x68] sm:$0xff]  }
 0x2b9   : > { %v2999_v37 = vpop.f32.mrf.mxu1  ;;  %7159 = vmatmul.mubr.bf16.gmra.mxu1 %v4255_v14  ;;  %v4442_v14 = vrot.slane %v4019_v19, 2  ;;  %v5107_v10 = vsel %vm689_vm2, %v5077_v23, 0.0  ;;  %v6227_v23 = vunpack.c.l.bf16 %v6290_v43 }
 0x2ba   : > { %v9176_v24 = vadd.f32 %v2999_v37, %v2790_v53  ;;  %7162 = vmatprep.mubr.msk.bf16.mxu1 %vm7388_vm1, %v9686_v1  ;;  %v6841_v21 = vpop.f32.mrf.mxu0  ;;  %v5212_v13 = vsel %vm689_vm2, %v5182_v55, 0.0  ;;  %5108 = vadd.xlane.f32.xlu0 %v5107_v10  ;;  %v5078_v53 = vand.u32 2147483647, %v6224_v38  ;;  %v4975_v37 = vand.u32 2147483647, %v6200_v41 }
 0x2bb   : > { %v6884_v28 = vpop.f32.mrf.mxu1  ;;  %5213 = vadd.xlane.f32.xlu1 %v5212_v13  ;;  %v4440_v41 = vor.u32 %v4439_v4, %v4436_v18  ;;  %v4443_v55 = vor.u32 %v4442_v14, %v4441_v47  ;;  %v6277_v13 = vld [vmem:[%s7502_s29 + $0x30] sm:$0xff]   ;;  %v6203_v47 = vunpack.c.l.bf16 %v6284_v59 }
 0x2bc   : > { %v2798_v63 = vpop.f32.mrf.mxu0  ;;  %7119 = vmatmul.mubr.bf16.gmra.mxu0 %v4065_v29  ;;  %v5110_v30 = vsel %vm689_vm2, %v5078_v53, 0.0  ;;  %v5011_v19 = vsel %vm689_vm2, %v4975_v37, 0.0  ;;  %v5079_v28 = vand.u32 2147483647, %v6227_v23  ;;  %v6175_v14 = vunpack.c.l.bf16 %v6277_v13  ;;  %v9209_v23 = vld [vmem:[%s7502_s29 + $0xd0] sm:$0xff]  }
 0x2bd   : > { %v3002_v22 = vpop.f32.mrf.mxu1  ;;  %7182 = vmatprep.mubr.msk.bf16.mxu0 %vm7388_vm1, %v9686_v1  ;;  %v4444_v4 = vsel %vm2036_vm5, %v4440_v41, %v4443_v55  ;;  %v6228_v41 = vunpack.c.h.bf16 %v6290_v43  ;;  %v6176_v43 = vunpack.c.h.bf16 %v6277_v13 }
 0x2be   : > { %v9184_v25 = vadd.f32 %v3002_v22, %v2793_v54  ;;  %v6844_v40 = vpop.f32.mrf.mxu0  ;;  %5111 = vadd.xlane.f32.xlu0 %v5110_v30  ;;  %v5183_v54 = vand.u32 2147483647, %v6252_v58  ;;  %v5113_v18 = vsel %vm689_vm2, %v5079_v28, 0.0  ;;  %v9704_v22 = vshrl.u32 %v9002_v57, 16 }
 0x2bf   : > { %v6885_v8 = vpop.f32.mrf.mxu1  ;;  %5012 = vadd.xlane.f32.xlu1 %v5011_v19  ;;  %v4976_v58 = vand.u32 2147483647, %v6203_v47  ;;  %v4869_v40 = vand.u32 2147483647, %v6175_v14 }
 0x2c0   : > { %v2801_v38 = vpop.f32.mrf.mxu0  ;;  %v5215_v10 = vsel %vm689_vm2, %v5183_v54, 0.0  ;;  %v4445_v39 = vrot.slane %v9704_v22, 1 }
 0x2c1   : > { %v3007_v21 = vpop.f32.mrf.mxu1  ;;  %7163 = vmatmul.mubr.bf16.gmra.mxu1 %v4254_v45  ;;  %v9705_v45 = vshll.u32 %v9002_v57, 16  ;;  %v5014_v57 = vsel %vm689_vm2, %v4976_v58, 0.0  ;;  %v4907_v28 = vsel %vm689_vm2, %v4869_v40, 0.0  ;;  %v6204_v58 = vunpack.c.h.bf16 %v6284_v59 }
 0x2c2   : > { %v9193_v29 = vadd.f32 %v3007_v21, %v2798_v63  ;;  %v6845_v53 = vpop.f32.mrf.mxu0  ;;  %5114 = vadd.xlane.f32.xlu0 %v5113_v18 }
 0x2c3   : > { %v6888_v37 = vpop.f32.mrf.mxu1  ;;  %v4446_v63 = vrot.slane %v9705_v45, 2  ;;  %5216 = vadd.xlane.f32.xlu1 %v5215_v10  ;;  %v6255_v10 = vunpack.c.l.bf16 %v9209_v23  ;;  %v4977_v13 = vand.u32 2147483647, %v6204_v58  ;;  %v9709_v58 = vshll.u32 %v9065_v33, 16 }
 0x2c4   : > { %v2806_v30 = vpop.f32.mrf.mxu0  ;;  %7183 = vmatmul.mubr.bf16.vlgmr.msra.gmra.mxu0 %v4444_v4  ;;  %v5080_v37 = vand.u32 2147483647, %v6228_v41  ;;  %v9707_v41 = vshll.u32 %v9040_v36, 16 }
 0x2c5   : > { %v3010_v19 = vpop.f32.mrf.mxu1  ;;  %7186 = vmatprep.mubr.msk.bf16.mxu0 %vm7388_vm1, %v9686_v1  ;;  %v4447_v53 = vor.u32 %v4446_v63, %v4445_v39  ;;  %v5184_v47 = vand.u32 2147483647, %v6255_v10  ;;  %v9706_v39 = vshrl.u32 %v9040_v36, 16 }
 0x2c6   : > { %v9204_v8 = vadd.f32 %v3010_v19, %v2801_v38  ;;  %v6848_v54 = vpop.f32.mrf.mxu0  ;;  %5015 = vadd.xlane.f32.xlu0 %v5014_v57  ;;  %v5116_v4 = vsel %vm689_vm2, %v5080_v37, 0.0  ;;  %v5017_v37 = vsel %vm4910_vm3, %v4977_v13, 0.0 }
 0x2c7   : > { %v6889_v21 = vpop.f32.mrf.mxu1  ;;  %4908 = vadd.xlane.f32.xlu1 %v4907_v28  ;;  %v5218_v19 = vsel %vm689_vm2, %v5184_v47, 0.0  ;;  %v4448_v40 = vsel %vm2036_vm5, %v4443_v55, %v4447_v53  ;;  %v4449_v63 = vrot.slane %v9706_v39, 1  ;;  %v4450_v54 = vrot.slane %v9707_v41, 2 }
 0x2c8   : > { %v2809_v38 = vpop.f32.mrf.mxu0 }
 0x2c9   : > { %v3015_v18 = vpop.f32.mrf.mxu1  ;;  %v4451_v36 = vor.u32 %v4450_v54, %v4449_v63 }
 0x2ca   : > { %v9214_v14 = vadd.f32 %v3015_v18, %v2806_v30  ;;  %v6849_v22 = vpop.f32.mrf.mxu0  ;;  %5219 = vadd.xlane.f32.xlu0 %v5218_v19  ;;  %v4870_v30 = vand.u32 2147483647, %v6176_v43 }
 0x2cb   : > { %v6892_v45 = vpop.f32.mrf.mxu1  ;;  %5117 = vadd.xlane.f32.xlu1 %v5116_v4 }
 0x2cc   : > { %v2814_v21 = vpop.f32.mrf.mxu0  ;;  %7187 = vmatmul.mubr.bf16.gmra.mxu0 %v4448_v40  ;;  %v4911_v55 = vsel %vm4910_vm3, %v4870_v30, 0.0  ;;  %v9708_v45 = vshrl.u32 %v9065_v33, 16  ;;  %v4454_v40 = vrot.slane %v9709_v58, 2 }
 0x2cd   : > { %v3018_v57 = vpop.f32.mrf.mxu1  ;;  %7190 = vmatprep.mubr.msk.bf16.mxu0 %vm7388_vm1, %v9686_v1 }
 0x2ce   : > { %v9223_v28 = vadd.f32 %v3018_v57, %v2809_v38  ;;  %v6852_v59 = vpop.f32.mrf.mxu0  ;;  %4912 = vadd.xlane.f32.xlu0 %v4911_v55  ;;  %v4452_v38 = vsel %vm2036_vm5, %v4447_v53, %v4451_v36  ;;  %v4453_v19 = vrot.slane %v9708_v45, 1 }
 0x2cf   : > { %v6893_v10 = vpop.f32.mrf.mxu1  ;;  %5018 = vadd.xlane.f32.xlu1 %v5017_v37 }
 0x2d0   : > { %v2817_v18 = vpop.f32.mrf.mxu0  ;;  %v9710_v10 = vshrl.u32 %v9094_v49, 16 }
 0x2d1   : > { %v3023_v47 = vpop.f32.mrf.mxu1 }
 0x2d2   : > { %v9229_v4 = vadd.f32 %v3023_v47, %v2814_v21  ;;  %v6853_v43 = vpop.f32.mrf.mxu0  ;;  %v4455_v21 = vor.u32 %v4454_v40, %v4453_v19  ;;  %v4457_v37 = vrot.slane %v9710_v10, 1 }
 0x2d3   : > { %v6896_v22 = vpop.f32.mrf.mxu1  ;;  %v7378_v43 = vld [vmem:[%s8392_s30 + $0x3c] ss:$0 sps:$4 sm:$0xff]  }
 0x2d4   : > { %v2822_v39 = vpop.f32.mrf.mxu0  ;;  %7191 = vmatmul.mubr.bf16.gmra.mxu0 %v4452_v38  ;;  %v4456_v33 = vsel %vm2036_vm5, %v4451_v36, %v4455_v21  ;;  %v4465_v36 = vshll.u32 %v7378_v43, 16 }
 0x2d5   : > { %v3026_v41 = vpop.f32.mrf.mxu1  ;;  %7194 = vmatprep.mubr.msk.bf16.mxu0 %vm7388_vm1, %v9686_v1 }
 0x2d6   : > { %v9236_v63 = vadd.f32 %v3026_v41, %v2817_v18  ;;  %v6856_v54 = vpop.f32.mrf.mxu0  ;;  %v9711_v18 = vshll.u32 %v9094_v49, 16 }
 0x2d7   : > { %v6897_v30 = vpop.f32.mrf.mxu1 }
 0x2d8   : > { %v2825_v57 = vpop.f32.mrf.mxu0  ;;  %v4458_v47 = vrot.slane %v9711_v18, 2 }
 0x2d9   : > { %v3031_v53 = vpop.f32.mrf.mxu1 }
 0x2da   : > { %v9240_v13 = vadd.f32 %v3031_v53, %v2822_v39  ;;  %v6857_v55 = vpop.f32.mrf.mxu0  ;;  %v4459_v40 = vor.u32 %v4458_v47, %v4457_v37  ;;  %v4462_v39 = vshrl.u32 %v7378_v43, 16 }
 0x2db   : > { %v6900_v59 = vpop.f32.mrf.mxu1 }
 0x2dc   : > { %v3185_v38 = vpop.f32.mrf.mxu0  ;;  %7195 = vmatmul.mubr.bf16.gmra.mxu0 %v4456_v33  ;;  %v4460_v55 = vsel %vm2036_vm5, %v4455_v21, %v4459_v40  ;;  %v4464_v59 = vrot.slane %v4462_v39, 1 }
 0x2dd   : > { %v3034_v22 = vpop.f32.mrf.mxu1  ;;  %v3239_v45 = vadd.f32 %v3185_v38, %v9130_v16  ;;  %7198 = vmatprep.mubr.msk.bf16.mxu0 %vm7388_vm1, %v9686_v1  ;;  %v4467_v16 = vrot.slane %v4465_v36, 2 }
 0x2de   : > { %v6920_v58 = vpop.f32.mrf.mxu0 }
 0x2df   : > { %v6901_v19 = vpop.f32.mrf.mxu1  ;;  %v4468_v43 = vor.u32 %v4467_v16, %v4464_v59 }
 0x2e0   : > { %v3188_v41 = vpop.f32.mrf.mxu0 }
 0x2e1   : > { %v3469_v54 = vpop.f32.mrf.mxu1  ;;  %v3240_v30 = vadd.f32 %v3188_v41, %v9141_v61  ;;  %v4469_v39 = vsel %vm2036_vm5, %v4459_v40, %v4468_v43 }
 0x2e2   : > { %v9252_v49 = vadd.f32 %v3469_v54, %v3239_v45  ;;  %v6921_v57 = vpop.f32.mrf.mxu0 }
 0x2e3   : > { %v6964_v53 = vpop.f32.mrf.mxu1  ;;  %v9270_v57 = vld [vmem:[%s7502_s29 + $0xa0] sm:$0xff]  }
 0x2e4   : > { %v3193_v33 = vpop.f32.mrf.mxu0  ;;  %7199 = vmatmul.mubr.bf16.gmra.mxu0 %v4460_v55  ;;  %v6231_v55 = vunpack.c.l.bf16 %v9270_v57 }
 0x2e5   : > { %v3472_v10 = vpop.f32.mrf.mxu1  ;;  %v3241_v18 = vadd.f32 %v3193_v33, %v9151_v42  ;;  %7202 = vmatprep.mubr.msk.bf16.mxu0 %vm7388_vm1, %v9686_v1 }
 0x2e6   : > { %v9256_v37 = vadd.f32 %v3472_v10, %v3240_v30  ;;  %v6924_v47 = vpop.f32.mrf.mxu0  ;;  %v5081_v40 = vand.u32 2147483647, %v6231_v55 }
 0x2e7   : > { %v6965_v61 = vpop.f32.mrf.mxu1  ;;  %v4873_v30 = vpop.xlane.xlu1 %4872 }
 0x2e8   : > { %v3196_v22 = vpop.f32.mrf.mxu0  ;;  %v5119_v61 = vsel %vm689_vm2, %v5081_v40, 0.0 }
 0x2e9   : > { %v3477_v38 = vpop.f32.mrf.mxu1  ;;  %v3242_v21 = vadd.f32 %v3196_v22, %v9160_v3  ;;  %5120 = vadd.xlane.f32.xlu0 %v5119_v61 }
 0x2ea   : > { %v9261_v45 = vadd.f32 %v3477_v38, %v3241_v18  ;;  %v6925_v19 = vpop.f32.mrf.mxu0 }
 0x2eb   : > { %v6968_v58 = vpop.f32.mrf.mxu1 }
 0x2ec   : > { %v3201_v42 = vpop.f32.mrf.mxu0  ;;  %7203 = vmatmul.mubr.bf16.gmra.mxu0 %v4469_v39 }
 0x2ed   : > { %v3480_v36 = vpop.f32.mrf.mxu1  ;;  %v3243_v41 = vadd.f32 %v3201_v42, %v9176_v24  ;;  %7206 = vmatprep.mubr.msk.bf16.mxu0 %vm7388_vm1, %v9686_v1  ;;  %v4882_v24 = vpop.xlane.xlu1 %4881 }
 0x2ee   : > { %v9265_v54 = vadd.f32 %v3480_v36, %v3242_v21  ;;  %v6928_v3 = vpop.f32.mrf.mxu0 }
 0x2ef   : > { %v6969_v53 = vpop.f32.mrf.mxu1 }
 0x2f0   : > { %v3204_v59 = vpop.f32.mrf.mxu0 }
 0x2f1   : > { %v3485_v16 = vpop.f32.mrf.mxu1  ;;  %v3244_v33 = vadd.f32 %v3204_v59, %v9184_v25  ;;  %v4888_v58 = vpop.xlane.xlu1 %4887 }
 0x2f2   : > { %v9274_v10 = vadd.f32 %v3485_v16, %v3243_v41  ;;  %v6929_v18 = vpop.f32.mrf.mxu0 }
 0x2f3   : > { %v6972_v47 = vpop.f32.mrf.mxu1 }
 0x2f4   : > { %v3209_v22 = vpop.f32.mrf.mxu0  ;;  %7207 = vmatmul.mubr.bf16.gmra.mxu0 %v4468_v43 }
 0x2f5   : > { %v3488_v38 = vpop.f32.mrf.mxu1  ;;  %v3245_v21 = vadd.f32 %v3209_v22, %v9193_v29  ;;  %v4894_v53 = vpop.xlane.xlu1 %4893 }
 0x2f6   : > { %v9278_v19 = vadd.f32 %v3488_v38, %v3244_v33  ;;  %v6932_v39 = vpop.f32.mrf.mxu0 }
 0x2f7   : > { %v6973_v42 = vpop.f32.mrf.mxu1  ;;  %v4876_v61 = vpop.xlane.xlu0 %4875 }
 0x2f8   : > { %v3212_v36 = vpop.f32.mrf.mxu0  ;;  %v4914_v39 = vadd.f32 %v4876_v61, %v4873_v30 }
 0x2f9   : > { %v3493_v25 = vpop.f32.mrf.mxu1  ;;  %v3246_v41 = vadd.f32 %v3212_v36, %v9204_v8  ;;  %v4900_v29 = vpop.xlane.xlu1 %4899 }
 0x2fa   : > { %v9281_v3 = vadd.f32 %v3493_v25, %v3245_v21  ;;  %v6933_v55 = vpop.f32.mrf.mxu0 }
 0x2fb   : > { %v6976_v59 = vpop.f32.mrf.mxu1 }
 0x2fc   : > { %v3217_v16 = vpop.f32.mrf.mxu0  ;;  %v4879_v55 = vpop.xlane.xlu0 %4878 }
 0x2fd   : > { %v3496_v40 = vpop.f32.mrf.mxu1  ;;  %v3247_v43 = vadd.f32 %v3217_v16, %v9214_v14 }
 0x2fe   : > { %v9284_v18 = vadd.f32 %v3496_v40, %v3246_v41  ;;  %v6936_v33 = vpop.f32.mrf.mxu0  ;;  %v9289_v42 = vpop.xlane.xlu1 %4905  ;;  %v4915_v41 = vadd.f32 %v4914_v39, %v4879_v55 }
 0x2ff   : > { %v6977_v47 = vpop.f32.mrf.mxu1 }
 0x300   : > { %v3220_v22 = vpop.f32.mrf.mxu0  ;;  %v4916_v30 = vadd.f32 %v4915_v41, %v4882_v24  ;;  %v4885_v61 = vpop.xlane.xlu0 %4884 }
 0x301   : > { %v3501_v38 = vpop.f32.mrf.mxu1  ;;  %v3248_v8 = vadd.f32 %v3220_v22, %v9223_v28 }
 0x302   : > { %v9287_v21 = vadd.f32 %v3501_v38, %v3247_v43  ;;  %v6937_v36 = vpop.f32.mrf.mxu0  ;;  %v4983_v33 = vpop.xlane.xlu1 %4982  ;;  %v4917_v22 = vadd.f32 %v4916_v30, %v4885_v61 }
 0x303   : > { %v6980_v25 = vpop.f32.mrf.mxu1 }
 0x304   : > { %v3225_v59 = vpop.f32.mrf.mxu0  ;;  %v4918_v39 = vadd.f32 %v4917_v22, %v4888_v58  ;;  %v4891_v55 = vpop.xlane.xlu0 %4890  ;;  %v9303_v58 = vld [vmem:[%s7502_s29 + $0xd8] sm:$0xff]  }
 0x305   : > { %v3504_v14 = vpop.f32.mrf.mxu1  ;;  %v3249_v16 = vadd.f32 %v3225_v59, %v9229_v4  ;;  %9712 = vst [vmem:[#allocation11_spill] sm:$0xff] %v9303_v58 }
 0x306   : > { %v9292_v40 = vadd.f32 %v3504_v14, %v3248_v8  ;;  %v6940_v47 = vpop.f32.mrf.mxu0  ;;  %v5085_v25 = vpop.xlane.xlu1 %5084  ;;  %v4919_v59 = vadd.f32 %v4918_v39, %v4891_v55 }
 0x307   : > { %v6981_v1 = vpop.f32.mrf.mxu1 }
 0x308   : > { %v3228_v28 = vpop.f32.mrf.mxu0  ;;  %v4920_v30 = vadd.f32 %v4919_v59, %v4894_v53 }
 0x309   : > { %v3509_v43 = vpop.f32.mrf.mxu1  ;;  %v3250_v38 = vadd.f32 %v3228_v28, %v9236_v63  ;;  %v4897_v63 = vpop.xlane.xlu0 %4896 }
 0x30a   : > { %v9295_v36 = vadd.f32 %v3509_v43, %v3249_v16  ;;  %v6941_v56 = vpop.f32.mrf.mxu0  ;;  %v4989_v14 = vpop.xlane.xlu1 %4988  ;;  %v4921_v28 = vadd.f32 %v4920_v30, %v4897_v63 }
 0x30b   : > { %v6984_v12 = vpop.f32.mrf.mxu1 }
 0x30c   : > { %v3233_v4 = vpop.f32.mrf.mxu0  ;;  %v4922_v39 = vadd.f32 %v4921_v28, %v4900_v29 }
 0x30d   : > { %v3512_v8 = vpop.f32.mrf.mxu1  ;;  %v3251_v1 = vadd.f32 %v3233_v4, %v9240_v13  ;;  %v6259_v13 = vunpack.c.l.bf16 %v9303_v58 }
 0x30e   : > { %v9298_v24 = vadd.f32 %v3512_v8, %v3250_v38  ;;  %v6944_v41 = vpop.f32.mrf.mxu0  ;;  %v5190_v12 = vpop.xlane.xlu1 %5189 }
 0x30f   : > { %v6985_v47 = vpop.f32.mrf.mxu1  ;;  %v4903_v38 = vpop.xlane.xlu0 %4902  ;;  %v5186_v53 = vand.u32 2147483647, %v6259_v13 }
 0x310   : > { %v3236_v16 = vpop.f32.mrf.mxu0  ;;  %v9306_v8 = vadd.f32 %v4922_v39, %v4903_v38 }
 0x311   : > { %v3517_v61 = vpop.f32.mrf.mxu1  ;;  %v5224_v30 = vsel %vm689_vm2, %v5186_v53, 0.0 }
 0x312   : > { %v9300_v56 = vadd.f32 %v3517_v61, %v3251_v1  ;;  %v6945_v43 = vpop.f32.mrf.mxu0  ;;  %v4992_v41 = vpop.xlane.xlu1 %4991  ;;  %5225 = vadd.xlane.f32.xlu0 %v5224_v30 }
 0x313   : > { %v6988_v22 = vpop.f32.mrf.mxu1  ;;  %v4980_v63 = vpop.xlane.xlu0 %4979 }
 0x314   : > { %v3649_v4 = vpop.f32.mrf.mxu0  ;;  %v5020_v29 = vadd.f32 %v4983_v33, %v4980_v63 }
 0x315   : > { %v3520_v55 = vpop.f32.mrf.mxu1  ;;  %v3703_v59 = vadd.f32 %v3649_v4, %v9252_v49 }
 0x316   : > { %v7008_v1 = vpop.f32.mrf.mxu0 }
 0x317   : > { %v6989_v47 = vpop.f32.mrf.mxu1  ;;  %v9313_v22 = vpop.xlane.xlu1 %5195 }
 0x318   : > { %v3652_v16 = vpop.f32.mrf.mxu0  ;;  %9713 = vst [vmem:[#allocation12_spill] sm:$0xff] %v9313_v22  ;;  %v4986_v38 = vpop.xlane.xlu0 %4985 }
 0x319   : > { %v3881_v61 = vpop.f32.mrf.mxu1  ;;  %v3704_v28 = vadd.f32 %v3652_v16, %v9256_v37  ;;  %v5021_v4 = vadd.f32 %v5020_v29, %v4986_v38 }
 0x31a   : > { %v9311_v43 = vadd.f32 %v3881_v61, %v3703_v59  ;;  %v7009_v39 = vpop.f32.mrf.mxu0 }
 0x31b   : > { %v7052_v13 = vpop.f32.mrf.mxu1  ;;  %v5022_v63 = vadd.f32 %v5021_v4, %v4989_v14 }
 0x31c   : > { %v3657_v49 = vpop.f32.mrf.mxu0  ;;  %v9318_v1 = vpop.xlane.xlu1 %5096 }
 0x31d   : > { %v3884_v55 = vpop.f32.mrf.mxu1  ;;  %v3705_v47 = vadd.f32 %v3657_v49, %v9261_v45  ;;  %9714 = vst [vmem:[#allocation13_spill] sm:$0xff] %v9318_v1  ;;  %v5088_v37 = vpop.xlane.xlu0 %5087 }
 0x31e   : > { %v9316_v53 = vadd.f32 %v3884_v55, %v3704_v28  ;;  %v7012_v30 = vpop.f32.mrf.mxu0  ;;  %v5125_v61 = vadd.f32 %v5088_v37, %v5085_v25 }
 0x31f   : > { %v7053_v33 = vpop.f32.mrf.mxu1 }
 0x320   : > { %v3660_v59 = vpop.f32.mrf.mxu0  ;;  %v9323_v22 = vpop.xlane.xlu1 %4997 }
 0x321   : > { %v3889_v16 = vpop.f32.mrf.mxu1  ;;  %v3706_v39 = vadd.f32 %v3660_v59, %v9265_v54  ;;  %v5091_v30 = vpop.xlane.xlu0 %5090 }
 0x322   : > { %v9321_v13 = vadd.f32 %v3889_v16, %v3705_v47  ;;  %v7013_v29 = vpop.f32.mrf.mxu0  ;;  %v5126_v25 = vadd.f32 %v5125_v61, %v5091_v30 }
 0x323   : > { %v7056_v38 = vpop.f32.mrf.mxu1 }
 0x324   : > { %v3665_v45 = vpop.f32.mrf.mxu0  ;;  %v9328_v14 = vpop.xlane.xlu1 %5201 }
 0x325   : > { %v3892_v28 = vpop.f32.mrf.mxu1  ;;  %v3707_v49 = vadd.f32 %v3665_v45, %v9274_v10  ;;  %9715 = vst [vmem:[#allocation14_spill] sm:$0xff] %v9328_v14  ;;  %v5193_v16 = vpop.xlane.xlu0 %5192 }
 0x326   : > { %v9326_v55 = vadd.f32 %v3892_v28, %v3706_v39  ;;  %v7016_v4 = vpop.f32.mrf.mxu0  ;;  %v9333_v9 = vadd.f32 %v5193_v16, %v5190_v12 }
 0x327   : > { %v7057_v33 = vpop.f32.mrf.mxu1 }
 0x328   : > { %v3668_v37 = vpop.f32.mrf.mxu0  ;;  %v5001_v29 = vpop.xlane.xlu1 %5000  ;;  %9716 = vst [vmem:[#allocation15_spill] sm:$0xff] %v9333_v9 }
 0x329   : > { %v3897_v54 = vpop.f32.mrf.mxu1  ;;  %v3708_v47 = vadd.f32 %v3668_v37, %v9278_v19  ;;  %v5094_v4 = vpop.xlane.xlu0 %5093 }
 0x32a   : > { %v9331_v59 = vadd.f32 %v3897_v54, %v3707_v49  ;;  %v7017_v38 = vpop.f32.mrf.mxu0  ;;  %v9340_v19 = vadd.f32 %v5126_v25, %v5094_v4  ;;  %v5023_v49 = vadd.f32 %v5022_v63, %v4992_v41 }
 0x32b   : > { %v7060_v1 = vpop.f32.mrf.mxu1 }
 0x32c   : > { %v3673_v10 = vpop.f32.mrf.mxu0  ;;  %v9338_v61 = vpop.xlane.xlu1 %5204  ;;  %9718 = vst [vmem:[#allocation17_spill] sm:$0xff] %v9340_v19 }
 0x32d   : > { %v3900_v39 = vpop.f32.mrf.mxu1  ;;  %v3709_v45 = vadd.f32 %v3673_v10, %v9281_v3  ;;  %9717 = vst [vmem:[#allocation16_spill] sm:$0xff] %v9338_v61  ;;  %v4995_v16 = vpop.xlane.xlu0 %4994 }
 0x32e   : > { %v9336_v28 = vadd.f32 %v3900_v39, %v3708_v47  ;;  %v7020_v30 = vpop.f32.mrf.mxu0  ;;  %v5024_v47 = vadd.f32 %v5023_v49, %v4995_v16 }
 0x32f   : > { %v7061_v33 = vpop.f32.mrf.mxu1 }
 0x330   : > { %v3676_v37 = vpop.f32.mrf.mxu0  ;;  %v5004_v38 = vpop.xlane.xlu1 %5003 }
 0x331   : > { %v3905_v54 = vpop.f32.mrf.mxu1  ;;  %v3710_v1 = vadd.f32 %v3676_v37, %v9284_v18  ;;  %v9348_v25 = vpop.xlane.xlu0 %5198 }
 0x332   : > { %v9343_v12 = vadd.f32 %v3905_v54, %v3709_v45  ;;  %v7021_v14 = vpop.f32.mrf.mxu0  ;;  %9719 = vst [vmem:[#allocation18_spill] sm:$0xff] %v9348_v25 }
 0x333   : > { %v7064_v3 = vpop.f32.mrf.mxu1 }
 0x334   : > { %v3681_v10 = vpop.f32.mrf.mxu0  ;;  %v9350_v41 = vpop.xlane.xlu1 %5207 }
 0x335   : > { %v3908_v39 = vpop.f32.mrf.mxu1  ;;  %v3711_v61 = vadd.f32 %v3681_v10, %v9287_v21  ;;  %9720 = vst [vmem:[#allocation19_spill] sm:$0xff] %v9350_v41 }
 0x336   : > { %v9346_v30 = vadd.f32 %v3908_v39, %v3710_v1  ;;  %v7024_v63 = vpop.f32.mrf.mxu0  ;;  %v9355_v14 = vpop.xlane.xlu0 %5099 }
 0x337   : > { %v7065_v4 = vpop.f32.mrf.mxu1  ;;  %9721 = vst [vmem:[#allocation20_spill] sm:$0xff] %v9355_v14 }
 0x338   : > { %v3684_v18 = vpop.f32.mrf.mxu0  ;;  %v5007_v49 = vpop.xlane.xlu1 %5006 }
 0x339   : > { %v3913_v45 = vpop.f32.mrf.mxu1  ;;  %v3712_v33 = vadd.f32 %v3684_v18, %v9292_v40  ;;  %v5025_v40 = vadd.f32 %v5024_v47, %v9323_v22 }
 0x33a   : > { %v9353_v37 = vadd.f32 %v3913_v45, %v3711_v61  ;;  %v7025_v54 = vpop.f32.mrf.mxu0  ;;  %v9360_v39 = vpop.xlane.xlu0 %5102 }
 0x33b   : > { %v7068_v16 = vpop.f32.mrf.mxu1  ;;  %9722 = vst [vmem:[#allocation21_spill] sm:$0xff] %v9360_v39 }
 0x33c   : > { %v3689_v21 = vpop.f32.mrf.mxu0  ;;  %v9362_v63 = vpop.xlane.xlu1 %5210 }
 0x33d   : > { %v3916_v1 = vpop.f32.mrf.mxu1  ;;  %v3713_v3 = vadd.f32 %v3689_v21, %v9295_v36  ;;  %9723 = vst [vmem:[#allocation22_spill] sm:$0xff] %v9362_v63  ;;  %v5026_v21 = vadd.f32 %v5025_v40, %v5001_v29 }
 0x33e   : > { %v9358_v10 = vadd.f32 %v3916_v1, %v3712_v33  ;;  %v7028_v4 = vpop.f32.mrf.mxu0  ;;  %v9368_v16 = vpop.xlane.xlu0 %5105  ;;  %v4924_v1 = vadd.f32 %v9306_v8, %v9289_v42 }
 0x33f   : > { %v7069_v41 = vpop.f32.mrf.mxu1  ;;  %9724 = vst [vmem:[#allocation23_spill] sm:$0xff] %v9368_v16 }
 0x340   : > { %v3692_v61 = vpop.f32.mrf.mxu0  ;;  %v5010_v25 = vpop.xlane.xlu1 %5009 }
 0x341   : > { %v3921_v18 = vpop.f32.mrf.mxu1  ;;  %v3714_v45 = vadd.f32 %v3692_v61, %v9298_v24 }
 0x342   : > { %v9366_v54 = vadd.f32 %v3921_v18, %v3713_v3  ;;  %v7029_v36 = vpop.f32.mrf.mxu0  ;;  %v5027_v18 = vadd.f32 %v5026_v21, %v5004_v38 }
 0x343   : > { %v7072_v33 = vpop.f32.mrf.mxu1  ;;  %v9375_v47 = vpop.xlane.xlu0 %5108 }
 0x344   : > { %v3697_v63 = vpop.f32.mrf.mxu0  ;;  %9726 = vst [vmem:[#allocation25_spill] sm:$0xff] %v9375_v47  ;;  %v9377_v24 = vpop.xlane.xlu1 %5213  ;;  %v5028_v16 = vadd.f32 %v5027_v18, %v5007_v49 }
 0x345   : > { %v3924_v4 = vpop.f32.mrf.mxu1  ;;  %v3715_v41 = vadd.f32 %v3697_v63, %v9300_v56  ;;  %9727 = vst [vmem:[#allocation26_spill] sm:$0xff] %v9377_v24 }
 0x346   : > { %v9373_v22 = vadd.f32 %v3924_v4, %v3714_v45  ;;  %v7032_v3 = vpop.f32.mrf.mxu0  ;;  %v5029_v38 = vadd.f32 %v5028_v16, %v5010_v25 }
 0x347   : > { %v7073_v61 = vpop.f32.mrf.mxu1  ;;  %v9381_v29 = vpop.xlane.xlu0 %5111 }
 0x348   : > { %9725 = vst [vmem:[#allocation24_spill] sm:$0xff] %v9373_v22  ;;  %v3700_v9 = vpop.f32.mrf.mxu0  ;;  %9729 = vst [vmem:[#allocation28_spill] sm:$0xff] %v9381_v29  ;;  %v5013_v42 = vpop.xlane.xlu1 %5012 }
 0x349   : > { %v3929_v36 = vpop.f32.mrf.mxu1 }
 0x34a   : > { %v9379_v33 = vadd.f32 %v3929_v36, %v3715_v41  ;;  %v7033_v8 = vpop.f32.mrf.mxu0 }
 0x34b   : > { %v7076_v40 = vpop.f32.mrf.mxu1  ;;  %v9385_v45 = vpop.xlane.xlu0 %5114 }
 0x34c   : > { %9728 = vst [vmem:[#allocation27_spill] sm:$0xff] %v9379_v33  ;;  %v9383_v63 = vpop.f32.mrf.mxu0  ;;  %9730 = vst [vmem:[#allocation29_spill] sm:$0xff] %v9385_v45  ;;  %v9387_v4 = vpop.xlane.xlu1 %5216  ;;  %v5030_v40 = vadd.f32 %v5029_v38, %v5013_v42 }
 0x34d   : > { %v3932_v56 = vpop.f32.mrf.mxu1  ;;  %9731 = vst [vmem:[#allocation30_spill] sm:$0xff] %v9387_v4 }
 0x34e   : > { %v7096_v61 = vpop.f32.mrf.mxu0 }
 0x34f   : > { %v7077_v3 = vpop.f32.mrf.mxu1  ;;  %v5016_v41 = vpop.xlane.xlu0 %5015 }
 0x350   : > { %v9389_v9 = vpop.f32.mrf.mxu0  ;;  %v4909_v36 = vpop.xlane.xlu1 %4908  ;;  %v5031_v25 = vadd.f32 %v5030_v40, %v5016_v41 }
 0x351   : > { %v9391_v21 = vpop.f32.mrf.mxu1  ;;  %v4925_v16 = vadd.f32 %v4924_v1, %v4909_v36 }
 0x352   : > { %v7097_v24 = vpop.f32.mrf.mxu0 }
 0x353   : > { %v7140_v8 = vpop.f32.mrf.mxu1  ;;  %v9397_v56 = vpop.xlane.xlu0 %5219 }
 0x354   : > { %v9393_v49 = vpop.f32.mrf.mxu0  ;;  %9732 = vst [vmem:[#allocation31_spill] sm:$0xff] %v9397_v56  ;;  %v9399_v45 = vpop.xlane.xlu1 %5117 }
 0x355   : > { %v9395_v18 = vpop.f32.mrf.mxu1  ;;  %9733 = vst [vmem:[#allocation32_spill] sm:$0xff] %v9399_v45 }
 0x356   : > { %v7100_v3 = vpop.f32.mrf.mxu0 }
 0x357   : > { %v7141_v61 = vpop.f32.mrf.mxu1  ;;  %v4913_v47 = vpop.xlane.xlu0 %4912 }
 0x358   : > { %v9401_v4 = vpop.f32.mrf.mxu0  ;;  %v5019_v24 = vpop.xlane.xlu1 %5018  ;;  %v4927_v38 = vsel %vm1705_vm4, %v4913_v47, 0.0 }
 0x359   : > { %v9403_v29 = vpop.f32.mrf.mxu1  ;;  %v5032_v39 = vsel %vm1705_vm4, %v5019_v24, 0.0  ;;  %v4928_v14 = vadd.f32 %v4927_v38, %v4925_v16 }
 0x35a   : > { %v7101_v8 = vpop.f32.mrf.mxu0  ;;  %v5033_v56 = vadd.f32 %v5032_v39, %v5031_v25 }
 0x35b   : > { %v7144_v42 = vpop.f32.mrf.mxu1  ;;  %v4929_v41 = vrot.slane %v4928_v14, 4 }
 0x35c   : > { %v9407_v19 = vpop.f32.mrf.mxu0  ;;  %v5034_v1 = vrot.slane %v5033_v56, 4 }
 0x35d   : > { %v9409_v3 = vpop.f32.mrf.mxu1  ;;  %v4930_v61 = vadd.f32 %v4929_v41, %v4928_v14 }
 0x35e   : > { %v7104_v36 = vpop.f32.mrf.mxu0  ;;  %v5035_v45 = vadd.f32 %v5034_v1, %v5033_v56 }
 0x35f   : > { %v7145_v40 = vpop.f32.mrf.mxu1  ;;  %v4931_v42 = vrot.slane %v4930_v61, 2 }
 0x360   : > { %v9411_v44 = vpop.f32.mrf.mxu0  ;;  %v5036_v47 = vrot.slane %v5035_v45, 2 }
 0x361   : > { %v9413_v8 = vpop.f32.mrf.mxu1  ;;  %v4932_v16 = vadd.f32 %v4931_v42, %v4930_v61 }
 0x362   : > { %v7105_v35 = vpop.f32.mrf.mxu0  ;;  %v5037_v39 = vadd.f32 %v5036_v47, %v5035_v45 }
 0x363   : > { %v7148_v24 = vpop.f32.mrf.mxu1  ;;  %v4933_v2 = vrot.slane %v4932_v16, 1 }
 0x364   : > { %v9415_v25 = vpop.f32.mrf.mxu0  ;;  %v5038_v33 = vrot.slane %v5037_v39, 1 }
 0x365   : > { %v9417_v38 = vpop.f32.mrf.mxu1  ;;  %v4934_v14 = vadd.f32 %v4933_v2, %v4932_v16 }
 0x366   : > { %v7108_v36 = vpop.f32.mrf.mxu0  ;;  %v5039_v56 = vadd.f32 %v5038_v33, %v5037_v39 }
 0x367   : > { %v7149_v40 = vpop.f32.mrf.mxu1 }
 0x368   : > { %v9419_v41 = vpop.f32.mrf.mxu0  ;;  %v9423_v0 = vadd.f32 %v5039_v56, %v4934_v14 }
 0x369   : > { %v9421_v1 = vpop.f32.mrf.mxu1 }
 0x36a   : > { %9734 = vst [vmem:[#allocation33_spill] sm:$0xff] %v9423_v0  ;;  %v7109_v35 = vpop.f32.mrf.mxu0 }
 0x36b   : > { %v7152_v24 = vpop.f32.mrf.mxu1 }
 0x36c   : > { %v9425_v61 = vpop.f32.mrf.mxu0 }
 0x36d   : > { %v9427_v45 = vpop.f32.mrf.mxu1 }
 0x36e   : > { %v7112_v42 = vpop.f32.mrf.mxu0 }
 0x36f   : > { %v7153_v47 = vpop.f32.mrf.mxu1 }
 0x370   : > { %v9429_v7 = vpop.f32.mrf.mxu0 }
 0x371   : > { %v9431_v36 = vpop.f32.mrf.mxu1 }
 0x372   : > { %v7113_v2 = vpop.f32.mrf.mxu0 }
 0x373   : > { %v7156_v33 = vpop.f32.mrf.mxu1 }
 0x374   : > { %v9433_v16 = vpop.f32.mrf.mxu0 }
 0x375   : > { %v9435_v39 = vpop.f32.mrf.mxu1 }
 0x376   : > { %v7116_v40 = vpop.f32.mrf.mxu0 }
 0x377   : > { %v7157_v14 = vpop.f32.mrf.mxu1  ;;  %v4209_v40 = vadd.f32 %v9383_v63, %v9311_v43  ;;  %v6256_v63 = vunpack.c.h.bf16 %v9209_v23 }
 0x378   : > { %v9437_v56 = vpop.f32.mrf.mxu0 }
 0x379   : > { %9735 = vst [vmem:[#allocation34_spill] sm:$0xff] %v9437_v56  ;;  %v9439_v35 = vpop.f32.mrf.mxu1  ;;  %v4399_v56 = vadd.f32 %v9391_v21, %v4209_v40  ;;  %v4211_v21 = vadd.f32 %v9393_v49, %v9321_v13  ;;  %v4212_v13 = vadd.f32 %v9401_v4, %v9326_v55  ;;  %v5185_v49 = vand.u32 2147483647, %v6256_v63  ;;  %v9484_v55 = vld [vmem:[%s9463_s21 + $0x28] sm:$0xff]  ;;  %v9487_v4 = vld [vmem:[%s9463_s21 + $0x30] sm:$0xff] }
 0x37a   : > { %9736 = vst [vmem:[#allocation35_spill] sm:$0xff] %v9439_v35  ;;  %v7117_v24 = vpop.f32.mrf.mxu0 }
 0x37b   : > { %v7160_v0 = vpop.f32.mrf.mxu1 }
 0x37c   : > { %v9441_v42 = vpop.f32.mrf.mxu0  ;;  %v9453_v0 = vld [vmem:[%s9670_s9] ss:$0 sm:$0xff] }
 0x37d   : > { %9737 = vst [vmem:[#allocation36_spill] sm:$0xff] %v9441_v42  ;;  %v9443_v47 = vpop.f32.mrf.mxu1 }
 0x37e   : > { %v7120_v58 = vpop.f32.mrf.mxu0 }
 0x37f   : > { %v7161_v22 = vpop.f32.mrf.mxu1  ;;  %v4210_v58 = vadd.f32 %v9389_v9, %v9316_v53 }
 0x380   : > { %v4206_v2 = vpop.f32.mrf.mxu0 }
 0x381   : > { %v9445_v33 = vpop.f32.mrf.mxu1  ;;  %v4400_v42 = vadd.f32 %v9395_v18, %v4210_v58  ;;  %v4672_v18 = vld [vmem:[%s9463_s21] sm:$0xff] }
 0x382   : > { %9738 = vst [vmem:[#allocation37_spill] sm:$0xff] %v9445_v33  ;;  %v7121_v14 = vpop.f32.mrf.mxu0 }
 0x383   : > { %v7164_v31 = vpop.f32.mrf.mxu1 }
 0x384   : > { %v4559_v24 = vpop.f32.mrf.mxu0 }
 0x385   : > { %v4396_v35 = vpop.f32.mrf.mxu1  ;;  %v4613_v22 = vadd.f32 %v4559_v24, %v4399_v56 }
 0x386   : > { %v7184_v33 = vpop.f32.mrf.mxu0  ;;  %v6232_v35 = vunpack.c.h.bf16 %v9270_v57 }
 0x387   : > { %v7165_v2 = vpop.f32.mrf.mxu1  ;;  %v4633_v43 = vadd.f32 %v9453_v0, %v4613_v22  ;;  %v4401_v33 = vadd.f32 %v9403_v29, %v4211_v21  ;;  %v4673_v29 = vld [vmem:[%s9463_s21 + $0x8] sm:$0xff]  ;;  %v9493_v21 = vld [vmem:[%s9463_s21 + $0x38] sm:$0xff] }
 0x388   : > { %v4562_v31 = vpop.f32.mrf.mxu0  ;;  %v5082_v22 = vand.u32 2147483647, %v6232_v35  ;;  %v4674_v2 = vld [vmem:[%s9463_s21 + $0x10] sm:$0xff] }
 0x389   : > { %v4646_v53 = vadd.f32 %v4633_v43, %v8478_v11  ;;  %v4614_v9 = vadd.f32 %v4562_v31, %v4400_v42  ;;  %v4675_v43 = vld [vmem:[%s9463_s21 + $0x18] sm:$0xff] }
 0x38a   : > { %v7185_v56 = vpop.f32.mrf.mxu0 }
 0x38b   : > { %v4634_v40 = vadd.f32 %v9453_v0, %v4614_v9  ;;  %v4659_v23 = vmul.f32 %v4646_v53, %v8217_v34  ;;  %v9481_v34 = vld [vmem:[%s9463_s21 + $0x20] sm:$0xff]  ;;  %v9499_v9 = vld [vmem:[%s9463_s21 + $0x48] sm:$0xff]  ;;  %v9739_v56 = vmov 0.0  }
 0x38c   : > { %v4567_v11 = vpop.f32.mrf.mxu0  ;;  %v9496_v53 = vld [vmem:[%s9463_s21 + $0x40] sm:$0xff] }
 0x38d   : > { %v4647_v42 = vadd.f32 %v4634_v40, %v8503_v60  ;;  %v4615_v14 = vadd.f32 %v4567_v11, %v4401_v33  ;;  %v5252_v24 = vand.u32 2147483647, %v4659_v23  ;;  %v4685_v57 = vadd.f32 %v4672_v18, %v4659_v23  ;;  %v9515_v40 = vld [vmem:[%s9463_s21 + $0x58] sm:$0xff]  ;;  %v9518_v23 = vld [vmem:[%s9463_s21 + $0x60] sm:$0xf] }
 0x38e   : > { %v7188_v58 = vpop.f32.mrf.mxu0  ;;  %v4402_v60 = vadd.f32 %v9409_v3, %v4212_v13  ;;  %v4213_v3 = vadd.f32 %v9407_v19, %v9331_v59  ;;  %v5221_v33 = vsel %vm689_vm2, %v5185_v49, 0.0  ;;  %9740 = vst [vmem:[#allocation38_spill] sm:$0xff] %v9518_v23  ;;  %v4214_v23 = vadd.f32 %v9411_v44, %v9336_v28 }
 0x38f   : > { %v4635_v31 = vadd.f32 %v9453_v0, %v4615_v14  ;;  %5265 = vadd.xlane.f32.xlu1 %v5252_v24  ;;  %vm4698_vm1 = vcmp.ge.f32.partialorder %v4685_v57, 1.0  ;;  %v4660_v63 = vmul.f32 %v4647_v42, %v8231_v27  ;;  %v9512_v27 = vld [vmem:[%s9463_s21 + $0x50] sm:$0xff] }
 0x390   : > { %v6017_v18 = vsel %vm4698_vm1, 1.0, %v9739_v56  ;;  %v4570_v35 = vpop.f32.mrf.mxu0  ;;  %v4403_v19 = vadd.f32 %v9413_v8, %v4213_v3  ;;  %v4404_v3 = vadd.f32 %v9417_v38, %v4214_v23 }
 0x391   : > { %v4648_v13 = vadd.f32 %v4635_v31, %v8535_v15  ;;  %v4737_v11 = vsub.f32 %v4685_v57, %v6017_v18  ;;  %v4616_v42 = vadd.f32 %v4570_v35, %v4402_v60  ;;  %v5253_v14 = vand.u32 2147483647, %v4660_v63 }
 0x392   : > { %v7189_v24 = vpop.f32.mrf.mxu0  ;;  %v4686_v59 = vadd.f32 %v4673_v29, %v4660_v63  ;;  %v5122_v57 = vsel %vm4910_vm3, %v5082_v22, 0.0  ;;  %v4215_v35 = vadd.f32 %v9415_v25, %v9343_v12  ;;  %v4216_v25 = vadd.f32 %v9419_v41, %v9346_v30 }
 0x393   : > { %v4636_v58 = vadd.f32 %v9453_v0, %v4616_v42  ;;  %5222 = vadd.xlane.f32.xlu1 %v5221_v33  ;;  %5267 = vadd.xlane.f32.xlu0 %v5253_v14  ;;  %v4661_v49 = vmul.f32 %v4648_v13, %v8237_v32  ;;  %4750 = vst [vmem:[%s9505_s25] sm:$0xff] %v4737_v11 }
 0x394   : > { %vm4699_vm2 = vcmp.ge.f32.partialorder %v4686_v59, 1.0  ;;  %v4575_v15 = vpop.f32.mrf.mxu0  ;;  %v4405_v14 = vadd.f32 %v9421_v1, %v4215_v35 }
 0x395   : > { %v4649_v60 = vadd.f32 %v4636_v58, %v8554_v5  ;;  %v6018_v8 = vsel %vm4699_vm2, 1.0, %v9739_v56  ;;  %v4617_v32 = vadd.f32 %v4575_v15, %v4403_v19  ;;  %v5254_v29 = vand.u32 2147483647, %v4661_v49 }
 0x396   : > { %v4738_v31 = vsub.f32 %v4686_v59, %v6018_v8  ;;  %v6132_v63 = vpack.c.bf16 %v6018_v8, %v6017_v18  ;;  %v7192_v44 = vpop.f32.mrf.mxu0  ;;  %v4687_v28 = vadd.f32 %v4674_v2, %v4661_v49 }
 0x397   : > { %v4637_v22 = vadd.f32 %v9453_v0, %v4617_v32  ;;  %5123 = vadd.xlane.f32.xlu1 %v5122_v57  ;;  %5269 = vadd.xlane.f32.xlu0 %v5254_v29  ;;  %v4662_v5 = vmul.f32 %v4649_v60, %v8286_v6 }
 0x398   : > { %6133 = vst [vmem:[%s9533_s17] sm:$0xff] %v6132_v63   ;;  %vm4700_vm5 = vcmp.ge.f32.partialorder %v4687_v28, 1.0  ;;  %v4578_v33 = vpop.f32.mrf.mxu0  ;;  %4751 = vst [vmem:[%s9505_s25 + $0x8] sm:$0xff] %v4738_v31 }
 0x399   : > { %v4650_v18 = vadd.f32 %v4637_v22, %v8580_v46  ;;  %v6019_v2 = vsel %vm4700_vm5, 1.0, %v9739_v56  ;;  %v4618_v13 = vadd.f32 %v4578_v33, %v4404_v3  ;;  %v5255_v38 = vand.u32 2147483647, %v4662_v5 }
 0x39a   : > { %v4739_v23 = vsub.f32 %v4687_v28, %v6019_v2  ;;  %v7193_v11 = vpop.f32.mrf.mxu0  ;;  %v4688_v42 = vadd.f32 %v4675_v43, %v4662_v5 }
 0x39b   : > { %v4638_v6 = vadd.f32 %v9453_v0, %v4618_v13  ;;  %5271 = vadd.xlane.f32.xlu0 %v5255_v38  ;;  %v4663_v12 = vmul.f32 %v4650_v18, %v8298_v52  ;;  %v4406_v52 = vadd.f32 %v9427_v45, %v4216_v25  ;;  %v9741_v11 = vld [vmem:[#allocation35_spill] sm:$0xff] }
 0x39c   : > { %vm4701_vm11 = vcmp.ge.f32.partialorder %v4688_v42, 1.0  ;;  %v4583_v46 = vpop.f32.mrf.mxu0  ;;  %4752 = vst [vmem:[%s9505_s25 + $0x10] sm:$0xff] %v4739_v23  ;;  %v9745_v25 = vld [vmem:[#allocation11_spill] sm:$0xff] }
 0x39d   : > { %v4651_v24 = vadd.f32 %v4638_v6, %v8608_v20  ;;  %v6020_v59 = vsel %vm4701_vm11, 1.0, %v9739_v56  ;;  %v4619_v43 = vadd.f32 %v4583_v46, %v4405_v14  ;;  %v5256_v19 = vand.u32 2147483647, %v4663_v12  ;;  %v9743_v14 = vld [vmem:[#allocation24_spill] sm:$0xff]  ;;  %v9744_v6 = vld [vmem:[#allocation34_spill] sm:$0xff] }
 0x39e   : > { %v4740_v1 = vsub.f32 %v4688_v42, %v6020_v59  ;;  %v6135_v58 = vpack.c.bf16 %v6020_v59, %v6019_v2  ;;  %v7196_v49 = vpop.f32.mrf.mxu0  ;;  %v4689_v15 = vadd.f32 %v9481_v34, %v4663_v12  ;;  %v4217_v20 = vadd.f32 %v9425_v61, %v9353_v37 }
 0x39f   : > { %v4639_v30 = vadd.f32 %v9453_v0, %v4619_v43  ;;  %5273 = vadd.xlane.f32.xlu0 %v5256_v19  ;;  %v4664_v41 = vmul.f32 %v4651_v24, %v8307_v50  ;;  %v4218_v61 = vadd.f32 %v9429_v7, %v9358_v10  ;;  %v4220_v12 = vadd.f32 %v9744_v6, %v9743_v14  ;;  %v9746_v24 = vld [vmem:[#allocation7_spill] sm:$0xff] }
 0x3a0   : > { %6267 = vst [vmem:[%s9533_s17 + $0x8] sm:$0xff] %v6135_v58   ;;  %vm4702_vm12 = vcmp.ge.f32.partialorder %v4689_v15, 1.0  ;;  %v4586_v57 = vpop.f32.mrf.mxu0  ;;  %4753 = vst [vmem:[%s9505_s25 + $0x18] sm:$0xff] %v4740_v1  ;;  %v4407_v50 = vadd.f32 %v9431_v36, %v4217_v20  ;;  %v6260_v46 = vunpack.c.h.bf16 %v9745_v25 }
 0x3a1   : > { %v4652_v60 = vadd.f32 %v4639_v30, %v8624_v48  ;;  %v6021_v8 = vsel %vm4702_vm12, 1.0, %v9739_v56  ;;  %v4620_v34 = vadd.f32 %v4586_v57, %v4406_v52  ;;  %v5257_v32 = vand.u32 2147483647, %v4664_v41  ;;  %v9748_v57 = vld [vmem:[#allocation27_spill] sm:$0xff] }
 0x3a2   : > { %v4741_v45 = vsub.f32 %v4689_v15, %v6021_v8  ;;  %v7197_v29 = vpop.f32.mrf.mxu0  ;;  %v4690_v31 = vadd.f32 %v9484_v55, %v4664_v41  ;;  %v4410_v52 = vadd.f32 %v9443_v47, %v4220_v12  ;;  %v9747_v41 = vld [vmem:[#allocation3_spill] sm:$0xff] }
 0x3a3   : > { %v4640_v63 = vadd.f32 %v9453_v0, %v4620_v34  ;;  %5275 = vadd.xlane.f32.xlu0 %v5257_v32  ;;  %v4665_v37 = vmul.f32 %v4652_v60, %v8319_v62  ;;  %v4408_v62 = vadd.f32 %v9435_v39, %v4218_v61  ;;  %v9749_v60 = vld [vmem:[#allocation36_spill] sm:$0xff]  ;;  %v5187_v32 = vand.u32 2147483647, %v6260_v46  ;;  %v9751_v61 = vld [vmem:[#allocation37_spill] sm:$0xff] }
 0x3a4   : > { %vm4703_vm13 = vcmp.ge.f32.partialorder %v4690_v31, 1.0  ;;  %v4591_v48 = vpop.f32.mrf.mxu0  ;;  %4754 = vst [vmem:[%s9505_s25 + $0x20] sm:$0xff] %v4741_v45  ;;  %v9750_v45 = vld [vmem:[#allocation8_spill] sm:$0xff] }
 0x3a5   : > { %v4653_v44 = vadd.f32 %v4640_v63, %v8630_v17  ;;  %v6022_v28 = vsel %vm4703_vm13, 1.0, %v9739_v56  ;;  %v4621_v55 = vadd.f32 %v4591_v48, %v4407_v50  ;;  %v5258_v3 = vand.u32 2147483647, %v4665_v37 }
 0x3a6   : > { %v4742_v36 = vsub.f32 %v4690_v31, %v6022_v28  ;;  %v6138_v22 = vpack.c.bf16 %v6022_v28, %v6021_v8  ;;  %v7200_v5 = vpop.f32.mrf.mxu0  ;;  %v4691_v35 = vadd.f32 %v9487_v4, %v4665_v37  ;;  %v4219_v17 = vadd.f32 %v9433_v16, %v9366_v54  ;;  %v9742_v54 = vld [vmem:[#allocation2_spill] sm:$0xff]  ;;  %v9752_v28 = vld [vmem:[#allocation4_spill] sm:$0xff] }
 0x3a7   : > { %v4641_v7 = vadd.f32 %v9453_v0, %v4621_v55  ;;  %5277 = vadd.xlane.f32.xlu0 %v5258_v3  ;;  %v4666_v10 = vmul.f32 %v4653_v44, %v8328_v51  ;;  %v4221_v8 = vadd.f32 %v9749_v60, %v9748_v57  ;;  %v5121_v57 = vpop.xlane.xlu0 %5120  ;;  %v9764_v60 = vld [vmem:[#allocation28_spill] sm:$0xff] }
 0x3a8   : > { %6268 = vst [vmem:[%s9533_s17 + $0x10] sm:$0xff] %v6138_v22   ;;  %vm4704_vm14 = vcmp.ge.f32.partialorder %v4691_v35, 1.0  ;;  %v4594_v33 = vpop.f32.mrf.mxu0  ;;  %4755 = vst [vmem:[%s9505_s25 + $0x28] sm:$0xff] %v4742_v36  ;;  %v4409_v51 = vadd.f32 %v9741_v11, %v4219_v17  ;;  %v5227_v36 = vsel %vm4910_vm3, %v5187_v32, 0.0  ;;  %v9753_v22 = vld [vmem:[#allocation9_spill] sm:$0xff] }
 0x3a9   : > { %v4654_v18 = vadd.f32 %v4641_v7, %v8638_v26  ;;  %v6023_v2 = vsel %vm4704_vm14, 1.0, %v9739_v56  ;;  %v4622_v4 = vadd.f32 %v4594_v33, %v4408_v62  ;;  %v5259_v13 = vand.u32 2147483647, %v4666_v10 }
 0x3aa   : > { %v4743_v39 = vsub.f32 %v4691_v35, %v6023_v2  ;;  %v7201_v38 = vpop.f32.mrf.mxu0  ;;  %v4692_v23 = vadd.f32 %v9493_v21, %v4666_v10  ;;  %v4411_v48 = vadd.f32 %v9751_v61, %v4221_v8  ;;  %v9769_v61 = vld [vmem:[#allocation18_spill] sm:$0xff] }
 0x3ab   : > { %v4642_v42 = vadd.f32 %v9453_v0, %v4622_v4  ;;  %5279 = vadd.xlane.f32.xlu0 %v5259_v13  ;;  %v4667_v16 = vmul.f32 %v4654_v18, %v9742_v54 }
 0x3ac   : > { %vm4705_vm15 = vcmp.ge.f32.partialorder %v4692_v23, 1.0  ;;  %v4599_v26 = vpop.f32.mrf.mxu0  ;;  %4756 = vst [vmem:[%s9505_s25 + $0x30] sm:$0xff] %v4743_v39  ;;  %v9755_v39 = vld [vmem:[#allocation10_spill] sm:$0xff] }
 0x3ad   : > { %v4655_v59 = vadd.f32 %v4642_v42, %v9746_v24  ;;  %v6024_v21 = vsel %vm4705_vm15, 1.0, %v9739_v56  ;;  %v4623_v43 = vadd.f32 %v4599_v26, %v4409_v51  ;;  %v5260_v19 = vand.u32 2147483647, %v4667_v16  ;;  %v9756_v42 = vld [vmem:[#allocation6_spill] sm:$0xff] }
 0x3ae   : > { %v4744_v1 = vsub.f32 %v4692_v23, %v6024_v21  ;;  %v6141_v58 = vpack.c.bf16 %v6024_v21, %v6023_v2  ;;  %v7204_v49 = vpop.f32.mrf.mxu0  ;;  %v4693_v15 = vadd.f32 %v9496_v53, %v4667_v16  ;;  %v9754_v2 = vld [vmem:[#allocation5_spill] sm:$0xff]  ;;  %v9757_v26 = vld [vmem:[#allocation38_spill] sm:$0xff] }
 0x3af   : > { %v4643_v30 = vadd.f32 %v9453_v0, %v4623_v43  ;;  %5281 = vadd.xlane.f32.xlu1 %v5260_v19  ;;  %v4668_v20 = vmul.f32 %v4655_v59, %v9747_v41  ;;  %v9758_v21 = vld [vmem:[#allocation13_spill] sm:$0xff] }
 0x3b0   : > { %6269 = vst [vmem:[%s9533_s17 + $0x18] sm:$0xff] %v6141_v58   ;;  %vm4706_vm0 = vcmp.ge.f32.partialorder %v4693_v15, 1.0  ;;  %v4602_v34 = vpop.f32.mrf.mxu0  ;;  %4757 = vst [vmem:[%s9505_s25 + $0x38] sm:$0xff] %v4744_v1  ;;  %v9759_v43 = vld [vmem:[#allocation17_spill] sm:$0xff]  ;;  %v9760_v1 = vld [vmem:[#allocation20_spill] sm:$0xff] }
 0x3b1   : > { %v4656_v29 = vadd.f32 %v4643_v30, %v9750_v45  ;;  %v6025_v53 = vsel %vm4706_vm0, 1.0, %v9739_v56  ;;  %v4624_v31 = vadd.f32 %v4602_v34, %v4410_v52  ;;  %v5261_v47 = vand.u32 2147483647, %v4668_v20  ;;  %v9761_v49 = vld [vmem:[#allocation21_spill] sm:$0xff]  ;;  %v9762_v52 = vld [vmem:[#allocation23_spill] sm:$0xff]  ;;  %v5226_v34 = vpop.xlane.xlu0 %5225 }
 0x3b2   : > { %v4745_v50 = vsub.f32 %v4693_v15, %v6025_v53  ;;  %v7205_v63 = vpop.f32.mrf.mxu0  ;;  %v4694_v37 = vadd.f32 %v9499_v9, %v4668_v20  ;;  %v5128_v19 = vadd.f32 %v9759_v43, %v9758_v21  ;;  %v9763_v41 = vld [vmem:[#allocation25_spill] sm:$0xff] }
 0x3b3   : > { %v4644_v44 = vadd.f32 %v9453_v0, %v4624_v31  ;;  %5283 = vadd.xlane.f32.xlu0 %v5261_v47  ;;  %v4669_v55 = vmul.f32 %v4656_v29, %v9752_v28  ;;  %v9766_v29 = vld [vmem:[#allocation12_spill] sm:$0xff] }
 0x3b4   : > { %vm4707_vm6 = vcmp.ge.f32.partialorder %v4694_v37, 1.0  ;;  %v4607_v3 = vpop.f32.mrf.mxu0  ;;  %4758 = vst [vmem:[%s9505_s25 + $0x40] sm:$0xff] %v4745_v50  ;;  %v5129_v58 = vadd.f32 %v5128_v19, %v9760_v1  ;;  %v9768_v47 = vld [vmem:[#allocation32_spill] sm:$0xff] }
 0x3b5   : > { %v4657_v5 = vadd.f32 %v4644_v44, %v9753_v22  ;;  %v6026_v35 = vsel %vm4707_vm6, 1.0, %v9739_v56  ;;  %v4625_v62 = vadd.f32 %v4607_v3, %v4411_v48  ;;  %v5262_v9 = vand.u32 2147483647, %v4669_v55 }
 0x3b6   : > { %v4746_v7 = vsub.f32 %v4694_v37, %v6026_v35  ;;  %v6144_v10 = vpack.c.bf16 %v6026_v35, %v6025_v53  ;;  %v7208_v17 = vpop.f32.mrf.mxu0  ;;  %v4695_v33 = vadd.f32 %v9512_v27, %v4669_v55  ;;  %v5130_v15 = vadd.f32 %v5129_v58, %v9761_v49  ;;  %v9767_v53 = vld [vmem:[#allocation15_spill] sm:$0xff] }
 0x3b7   : > { %v4645_v18 = vadd.f32 %v9453_v0, %v4625_v62  ;;  %5228 = vadd.xlane.f32.xlu0 %v5227_v36  ;;  %5285 = vadd.xlane.f32.xlu1 %v5262_v9  ;;  %v4670_v4 = vmul.f32 %v4657_v5, %v9754_v2  ;;  %v5231_v31 = vadd.f32 %v9767_v53, %v9766_v29  ;;  %v9770_v36 = vld [vmem:[#allocation14_spill] sm:$0xff]  ;;  %v9771_v9 = vld [vmem:[#allocation16_spill] sm:$0xff] }
 0x3b8   : > { %6270 = vst [vmem:[%s9533_s17 + $0x20] sm:$0xff] %v6144_v10   ;;  %vm4708_vm7 = vcmp.ge.f32.partialorder %v4695_v33, 1.0  ;;  %v4610_v13 = vpop.f32.mrf.mxu0  ;;  %4759 = vst [vmem:[%s9505_s25 + $0x48] sm:$0xff] %v4746_v7  ;;  %v5131_v30 = vadd.f32 %v5130_v15, %v9762_v52 }
 0x3b9   : > { %v4658_v38 = vadd.f32 %v4645_v18, %v9755_v39  ;;  %v6027_v23 = vsel %vm4708_vm7, 1.0, %v9739_v56  ;;  %v5263_v11 = vand.u32 2147483647, %v4670_v4  ;;  %v4696_v27 = vadd.f32 %v9515_v40, %v4670_v4  ;;  %v9772_v18 = vld [vmem:[#allocation19_spill] sm:$0xff] }
 0x3ba   : > { %v4747_v51 = vsub.f32 %v4695_v33, %v6027_v23  ;;  %v7209_v0 = vpop.f32.mrf.mxu0  ;;  %v5132_v20 = vadd.f32 %v5131_v30, %v9763_v41  ;;  %v5232_v48 = vadd.f32 %v5231_v31, %v9769_v61 }
 0x3bb   : > { %5287 = vadd.xlane.f32.xlu1 %v5263_v11  ;;  %vm4709_vm8 = vcmp.ge.f32.partialorder %v4696_v27, 1.0  ;;  %v4671_v54 = vmul.f32 %v4658_v38, %v9756_v42  ;;  %v9773_v38 = vld [vmem:[#allocation22_spill] sm:$0xff] }
 0x3bc   : > { %v6028_v16 = vsel %vm4709_vm8, 1.0, %v9739_v56  ;;  %4760 = vst [vmem:[%s9505_s25 + $0x50] sm:$0xff] %v4747_v51  ;;  %v5133_v8 = vadd.f32 %v5132_v20, %v9764_v60  ;;  %v5233_v22 = vadd.f32 %v5232_v48, %v9770_v36  ;;  %v9775_v0 = vld [vmem:[#allocation26_spill] sm:$0xff] }
 0x3bd   : > { %v4748_v14 = vsub.f32 %v4696_v27, %v6028_v16  ;;  %v6147_v6 = vpack.c.bf16 %v6028_v16, %v6027_v23  ;;  %v5264_v12 = vand.u32 2147483647, %v4671_v54  ;;  %v4697_v25 = vadd.f32 %v9757_v26, %v4671_v54  ;;  %v9774_v27 = vld [vmem:[#allocation33_spill] sm:$0xff] }
 0x3be   : > { %v5234_v7 = vadd.f32 %v5233_v22, %v9771_v9 }
 0x3bf   : > { %6271 = vst [vmem:[%s9533_s17 + $0x28] sm:$0xff] %v6147_v6   ;;  %4761 = vst [vmem:[%s9505_s25 + $0x58] sm:$0xff] %v4748_v14  ;;  %v5290_v40 = vsel %vm5289_vm9, %v5264_v12, 0.0  ;;  %vm4710_vm10 = vcmp.ge.f32.partialorder %v4697_v25, 1.0  ;;  %v9776_v14 = vld [vmem:[#allocation30_spill] sm:$0xff] }
 0x3c0   : > { %5291 = vadd.xlane.f32.xlu0 %v5290_v40  ;;  %v6029_v46 = vsel %vm4710_vm10, 1.0, %v9739_v56  ;;  %v9765_v56 = vld [vmem:[#allocation29_spill] sm:$0xff]  ;;  %v5235_v2 = vadd.f32 %v5234_v7, %v9772_v18  ;;  %v9777_v40 = vld [vmem:[#allocation31_spill] sm:$0xff] }
 0x3c1   : > { %v4749_v24 = vsub.f32 %v4697_v25, %v6029_v46  ;;  %v6112_v59 = vpack.c.bf16 %v6029_v46, %v6029_v46  ;;  %v5134_v32 = vadd.f32 %v5133_v8, %v9765_v56 }
 0x3c2   : > { %v5236_v23 = vadd.f32 %v5235_v2, %v9773_v38 }
 0x3c3   : > { %4762 = vst [vmem:[%s9505_s25 + $0x60] sm:$0xf] %v4749_v24  ;;  %4828 = vst [vmem:[%s9533_s17 + $0x30] sm:$0x3] %v6112_v59  ;;  %v5135_v50 = vadd.f32 %v5134_v32, %v9768_v47 }
 0x3c4   : > { %v5237_v42 = vadd.f32 %v5236_v23, %v9775_v0 }
 0x3c5   : > { %v5136_v44 = vadd.f32 %v5135_v50, %v5121_v57 }
 0x3c6   : > { %v5238_v6 = vadd.f32 %v5237_v42, %v9776_v14 }
 0x3c8   : > { %v5239_v46 = vadd.f32 %v5238_v6, %v9777_v40 }
 0x418   : > { %v5266_v45 = vpop.xlane.xlu1 %5265 }
 0x41c   : > { %v5223_v63 = vpop.xlane.xlu1 %5222  ;;  %v5268_v37 = vpop.xlane.xlu0 %5267 }
 0x41d   : > { %v5293_v16 = vadd.f32 %v5268_v37, %v5266_v45  ;;  %v5240_v59 = vadd.f32 %v5239_v46, %v5223_v63 }
 0x41f   : > { %v5241_v58 = vadd.f32 %v5240_v59, %v5226_v34 }
 0x420   : > { %v5124_v28 = vpop.xlane.xlu1 %5123  ;;  %v5270_v55 = vpop.xlane.xlu0 %5269 }
 0x421   : > { %v5137_v3 = vsel %vm1705_vm4, %v5124_v28, 0.0  ;;  %v5294_v12 = vadd.f32 %v5293_v16, %v5270_v55 }
 0x422   : > { %v5138_v5 = vadd.f32 %v5137_v3, %v5136_v44 }
 0x424   : > { %v5139_v35 = vrot.slane %v5138_v5, 4  ;;  %v5272_v62 = vpop.xlane.xlu0 %5271 }
 0x425   : > { %v5295_v25 = vadd.f32 %v5294_v12, %v5272_v62 }
 0x426   : > { %v5140_v10 = vadd.f32 %v5139_v35, %v5138_v5 }
 0x428   : > { %v5141_v17 = vrot.slane %v5140_v10, 2  ;;  %v5274_v33 = vpop.xlane.xlu0 %5273 }
 0x429   : > { %v5296_v24 = vadd.f32 %v5295_v25, %v5274_v33 }
 0x42a   : > { %v5142_v4 = vadd.f32 %v5141_v17, %v5140_v10 }
 0x42c   : > { %v5143_v13 = vrot.slane %v5142_v4, 1  ;;  %v5276_v39 = vpop.xlane.xlu0 %5275 }
 0x42d   : > { %v5297_v19 = vadd.f32 %v5296_v24, %v5276_v39 }
 0x42e   : > { %v5144_v11 = vadd.f32 %v5143_v13, %v5142_v4 }
 0x430   : > { %v5145_v51 = vadd.f32 %v5144_v11, %v9774_v27  ;;  %v5278_v54 = vpop.xlane.xlu0 %5277 }
 0x431   : > { %v5298_v1 = vadd.f32 %v5297_v19, %v5278_v54 }
 0x434   : > { %v5280_v26 = vpop.xlane.xlu0 %5279 }
 0x435   : > { %v5299_v52 = vadd.f32 %v5298_v1, %v5280_v26 }
 0x438   : > { %v5282_v21 = vpop.xlane.xlu1 %5281 }
 0x439   : > { %v5300_v20 = vadd.f32 %v5299_v52, %v5282_v21 }
 0x43c   : > { %v5284_v43 = vpop.xlane.xlu0 %5283 }
 0x43d   : > { %v5301_v60 = vadd.f32 %v5300_v20, %v5284_v43 }
 0x440   : > { %v5229_v49 = vpop.xlane.xlu0 %5228  ;;  %v5286_v15 = vpop.xlane.xlu1 %5285 }
 0x441   : > { %v5242_v30 = vsel %vm1705_vm4, %v5229_v49, 0.0  ;;  %v5302_v32 = vadd.f32 %v5301_v60, %v5286_v15 }
 0x442   : > { %v5243_v41 = vadd.f32 %v5242_v30, %v5241_v58 }
 0x444   : > { %v5244_v57 = vrot.slane %v5243_v41, 4  ;;  %v5288_v56 = vpop.xlane.xlu1 %5287 }
 0x445   : > { %v5303_v29 = vadd.f32 %v5302_v32, %v5288_v56 }
 0x446   : > { %v5245_v8 = vadd.f32 %v5244_v57, %v5243_v41 }
 0x448   : > { %v5246_v45 = vrot.slane %v5245_v8, 2 }
 0x449   : > { %v5292_v53 = vpop.xlane.xlu0 %5291 }
 0x44a   : > { %v5247_v31 = vadd.f32 %v5246_v45, %v5245_v8  ;;  %v5304_v47 = vsel %vm5289_vm9, %v5292_v53, 0.0 }
 0x44b   : > { %v5305_v34 = vadd.f32 %v5304_v47, %v5303_v29 }
 0x44c   : > { %v5248_v50 = vrot.slane %v5247_v31, 1 }
 0x44d   : > { %v5306_v63 = vrot.slane %v5305_v34, 4 }
 0x44e   : > { %v5249_v37 = vadd.f32 %v5248_v50, %v5247_v31 }
 0x44f   : > { %v5307_v61 = vadd.f32 %v5306_v63, %v5305_v34 }
 0x450   : > { %v5250_v48 = vadd.f32 %v5249_v37, %v5145_v51 }
 0x451   : > { %v5308_v44 = vrot.slane %v5307_v61, 2 }
 0x452   : > { %5251 = vst [vmem:[%s607_s16] sm:$0xff] %v5250_v48 }
 0x453   : > { %v5309_v28 = vadd.f32 %v5308_v44, %v5307_v61 }
 0x455   : > { %v5310_v55 = vrot.slane %v5309_v28, 1 }
 0x457   : > { %v5311_v3 = vadd.f32 %v5310_v55, %v5309_v28 }
 0x459   : > { %5312 = vst [vmem:[%s611_s23] sm:$0xff] %v5311_v3 }
 0x45a PF: > { %s26_s18 = sadd.s32 1, %s7385_s18  }
 0x45b   : > { %p23_p4 = scmp.ge.s32.totalorder %s26_s18, 4  }
 0x45d   :  { %25 = sbr.rel (!%p23_p4) target bundleno = 1 (0x1), region = 178 }

</bundles_post_ra>
